<compile_context>
chip_gen: v5e
topology: v5e:2x2
jax: 0.10.0
libtpu: 0.0.40
codegen_flags: <defaults>
</compile_context>

<pallas_src>
import functools

import jax
import jax.numpy as jnp
from jax import lax
from jax.experimental import pallas as pl
from jax.experimental.pallas import tpu as pltpu

EPS = 1e-5


# ----------------------------- Pallas kernels ------------------------------ #
def _make_conv_stats_kernel(Wo, Cin, Cp, taps):
    """Pass A: direct 3x3 conv (9 accumulated MXU dots) + per-tile BN partial stats."""

    def kernel(band_ref, w_ref, y_ref, stat_ref):
        band = band_ref[...]                    # (TM, 3*S, Wc, Cin)
        w = w_ref[...]                          # (9, Cin, Cp)
        tm = band.shape[0]
        m2 = tm * Wo
        z = jnp.zeros((m2, Cp), jnp.float32)    # f32 accumulator
        for t, (j, qx) in enumerate(taps):
            x = band[:, j, qx:qx + Wo, :]       # (TM, Wo, Cin), static slice
            x = x.reshape(m2, Cin)
            z = z + jnp.dot(x, w[t], preferred_element_type=jnp.float32)
        y_ref[...] = z.astype(y_ref.dtype)      # lane-dense (m2, Cp) store
        s1 = jnp.sum(z, axis=0, keepdims=True)          # (1, Cp) per-channel sum
        s2 = jnp.sum(z * z, axis=0, keepdims=True)      # (1, Cp) per-channel sumsq
        stat_ref[0] = jnp.concatenate([s1, s2], axis=0)

    return kernel


def _apply_bn_relu_kernel(y_ref, ss_ref, o_ref):
    """Pass B: folded BN affine + ReLU (one FMA + max per element)."""
    y = y_ref[...].astype(jnp.float32)
    o_ref[...] = jnp.maximum(y * ss_ref[0:1, :] + ss_ref[1:2, :], 0.0)


# ------------------------------- JAX glue ---------------------------------- #
def _pick_tile_rows(rows, Wo, max_tile_pixels):
    """Largest divisor of `rows` whose tile has <= max_tile_pixels output pixels."""
    best = 1
    for t in range(1, rows + 1):
        if rows % t == 0 and t * Wo <= max_tile_pixels:
            best = t
    return best


def _build_bands(x_nhwc, stride):
    """Row-band layout for a 3x3 / pad=1 conv: ~3x expansion instead of 9x im2col.

    Returns band (N*Ho, 3*stride, Wc, C) plus taps [(slab_index, col_offset)] such
    that output pixel (r, c), tap (dy, dx) reads band[r, slab, col_offset + c, :].
    """
    N, H, W, C = x_nhwc.shape
    xp = jnp.pad(x_nhwc, ((0, 0), (1, 1), (1, 1), (0, 0)))
    Ho = (H + 2 - 3) // stride + 1
    Wo = (W + 2 - 3) // stride + 1
    Wc = Wo + 2 // stride                       # columns per phase, incl. halo
    slabs = []
    for dy in range(3):
        rows = xp[:, dy:dy + stride * (Ho - 1) + 1:stride, :, :]              # (N,Ho,W+2,C)
        for p in range(stride):                                               # column phases
            slabs.append(rows[:, :, p:p + stride * (Wc - 1) + 1:stride, :])   # (N,Ho,Wc,C)
    band = jnp.stack(slabs, axis=2)                                           # (N,Ho,3*S,Wc,C)
    taps = [(dy * stride + dx % stride, dx // stride)
            for dy in range(3) for dx in range(3)]
    return band.reshape(N * Ho, 3 * stride, Wc, C), Ho, Wo, Wc, taps


def conv_bn_relu(x_nhwc, w_oihw, gamma, beta, stride, max_tile_pixels=2048):
    """Conv2d(3x3, pad=1, stride) + BatchNorm2d(training stats) + ReLU via Pallas."""
    N, H, W, Cin = x_nhwc.shape
    Cout = w_oihw.shape[0]
    Cp = ((Cout + 127) // 128) * 128            # lane-dense output channels
    Wo = (W + 2 - 3) // stride + 1
    # bf16 MXU operands (f32 accumulation) when the in-kernel row collapse is
    # bf16-tile aligned; otherwise (tiny toy Wo) keep f32 operands for robustness.
    use_bf16 = (Wo % 16 == 0)
    cdt = jnp.bfloat16 if use_bf16 else jnp.float32

    band, Ho, Wo, Wc, taps = _build_bands(x_nhwc.astype(cdt), stride)
    R = N * Ho
    M = R * Wo
    TM = _pick_tile_rows(R, Wo, max_tile_pixels)
    G = R // TM

    # PyTorch weight (Cout, Cin, 3, 3) -> per-tap (9, Cin, Cout_pad); tap t = dy*3+dx.
    w_taps = jnp.transpose(w_oihw, (2, 3, 1, 0)).reshape(9, Cin, Cout)
    w_taps = jnp.pad(w_taps, ((0, 0), (0, 0), (0, Cp - Cout))).astype(cdt)

    # Pass A: conv + partial BN stats, tiled over M, fully parallel grid axis.
    y, part = pl.pallas_call(
        _make_conv_stats_kernel(Wo, Cin, Cp, taps),
        out_shape=(
            jax.ShapeDtypeStruct((M, Cp), cdt),
            jax.ShapeDtypeStruct((G, 2, Cp), jnp.float32),
        ),
        grid=(G,),
        in_specs=[
            pl.BlockSpec((TM, 3 * stride, Wc, Cin), lambda i: (i, 0, 0, 0)),
            pl.BlockSpec((9, Cin, Cp), lambda i: (0, 0, 0)),
        ],
        out_specs=(
            pl.BlockSpec((TM * Wo, Cp), lambda i: (i, 0)),
            pl.BlockSpec((1, 2, Cp), lambda i: (i, 0, 0)),
        ),
        compiler_params=pltpu.CompilerParams(dimension_semantics=("parallel",)),
    )(band, w_taps)

    # Tiny per-channel reduction + folded BN affine (conv bias cancels vs batch mean).
    stats = jnp.sum(part, axis=0)                                 # (2, Cp)
    mean = stats[0] / M
    var = jnp.maximum(stats[1] / M - mean * mean, 0.0)            # biased variance
    gp = jnp.pad(gamma.astype(jnp.float32), (0, Cp - Cout))
    bp = jnp.pad(beta.astype(jnp.float32), (0, Cp - Cout))
    scale = gp * lax.rsqrt(var + EPS)
    shift = bp - mean * scale
    ss = jnp.stack([scale, shift], axis=0)                        # (2, Cp)

    # Pass B: normalize + ReLU, tiled over M, fully parallel grid axis.
    out = pl.pallas_call(
        _apply_bn_relu_kernel,
        out_shape=jax.ShapeDtypeStruct((M, Cp), jnp.float32),
        grid=(G,),
        in_specs=[
            pl.BlockSpec((TM * Wo, Cp), lambda i: (i, 0)),
            pl.BlockSpec((2, Cp), lambda i: (0, 0)),
        ],
        out_specs=pl.BlockSpec((TM * Wo, Cp), lambda i: (i, 0)),
        compiler_params=pltpu.CompilerParams(dimension_semantics=("parallel",)),
    )(y, ss)

    return out[:, :Cout].reshape(N, Ho, Wo, Cout)


# ------------------------- parameter initialization ------------------------ #
def init_params(key, in_ch, out_ch):
    def conv_init(k, cin, cout):
        fan_in = cin * 9
        bound = 1.0 / jnp.sqrt(jnp.float32(fan_in))
        kw, kb = jax.random.split(k)
        w = jax.random.uniform(kw, (cout, cin, 3, 3), jnp.float32, -bound, bound)
        b = jax.random.uniform(kb, (cout,), jnp.float32, -bound, bound)
        return w, b

    k1, k2, k3 = jax.random.split(key, 3)
    w1, b1 = conv_init(k1, in_ch, out_ch)
    w2, b2 = conv_init(k2, out_ch, out_ch)
    w3, b3 = conv_init(k3, out_ch, out_ch)
    bn = lambda c: (jnp.ones((c,), jnp.float32), jnp.zeros((c,), jnp.float32))
    g1, be1 = bn(out_ch)
    g2, be2 = bn(out_ch)
    g3, be3 = bn(out_ch)
    # NOTE: conv biases are kept for parameter parity but are unused in the forward
    # pass: BatchNorm's batch-mean subtraction cancels them exactly.
    # TODO(synk): BatchNorm running_mean/running_var buffer updates (a training-time
    # side effect that does not affect forward outputs) are not modeled.
    return dict(w1=w1, b1=b1, g1=g1, be1=be1,
                w2=w2, b2=b2, g2=g2, be2=be2,
                w3=w3, b3=b3, g3=g3, be3=be3)


# ------------------------------ module forward ----------------------------- #
def downsample_layer_forward(params, x_nchw, max_tile_pixels=2048):
    # External API is NCHW (PyTorch convention); compute runs in NHWC row-bands.
    x = jnp.transpose(x_nchw, (0, 2, 3, 1))
    h = conv_bn_relu(x, params["w1"], params["g1"], params["be1"], 1, max_tile_pixels)
    out = conv_bn_relu(h, params["w2"], params["g2"], params["be2"], 1, max_tile_pixels)
    out2 = conv_bn_relu(out, params["w3"], params["g3"], params["be3"], 2, max_tile_pixels)
    return jnp.transpose(out, (0, 3, 1, 2)), jnp.transpose(out2, (0, 3, 1, 2))


# --------------------------- pure-JAX reference ---------------------------- #
def _ref_block(x_nchw, w, b, gamma, beta, stride):
    y = lax.conv_general_dilated(
        x_nchw, w, (stride, stride), ((1, 1), (1, 1)),
        dimension_numbers=("NCHW", "OIHW", "NCHW"))
    y = y + b[None, :, None, None]
    mean = jnp.mean(y, axis=(0, 2, 3), keepdims=True)
    var = jnp.mean((y - mean) ** 2, axis=(0, 2, 3), keepdims=True)
    y = (y - mean) * lax.rsqrt(var + EPS)
    return jnp.maximum(y * gamma[None, :, None, None] + beta[None, :, None, None], 0.0)


def _ref_forward(p, x):
    h = _ref_block(x, p["w1"], p["b1"], p["g1"], p["be1"], 1)
    out = _ref_block(h, p["w2"], p["b2"], p["g2"], p["be2"], 1)
    out2 = _ref_block(out, p["w3"], p["b3"], p["g3"], p["be3"], 2)
    return out, out2


if __name__ == "__main__":
    key = jax.random.PRNGKey(0)
    k_param, k_x = jax.random.split(key)

    in_ch, out_ch = 4, 8
    N, H, W = 2, 16, 16

    params = init_params(k_param, in_ch, out_ch)
    x = jax.random.normal(k_x, (N, in_ch, H, W), jnp.float32)

    # Small tile budget at these toy shapes so the M-grid actually takes several
    # steps (exercises pipelining).  Real sizes: keep the ~2048-pixel default;
    # roughly halve it on v7x (64 MiB VMEM, 2 TCs).
    fwd = jax.jit(functools.partial(downsample_layer_forward, max_tile_pixels=64))

    out, out2 = fwd(params, x)
    out = jax.block_until_ready(out)
    out2 = jax.block_until_ready(out2)

    assert out.shape == (N, out_ch, H, W), out.shape
    assert out2.shape == (N, out_ch, H // 2, W // 2), out2.shape

    ref_out, ref_out2 = _ref_forward(params, x)
    # bf16 MXU operands vs a pure-f32 reference -> slightly loose tolerance.
    err1 = float(jnp.max(jnp.abs(out - ref_out)))
    err2 = float(jnp.max(jnp.abs(out2 - ref_out2)))
    assert jnp.allclose(out, ref_out, atol=5e-2, rtol=5e-2), err1
    assert jnp.allclose(out2, ref_out2, atol=5e-2, rtol=5e-2), err2

    print("KERNEL_OK")
</pallas_src>

<mosaic_0001>
module attributes {stable_mosaic.version = 11 : i64} {
  func.func @kernel(%arg0: i32, %arg1: memref<4x3x18x4xbf16, #tpu.memory_space<vmem>>, %arg2: memref<9x4x128xbf16, #tpu.memory_space<vmem>>, %arg3: memref<64x128xbf16, #tpu.memory_space<vmem>>, %arg4: memref<1x2x128xf32, #tpu.memory_space<vmem>>) attributes {dimension_semantics = [#tpu.dimension_semantics<parallel>], iteration_bounds = array<i64: 8>, scalar_prefetch = 0 : i64, scratch_operands = 0 : i64, tpu.core_type = #tpu.core_type<tc>, window_params = [{transform_indices = @transform_0, window_bounds = array<i64: 4, 3, 18, 4>}, {pipeline_mode = #tpu.pipeline_mode<synchronous>, transform_indices = @transform_1, window_bounds = array<i64: 9, 4, 128>}, {transform_indices = @transform_2, window_bounds = array<i64: 64, 128>}, {transform_indices = @transform_3, window_bounds = array<i64: 1, 2, 128>}]} {
    %c0 = arith.constant 0 : index
    %c0_0 = arith.constant 0 : index
    %c0_1 = arith.constant 0 : index
    %c0_2 = arith.constant 0 : index
    %0 = vector.load %arg1[%c0, %c0_0, %c0_1, %c0_2] : memref<4x3x18x4xbf16, #tpu.memory_space<vmem>>, vector<4x3x18x4xbf16>
    %c0_3 = arith.constant 0 : index
    %c0_4 = arith.constant 0 : index
    %c0_5 = arith.constant 0 : index
    %1 = vector.load %arg2[%c0_3, %c0_4, %c0_5] : memref<9x4x128xbf16, #tpu.memory_space<vmem>>, vector<9x4x128xbf16>
    %cst = arith.constant 0.000000e+00 : f32
    %2 = vector.broadcast %cst : f32 to vector<64x128xf32>
    %3 = vector.extract_strided_slice %0 {offsets = [0, 0, 0, 0], sizes = [4, 1, 16, 4], strides = [1, 1, 1, 1]} : vector<4x3x18x4xbf16> to vector<4x1x16x4xbf16>
    %4 = vector.shape_cast %3 : vector<4x1x16x4xbf16> to vector<4x16x4xbf16>
    %5 = vector.shape_cast %4 : vector<4x16x4xbf16> to vector<64x4xbf16>
    %6 = vector.extract_strided_slice %1 {offsets = [0, 0, 0], sizes = [1, 4, 128], strides = [1, 1, 1]} : vector<9x4x128xbf16> to vector<1x4x128xbf16>
    %7 = vector.shape_cast %6 : vector<1x4x128xbf16> to vector<4x128xbf16>
    %cst_6 = arith.constant dense<0.000000e+00> : vector<64x128xf32>
    %8 = tpu.matmul %5, %7, %cst_6 {dimension_numbers = #tpu.dot_dimension_numbers<[1], [0], [0], [1], [0, 0, 1, 1], [], []>} : vector<64x4xbf16>, vector<4x128xbf16>, vector<64x128xf32> -> vector<64x128xf32>
    %9 = arith.addf %2, %8 : vector<64x128xf32>
    %10 = vector.extract_strided_slice %0 {offsets = [0, 0, 1, 0], sizes = [4, 1, 16, 4], strides = [1, 1, 1, 1]} : vector<4x3x18x4xbf16> to vector<4x1x16x4xbf16>
    %11 = vector.shape_cast %10 : vector<4x1x16x4xbf16> to vector<4x16x4xbf16>
    %12 = vector.shape_cast %11 : vector<4x16x4xbf16> to vector<64x4xbf16>
    %13 = vector.extract_strided_slice %1 {offsets = [1, 0, 0], sizes = [1, 4, 128], strides = [1, 1, 1]} : vector<9x4x128xbf16> to vector<1x4x128xbf16>
    %14 = vector.shape_cast %13 : vector<1x4x128xbf16> to vector<4x128xbf16>
    %cst_7 = arith.constant dense<0.000000e+00> : vector<64x128xf32>
    %15 = tpu.matmul %12, %14, %cst_7 {dimension_numbers = #tpu.dot_dimension_numbers<[1], [0], [0], [1], [0, 0, 1, 1], [], []>} : vector<64x4xbf16>, vector<4x128xbf16>, vector<64x128xf32> -> vector<64x128xf32>
    %16 = arith.addf %9, %15 : vector<64x128xf32>
    %17 = vector.extract_strided_slice %0 {offsets = [0, 0, 2, 0], sizes = [4, 1, 16, 4], strides = [1, 1, 1, 1]} : vector<4x3x18x4xbf16> to vector<4x1x16x4xbf16>
    %18 = vector.shape_cast %17 : vector<4x1x16x4xbf16> to vector<4x16x4xbf16>
    %19 = vector.shape_cast %18 : vector<4x16x4xbf16> to vector<64x4xbf16>
    %20 = vector.extract_strided_slice %1 {offsets = [2, 0, 0], sizes = [1, 4, 128], strides = [1, 1, 1]} : vector<9x4x128xbf16> to vector<1x4x128xbf16>
    %21 = vector.shape_cast %20 : vector<1x4x128xbf16> to vector<4x128xbf16>
    %cst_8 = arith.constant dense<0.000000e+00> : vector<64x128xf32>
    %22 = tpu.matmul %19, %21, %cst_8 {dimension_numbers = #tpu.dot_dimension_numbers<[1], [0], [0], [1], [0, 0, 1, 1], [], []>} : vector<64x4xbf16>, vector<4x128xbf16>, vector<64x128xf32> -> vector<64x128xf32>
    %23 = arith.addf %16, %22 : vector<64x128xf32>
    %24 = vector.extract_strided_slice %0 {offsets = [0, 1, 0, 0], sizes = [4, 1, 16, 4], strides = [1, 1, 1, 1]} : vector<4x3x18x4xbf16> to vector<4x1x16x4xbf16>
    %25 = vector.shape_cast %24 : vector<4x1x16x4xbf16> to vector<4x16x4xbf16>
    %26 = vector.shape_cast %25 : vector<4x16x4xbf16> to vector<64x4xbf16>
    %27 = vector.extract_strided_slice %1 {offsets = [3, 0, 0], sizes = [1, 4, 128], strides = [1, 1, 1]} : vector<9x4x128xbf16> to vector<1x4x128xbf16>
    %28 = vector.shape_cast %27 : vector<1x4x128xbf16> to vector<4x128xbf16>
    %cst_9 = arith.constant dense<0.000000e+00> : vector<64x128xf32>
    %29 = tpu.matmul %26, %28, %cst_9 {dimension_numbers = #tpu.dot_dimension_numbers<[1], [0], [0], [1], [0, 0, 1, 1], [], []>} : vector<64x4xbf16>, vector<4x128xbf16>, vector<64x128xf32> -> vector<64x128xf32>
    %30 = arith.addf %23, %29 : vector<64x128xf32>
    %31 = vector.extract_strided_slice %0 {offsets = [0, 1, 1, 0], sizes = [4, 1, 16, 4], strides = [1, 1, 1, 1]} : vector<4x3x18x4xbf16> to vector<4x1x16x4xbf16>
    %32 = vector.shape_cast %31 : vector<4x1x16x4xbf16> to vector<4x16x4xbf16>
    %33 = vector.shape_cast %32 : vector<4x16x4xbf16> to vector<64x4xbf16>
    %34 = vector.extract_strided_slice %1 {offsets = [4, 0, 0], sizes = [1, 4, 128], strides = [1, 1, 1]} : vector<9x4x128xbf16> to vector<1x4x128xbf16>
    %35 = vector.shape_cast %34 : vector<1x4x128xbf16> to vector<4x128xbf16>
    %cst_10 = arith.constant dense<0.000000e+00> : vector<64x128xf32>
    %36 = tpu.matmul %33, %35, %cst_10 {dimension_numbers = #tpu.dot_dimension_numbers<[1], [0], [0], [1], [0, 0, 1, 1], [], []>} : vector<64x4xbf16>, vector<4x128xbf16>, vector<64x128xf32> -> vector<64x128xf32>
    %37 = arith.addf %30, %36 : vector<64x128xf32>
    %38 = vector.extract_strided_slice %0 {offsets = [0, 1, 2, 0], sizes = [4, 1, 16, 4], strides = [1, 1, 1, 1]} : vector<4x3x18x4xbf16> to vector<4x1x16x4xbf16>
    %39 = vector.shape_cast %38 : vector<4x1x16x4xbf16> to vector<4x16x4xbf16>
    %40 = vector.shape_cast %39 : vector<4x16x4xbf16> to vector<64x4xbf16>
    %41 = vector.extract_strided_slice %1 {offsets = [5, 0, 0], sizes = [1, 4, 128], strides = [1, 1, 1]} : vector<9x4x128xbf16> to vector<1x4x128xbf16>
    %42 = vector.shape_cast %41 : vector<1x4x128xbf16> to vector<4x128xbf16>
    %cst_11 = arith.constant dense<0.000000e+00> : vector<64x128xf32>
    %43 = tpu.matmul %40, %42, %cst_11 {dimension_numbers = #tpu.dot_dimension_numbers<[1], [0], [0], [1], [0, 0, 1, 1], [], []>} : vector<64x4xbf16>, vector<4x128xbf16>, vector<64x128xf32> -> vector<64x128xf32>
    %44 = arith.addf %37, %43 : vector<64x128xf32>
    %45 = vector.extract_strided_slice %0 {offsets = [0, 2, 0, 0], sizes = [4, 1, 16, 4], strides = [1, 1, 1, 1]} : vector<4x3x18x4xbf16> to vector<4x1x16x4xbf16>
    %46 = vector.shape_cast %45 : vector<4x1x16x4xbf16> to vector<4x16x4xbf16>
    %47 = vector.shape_cast %46 : vector<4x16x4xbf16> to vector<64x4xbf16>
    %48 = vector.extract_strided_slice %1 {offsets = [6, 0, 0], sizes = [1, 4, 128], strides = [1, 1, 1]} : vector<9x4x128xbf16> to vector<1x4x128xbf16>
    %49 = vector.shape_cast %48 : vector<1x4x128xbf16> to vector<4x128xbf16>
    %cst_12 = arith.constant dense<0.000000e+00> : vector<64x128xf32>
    %50 = tpu.matmul %47, %49, %cst_12 {dimension_numbers = #tpu.dot_dimension_numbers<[1], [0], [0], [1], [0, 0, 1, 1], [], []>} : vector<64x4xbf16>, vector<4x128xbf16>, vector<64x128xf32> -> vector<64x128xf32>
    %51 = arith.addf %44, %50 : vector<64x128xf32>
    %52 = vector.extract_strided_slice %0 {offsets = [0, 2, 1, 0], sizes = [4, 1, 16, 4], strides = [1, 1, 1, 1]} : vector<4x3x18x4xbf16> to vector<4x1x16x4xbf16>
    %53 = vector.shape_cast %52 : vector<4x1x16x4xbf16> to vector<4x16x4xbf16>
    %54 = vector.shape_cast %53 : vector<4x16x4xbf16> to vector<64x4xbf16>
    %55 = vector.extract_strided_slice %1 {offsets = [7, 0, 0], sizes = [1, 4, 128], strides = [1, 1, 1]} : vector<9x4x128xbf16> to vector<1x4x128xbf16>
    %56 = vector.shape_cast %55 : vector<1x4x128xbf16> to vector<4x128xbf16>
    %cst_13 = arith.constant dense<0.000000e+00> : vector<64x128xf32>
    %57 = tpu.matmul %54, %56, %cst_13 {dimension_numbers = #tpu.dot_dimension_numbers<[1], [0], [0], [1], [0, 0, 1, 1], [], []>} : vector<64x4xbf16>, vector<4x128xbf16>, vector<64x128xf32> -> vector<64x128xf32>
    %58 = arith.addf %51, %57 : vector<64x128xf32>
    %59 = vector.extract_strided_slice %0 {offsets = [0, 2, 2, 0], sizes = [4, 1, 16, 4], strides = [1, 1, 1, 1]} : vector<4x3x18x4xbf16> to vector<4x1x16x4xbf16>
    %60 = vector.shape_cast %59 : vector<4x1x16x4xbf16> to vector<4x16x4xbf16>
    %61 = vector.shape_cast %60 : vector<4x16x4xbf16> to vector<64x4xbf16>
    %62 = vector.extract_strided_slice %1 {offsets = [8, 0, 0], sizes = [1, 4, 128], strides = [1, 1, 1]} : vector<9x4x128xbf16> to vector<1x4x128xbf16>
    %63 = vector.shape_cast %62 : vector<1x4x128xbf16> to vector<4x128xbf16>
    %cst_14 = arith.constant dense<0.000000e+00> : vector<64x128xf32>
    %64 = tpu.matmul %61, %63, %cst_14 {dimension_numbers = #tpu.dot_dimension_numbers<[1], [0], [0], [1], [0, 0, 1, 1], [], []>} : vector<64x4xbf16>, vector<4x128xbf16>, vector<64x128xf32> -> vector<64x128xf32>
    %65 = arith.addf %58, %64 : vector<64x128xf32>
    %66 = arith.truncf %65 : vector<64x128xf32> to vector<64x128xbf16>
    %c0_15 = arith.constant 0 : index
    %c0_16 = arith.constant 0 : index
    %67 = vector.load %arg3[%c0_15, %c0_16] : memref<64x128xbf16, #tpu.memory_space<vmem>>, vector<64x128xbf16>
    tpu.vector_store %arg3[%c0_15, %c0_16], %66 {strides = array<i32>} : memref<64x128xbf16, #tpu.memory_space<vmem>>, vector<64x128xbf16>,
    %cst_17 = arith.constant dense<0.000000e+00> : vector<128xf32>
    %68 = vector.multi_reduction <add>, %65, %cst_17 [0] : vector<64x128xf32> to vector<128xf32>
    %69 = vector.shape_cast %68 : vector<128xf32> to vector<1x128xf32>
    %70 = arith.mulf %65, %65 : vector<64x128xf32>
    %cst_18 = arith.constant dense<0.000000e+00> : vector<128xf32>
    %71 = vector.multi_reduction <add>, %70, %cst_18 [0] : vector<64x128xf32> to vector<128xf32>
    %72 = vector.shape_cast %71 : vector<128xf32> to vector<1x128xf32>
    %73 = tpu.concatenate %69, %72 in 0 : vector<1x128xf32>, vector<1x128xf32> -> vector<2x128xf32>
    %c0_19 = arith.constant 0 : index
    %c0_20 = arith.constant 0 : index
    %c0_21 = arith.constant 0 : index
    %74 = vector.load %arg4[%c0_19, %c0_20, %c0_21] : memref<1x2x128xf32, #tpu.memory_space<vmem>>, vector<1x2x128xf32>
    %75 = vector.shape_cast %74 : vector<1x2x128xf32> to vector<2x128xf32>
    %76 = vector.shape_cast %73 : vector<2x128xf32> to vector<1x2x128xf32>
    tpu.vector_store %arg4[%c0_19, %c0_20, %c0_21], %76 {strides = array<i32>} : memref<1x2x128xf32, #tpu.memory_space<vmem>>, vector<1x2x128xf32>,
    return
  }
  func.func @transform_0(%arg0: i32) -> (i32, i32, i32, i32) {
    %c0_i32 = arith.constant 0 : i32
    %c0_i32_0 = arith.constant 0 : i32
    %c0_i32_1 = arith.constant 0 : i32
    %c0_i32_2 = arith.constant 0 : i32
    return %arg0, %c0_i32, %c0_i32_0, %c0_i32_1 : i32, i32, i32, i32
  }
  func.func @transform_1(%arg0: i32) -> (i32, i32, i32) {
    %c0_i32 = arith.constant 0 : i32
    %c0_i32_0 = arith.constant 0 : i32
    %c0_i32_1 = arith.constant 0 : i32
    %c0_i32_2 = arith.constant 0 : i32
    return %c0_i32, %c0_i32_0, %c0_i32_1 : i32, i32, i32
  }
  func.func @transform_2(%arg0: i32) -> (i32, i32) {
    %c0_i32 = arith.constant 0 : i32
    %c0_i32_0 = arith.constant 0 : i32
    return %arg0, %c0_i32 : i32, i32
  }
  func.func @transform_3(%arg0: i32) -> (i32, i32, i32) {
    %c0_i32 = arith.constant 0 : i32
    %c0_i32_0 = arith.constant 0 : i32
    %c0_i32_1 = arith.constant 0 : i32
    return %arg0, %c0_i32, %c0_i32_0 : i32, i32, i32
  }
}

module attributes {stable_mosaic.version = 11 : i64} {
  func.func @_apply_bn_relu_kernel(%arg0: i32, %arg1: memref<64x128xbf16, #tpu.memory_space<vmem>>, %arg2: memref<2x128xf32, #tpu.memory_space<vmem>>, %arg3: memref<64x128xf32, #tpu.memory_space<vmem>>) attributes {dimension_semantics = [#tpu.dimension_semantics<parallel>], iteration_bounds = array<i64: 8>, scalar_prefetch = 0 : i64, scratch_operands = 0 : i64, tpu.core_type = #tpu.core_type<tc>, window_params = [{transform_indices = @transform_0, window_bounds = array<i64: 64, 128>}, {pipeline_mode = #tpu.pipeline_mode<synchronous>, transform_indices = @transform_1, window_bounds = array<i64: 2, 128>}, {transform_indices = @transform_2, window_bounds = array<i64: 64, 128>}]} {
    %c0 = arith.constant 0 : index
    %c0_0 = arith.constant 0 : index
    %0 = vector.load %arg1[%c0, %c0_0] : memref<64x128xbf16, #tpu.memory_space<vmem>>, vector<64x128xbf16>
    %1 = arith.extf %0 : vector<64x128xbf16> to vector<64x128xf32>
    %c0_1 = arith.constant 0 : index
    %c0_2 = arith.constant 0 : index
    %2 = vector.load %arg2[%c0_1, %c0_2] : memref<2x128xf32, #tpu.memory_space<vmem>>, vector<1x128xf32>
    %3 = vector.broadcast %2 : vector<1x128xf32> to vector<64x128xf32>
    %4 = arith.mulf %1, %3 : vector<64x128xf32>
    %c1 = arith.constant 1 : index
    %c0_3 = arith.constant 0 : index
    %5 = vector.load %arg2[%c1, %c0_3] : memref<2x128xf32, #tpu.memory_space<vmem>>, vector<1x128xf32>
    %6 = vector.broadcast %5 : vector<1x128xf32> to vector<64x128xf32>
    %7 = arith.addf %4, %6 : vector<64x128xf32>
    %cst = arith.constant 0.000000e+00 : f32
    %8 = vector.broadcast %cst : f32 to vector<64x128xf32>
    %9 = arith.maximumf %7, %8 : vector<64x128xf32>
    %c0_4 = arith.constant 0 : index
    %c0_5 = arith.constant 0 : index
    %10 = vector.load %arg3[%c0_4, %c0_5] : memref<64x128xf32, #tpu.memory_space<vmem>>, vector<64x128xf32>
    tpu.vector_store %arg3[%c0_4, %c0_5], %9 {strides = array<i32>} : memref<64x128xf32, #tpu.memory_space<vmem>>, vector<64x128xf32>,
    return
  }
  func.func @transform_0(%arg0: i32) -> (i32, i32) {
    %c0_i32 = arith.constant 0 : i32
    %c0_i32_0 = arith.constant 0 : i32
    return %arg0, %c0_i32 : i32, i32
  }
  func.func @transform_1(%arg0: i32) -> (i32, i32) {
    %c0_i32 = arith.constant 0 : i32
    %c0_i32_0 = arith.constant 0 : i32
    %c0_i32_1 = arith.constant 0 : i32
    return %c0_i32, %c0_i32_0 : i32, i32
  }
  func.func @transform_2(%arg0: i32) -> (i32, i32) {
    %c0_i32 = arith.constant 0 : i32
    %c0_i32_0 = arith.constant 0 : i32
    return %arg0, %c0_i32 : i32, i32
  }
}

module attributes {stable_mosaic.version = 11 : i64} {
  func.func @kernel(%arg0: i32, %arg1: memref<4x3x18x8xbf16, #tpu.memory_space<vmem>>, %arg2: memref<9x8x128xbf16, #tpu.memory_space<vmem>>, %arg3: memref<64x128xbf16, #tpu.memory_space<vmem>>, %arg4: memref<1x2x128xf32, #tpu.memory_space<vmem>>) attributes {dimension_semantics = [#tpu.dimension_semantics<parallel>], iteration_bounds = array<i64: 8>, scalar_prefetch = 0 : i64, scratch_operands = 0 : i64, tpu.core_type = #tpu.core_type<tc>, window_params = [{transform_indices = @transform_0, window_bounds = array<i64: 4, 3, 18, 8>}, {pipeline_mode = #tpu.pipeline_mode<synchronous>, transform_indices = @transform_1, window_bounds = array<i64: 9, 8, 128>}, {transform_indices = @transform_2, window_bounds = array<i64: 64, 128>}, {transform_indices = @transform_3, window_bounds = array<i64: 1, 2, 128>}]} {
    %c0 = arith.constant 0 : index
    %c0_0 = arith.constant 0 : index
    %c0_1 = arith.constant 0 : index
    %c0_2 = arith.constant 0 : index
    %0 = vector.load %arg1[%c0, %c0_0, %c0_1, %c0_2] : memref<4x3x18x8xbf16, #tpu.memory_space<vmem>>, vector<4x3x18x8xbf16>
    %c0_3 = arith.constant 0 : index
    %c0_4 = arith.constant 0 : index
    %c0_5 = arith.constant 0 : index
    %1 = vector.load %arg2[%c0_3, %c0_4, %c0_5] : memref<9x8x128xbf16, #tpu.memory_space<vmem>>, vector<9x8x128xbf16>
    %cst = arith.constant 0.000000e+00 : f32
    %2 = vector.broadcast %cst : f32 to vector<64x128xf32>
    %3 = vector.extract_strided_slice %0 {offsets = [0, 0, 0, 0], sizes = [4, 1, 16, 8], strides = [1, 1, 1, 1]} : vector<4x3x18x8xbf16> to vector<4x1x16x8xbf16>
    %4 = vector.shape_cast %3 : vector<4x1x16x8xbf16> to vector<4x16x8xbf16>
    %5 = vector.shape_cast %4 : vector<4x16x8xbf16> to vector<64x8xbf16>
    %6 = vector.extract_strided_slice %1 {offsets = [0, 0, 0], sizes = [1, 8, 128], strides = [1, 1, 1]} : vector<9x8x128xbf16> to vector<1x8x128xbf16>
    %7 = vector.shape_cast %6 : vector<1x8x128xbf16> to vector<8x128xbf16>
    %cst_6 = arith.constant dense<0.000000e+00> : vector<64x128xf32>
    %8 = tpu.matmul %5, %7, %cst_6 {dimension_numbers = #tpu.dot_dimension_numbers<[1], [0], [0], [1], [0, 0, 1, 1], [], []>} : vector<64x8xbf16>, vector<8x128xbf16>, vector<64x128xf32> -> vector<64x128xf32>
    %9 = arith.addf %2, %8 : vector<64x128xf32>
    %10 = vector.extract_strided_slice %0 {offsets = [0, 0, 1, 0], sizes = [4, 1, 16, 8], strides = [1, 1, 1, 1]} : vector<4x3x18x8xbf16> to vector<4x1x16x8xbf16>
    %11 = vector.shape_cast %10 : vector<4x1x16x8xbf16> to vector<4x16x8xbf16>
    %12 = vector.shape_cast %11 : vector<4x16x8xbf16> to vector<64x8xbf16>
    %13 = vector.extract_strided_slice %1 {offsets = [1, 0, 0], sizes = [1, 8, 128], strides = [1, 1, 1]} : vector<9x8x128xbf16> to vector<1x8x128xbf16>
    %14 = vector.shape_cast %13 : vector<1x8x128xbf16> to vector<8x128xbf16>
    %cst_7 = arith.constant dense<0.000000e+00> : vector<64x128xf32>
    %15 = tpu.matmul %12, %14, %cst_7 {dimension_numbers = #tpu.dot_dimension_numbers<[1], [0], [0], [1], [0, 0, 1, 1], [], []>} : vector<64x8xbf16>, vector<8x128xbf16>, vector<64x128xf32> -> vector<64x128xf32>
    %16 = arith.addf %9, %15 : vector<64x128xf32>
    %17 = vector.extract_strided_slice %0 {offsets = [0, 0, 2, 0], sizes = [4, 1, 16, 8], strides = [1, 1, 1, 1]} : vector<4x3x18x8xbf16> to vector<4x1x16x8xbf16>
    %18 = vector.shape_cast %17 : vector<4x1x16x8xbf16> to vector<4x16x8xbf16>
    %19 = vector.shape_cast %18 : vector<4x16x8xbf16> to vector<64x8xbf16>
    %20 = vector.extract_strided_slice %1 {offsets = [2, 0, 0], sizes = [1, 8, 128], strides = [1, 1, 1]} : vector<9x8x128xbf16> to vector<1x8x128xbf16>
    %21 = vector.shape_cast %20 : vector<1x8x128xbf16> to vector<8x128xbf16>
    %cst_8 = arith.constant dense<0.000000e+00> : vector<64x128xf32>
    %22 = tpu.matmul %19, %21, %cst_8 {dimension_numbers = #tpu.dot_dimension_numbers<[1], [0], [0], [1], [0, 0, 1, 1], [], []>} : vector<64x8xbf16>, vector<8x128xbf16>, vector<64x128xf32> -> vector<64x128xf32>
    %23 = arith.addf %16, %22 : vector<64x128xf32>
    %24 = vector.extract_strided_slice %0 {offsets = [0, 1, 0, 0], sizes = [4, 1, 16, 8], strides = [1, 1, 1, 1]} : vector<4x3x18x8xbf16> to vector<4x1x16x8xbf16>
    %25 = vector.shape_cast %24 : vector<4x1x16x8xbf16> to vector<4x16x8xbf16>
    %26 = vector.shape_cast %25 : vector<4x16x8xbf16> to vector<64x8xbf16>
    %27 = vector.extract_strided_slice %1 {offsets = [3, 0, 0], sizes = [1, 8, 128], strides = [1, 1, 1]} : vector<9x8x128xbf16> to vector<1x8x128xbf16>
    %28 = vector.shape_cast %27 : vector<1x8x128xbf16> to vector<8x128xbf16>
    %cst_9 = arith.constant dense<0.000000e+00> : vector<64x128xf32>
    %29 = tpu.matmul %26, %28, %cst_9 {dimension_numbers = #tpu.dot_dimension_numbers<[1], [0], [0], [1], [0, 0, 1, 1], [], []>} : vector<64x8xbf16>, vector<8x128xbf16>, vector<64x128xf32> -> vector<64x128xf32>
    %30 = arith.addf %23, %29 : vector<64x128xf32>
    %31 = vector.extract_strided_slice %0 {offsets = [0, 1, 1, 0], sizes = [4, 1, 16, 8], strides = [1, 1, 1, 1]} : vector<4x3x18x8xbf16> to vector<4x1x16x8xbf16>
    %32 = vector.shape_cast %31 : vector<4x1x16x8xbf16> to vector<4x16x8xbf16>
    %33 = vector.shape_cast %32 : vector<4x16x8xbf16> to vector<64x8xbf16>
    %34 = vector.extract_strided_slice %1 {offsets = [4, 0, 0], sizes = [1, 8, 128], strides = [1, 1, 1]} : vector<9x8x128xbf16> to vector<1x8x128xbf16>
    %35 = vector.shape_cast %34 : vector<1x8x128xbf16> to vector<8x128xbf16>
    %cst_10 = arith.constant dense<0.000000e+00> : vector<64x128xf32>
    %36 = tpu.matmul %33, %35, %cst_10 {dimension_numbers = #tpu.dot_dimension_numbers<[1], [0], [0], [1], [0, 0, 1, 1], [], []>} : vector<64x8xbf16>, vector<8x128xbf16>, vector<64x128xf32> -> vector<64x128xf32>
    %37 = arith.addf %30, %36 : vector<64x128xf32>
    %38 = vector.extract_strided_slice %0 {offsets = [0, 1, 2, 0], sizes = [4, 1, 16, 8], strides = [1, 1, 1, 1]} : vector<4x3x18x8xbf16> to vector<4x1x16x8xbf16>
    %39 = vector.shape_cast %38 : vector<4x1x16x8xbf16> to vector<4x16x8xbf16>
    %40 = vector.shape_cast %39 : vector<4x16x8xbf16> to vector<64x8xbf16>
    %41 = vector.extract_strided_slice %1 {offsets = [5, 0, 0], sizes = [1, 8, 128], strides = [1, 1, 1]} : vector<9x8x128xbf16> to vector<1x8x128xbf16>
    %42 = vector.shape_cast %41 : vector<1x8x128xbf16> to vector<8x128xbf16>
    %cst_11 = arith.constant dense<0.000000e+00> : vector<64x128xf32>
    %43 = tpu.matmul %40, %42, %cst_11 {dimension_numbers = #tpu.dot_dimension_numbers<[1], [0], [0], [1], [0, 0, 1, 1], [], []>} : vector<64x8xbf16>, vector<8x128xbf16>, vector<64x128xf32> -> vector<64x128xf32>
    %44 = arith.addf %37, %43 : vector<64x128xf32>
    %45 = vector.extract_strided_slice %0 {offsets = [0, 2, 0, 0], sizes = [4, 1, 16, 8], strides = [1, 1, 1, 1]} : vector<4x3x18x8xbf16> to vector<4x1x16x8xbf16>
    %46 = vector.shape_cast %45 : vector<4x1x16x8xbf16> to vector<4x16x8xbf16>
    %47 = vector.shape_cast %46 : vector<4x16x8xbf16> to vector<64x8xbf16>
    %48 = vector.extract_strided_slice %1 {offsets = [6, 0, 0], sizes = [1, 8, 128], strides = [1, 1, 1]} : vector<9x8x128xbf16> to vector<1x8x128xbf16>
    %49 = vector.shape_cast %48 : vector<1x8x128xbf16> to vector<8x128xbf16>
    %cst_12 = arith.constant dense<0.000000e+00> : vector<64x128xf32>
    %50 = tpu.matmul %47, %49, %cst_12 {dimension_numbers = #tpu.dot_dimension_numbers<[1], [0], [0], [1], [0, 0, 1, 1], [], []>} : vector<64x8xbf16>, vector<8x128xbf16>, vector<64x128xf32> -> vector<64x128xf32>
    %51 = arith.addf %44, %50 : vector<64x128xf32>
    %52 = vector.extract_strided_slice %0 {offsets = [0, 2, 1, 0], sizes = [4, 1, 16, 8], strides = [1, 1, 1, 1]} : vector<4x3x18x8xbf16> to vector<4x1x16x8xbf16>
    %53 = vector.shape_cast %52 : vector<4x1x16x8xbf16> to vector<4x16x8xbf16>
    %54 = vector.shape_cast %53 : vector<4x16x8xbf16> to vector<64x8xbf16>
    %55 = vector.extract_strided_slice %1 {offsets = [7, 0, 0], sizes = [1, 8, 128], strides = [1, 1, 1]} : vector<9x8x128xbf16> to vector<1x8x128xbf16>
    %56 = vector.shape_cast %55 : vector<1x8x128xbf16> to vector<8x128xbf16>
    %cst_13 = arith.constant dense<0.000000e+00> : vector<64x128xf32>
    %57 = tpu.matmul %54, %56, %cst_13 {dimension_numbers = #tpu.dot_dimension_numbers<[1], [0], [0], [1], [0, 0, 1, 1], [], []>} : vector<64x8xbf16>, vector<8x128xbf16>, vector<64x128xf32> -> vector<64x128xf32>
    %58 = arith.addf %51, %57 : vector<64x128xf32>
    %59 = vector.extract_strided_slice %0 {offsets = [0, 2, 2, 0], sizes = [4, 1, 16, 8], strides = [1, 1, 1, 1]} : vector<4x3x18x8xbf16> to vector<4x1x16x8xbf16>
    %60 = vector.shape_cast %59 : vector<4x1x16x8xbf16> to vector<4x16x8xbf16>
    %61 = vector.shape_cast %60 : vector<4x16x8xbf16> to vector<64x8xbf16>
    %62 = vector.extract_strided_slice %1 {offsets = [8, 0, 0], sizes = [1, 8, 128], strides = [1, 1, 1]} : vector<9x8x128xbf16> to vector<1x8x128xbf16>
    %63 = vector.shape_cast %62 : vector<1x8x128xbf16> to vector<8x128xbf16>
    %cst_14 = arith.constant dense<0.000000e+00> : vector<64x128xf32>
    %64 = tpu.matmul %61, %63, %cst_14 {dimension_numbers = #tpu.dot_dimension_numbers<[1], [0], [0], [1], [0, 0, 1, 1], [], []>} : vector<64x8xbf16>, vector<8x128xbf16>, vector<64x128xf32> -> vector<64x128xf32>
    %65 = arith.addf %58, %64 : vector<64x128xf32>
    %66 = arith.truncf %65 : vector<64x128xf32> to vector<64x128xbf16>
    %c0_15 = arith.constant 0 : index
    %c0_16 = arith.constant 0 : index
    %67 = vector.load %arg3[%c0_15, %c0_16] : memref<64x128xbf16, #tpu.memory_space<vmem>>, vector<64x128xbf16>
    tpu.vector_store %arg3[%c0_15, %c0_16], %66 {strides = array<i32>} : memref<64x128xbf16, #tpu.memory_space<vmem>>, vector<64x128xbf16>,
    %cst_17 = arith.constant dense<0.000000e+00> : vector<128xf32>
    %68 = vector.multi_reduction <add>, %65, %cst_17 [0] : vector<64x128xf32> to vector<128xf32>
    %69 = vector.shape_cast %68 : vector<128xf32> to vector<1x128xf32>
    %70 = arith.mulf %65, %65 : vector<64x128xf32>
    %cst_18 = arith.constant dense<0.000000e+00> : vector<128xf32>
    %71 = vector.multi_reduction <add>, %70, %cst_18 [0] : vector<64x128xf32> to vector<128xf32>
    %72 = vector.shape_cast %71 : vector<128xf32> to vector<1x128xf32>
    %73 = tpu.concatenate %69, %72 in 0 : vector<1x128xf32>, vector<1x128xf32> -> vector<2x128xf32>
    %c0_19 = arith.constant 0 : index
    %c0_20 = arith.constant 0 : index
    %c0_21 = arith.constant 0 : index
    %74 = vector.load %arg4[%c0_19, %c0_20, %c0_21] : memref<1x2x128xf32, #tpu.memory_space<vmem>>, vector<1x2x128xf32>
    %75 = vector.shape_cast %74 : vector<1x2x128xf32> to vector<2x128xf32>
    %76 = vector.shape_cast %73 : vector<2x128xf32> to vector<1x2x128xf32>
    tpu.vector_store %arg4[%c0_19, %c0_20, %c0_21], %76 {strides = array<i32>} : memref<1x2x128xf32, #tpu.memory_space<vmem>>, vector<1x2x128xf32>,
    return
  }
  func.func @transform_0(%arg0: i32) -> (i32, i32, i32, i32) {
    %c0_i32 = arith.constant 0 : i32
    %c0_i32_0 = arith.constant 0 : i32
    %c0_i32_1 = arith.constant 0 : i32
    %c0_i32_2 = arith.constant 0 : i32
    return %arg0, %c0_i32, %c0_i32_0, %c0_i32_1 : i32, i32, i32, i32
  }
  func.func @transform_1(%arg0: i32) -> (i32, i32, i32) {
    %c0_i32 = arith.constant 0 : i32
    %c0_i32_0 = arith.constant 0 : i32
    %c0_i32_1 = arith.constant 0 : i32
    %c0_i32_2 = arith.constant 0 : i32
    return %c0_i32, %c0_i32_0, %c0_i32_1 : i32, i32, i32
  }
  func.func @transform_2(%arg0: i32) -> (i32, i32) {
    %c0_i32 = arith.constant 0 : i32
    %c0_i32_0 = arith.constant 0 : i32
    return %arg0, %c0_i32 : i32, i32
  }
  func.func @transform_3(%arg0: i32) -> (i32, i32, i32) {
    %c0_i32 = arith.constant 0 : i32
    %c0_i32_0 = arith.constant 0 : i32
    %c0_i32_1 = arith.constant 0 : i32
    return %arg0, %c0_i32, %c0_i32_0 : i32, i32, i32
  }
}

module attributes {stable_mosaic.version = 11 : i64} {
  func.func @kernel(%arg0: i32, %arg1: memref<8x6x9x8xf32, #tpu.memory_space<vmem>>, %arg2: memref<9x8x128xf32, #tpu.memory_space<vmem>>, %arg3: memref<64x128xf32, #tpu.memory_space<vmem>>, %arg4: memref<1x2x128xf32, #tpu.memory_space<vmem>>) attributes {dimension_semantics = [#tpu.dimension_semantics<parallel>], iteration_bounds = array<i64: 2>, scalar_prefetch = 0 : i64, scratch_operands = 0 : i64, tpu.core_type = #tpu.core_type<tc>, window_params = [{transform_indices = @transform_0, window_bounds = array<i64: 8, 6, 9, 8>}, {pipeline_mode = #tpu.pipeline_mode<synchronous>, transform_indices = @transform_1, window_bounds = array<i64: 9, 8, 128>}, {transform_indices = @transform_2, window_bounds = array<i64: 64, 128>}, {transform_indices = @transform_3, window_bounds = array<i64: 1, 2, 128>}]} {
    %c0 = arith.constant 0 : index
    %c0_0 = arith.constant 0 : index
    %c0_1 = arith.constant 0 : index
    %c0_2 = arith.constant 0 : index
    %0 = vector.load %arg1[%c0, %c0_0, %c0_1, %c0_2] : memref<8x6x9x8xf32, #tpu.memory_space<vmem>>, vector<8x6x9x8xf32>
    %c0_3 = arith.constant 0 : index
    %c0_4 = arith.constant 0 : index
    %c0_5 = arith.constant 0 : index
    %1 = vector.load %arg2[%c0_3, %c0_4, %c0_5] : memref<9x8x128xf32, #tpu.memory_space<vmem>>, vector<9x8x128xf32>
    %cst = arith.constant 0.000000e+00 : f32
    %2 = vector.broadcast %cst : f32 to vector<64x128xf32>
    %3 = vector.extract_strided_slice %0 {offsets = [0, 0, 0, 0], sizes = [8, 1, 8, 8], strides = [1, 1, 1, 1]} : vector<8x6x9x8xf32> to vector<8x1x8x8xf32>
    %4 = vector.shape_cast %3 : vector<8x1x8x8xf32> to vector<8x8x8xf32>
    %5 = vector.shape_cast %4 : vector<8x8x8xf32> to vector<64x8xf32>
    %6 = vector.extract_strided_slice %1 {offsets = [0, 0, 0], sizes = [1, 8, 128], strides = [1, 1, 1]} : vector<9x8x128xf32> to vector<1x8x128xf32>
    %7 = vector.shape_cast %6 : vector<1x8x128xf32> to vector<8x128xf32>
    %cst_6 = arith.constant dense<0.000000e+00> : vector<64x128xf32>
    %8 = tpu.matmul %5, %7, %cst_6 {dimension_numbers = #tpu.dot_dimension_numbers<[1], [0], [0], [1], [0, 0, 1, 1], [], []>} : vector<64x8xf32>, vector<8x128xf32>, vector<64x128xf32> -> vector<64x128xf32>
    %9 = arith.addf %2, %8 : vector<64x128xf32>
    %10 = vector.extract_strided_slice %0 {offsets = [0, 1, 0, 0], sizes = [8, 1, 8, 8], strides = [1, 1, 1, 1]} : vector<8x6x9x8xf32> to vector<8x1x8x8xf32>
    %11 = vector.shape_cast %10 : vector<8x1x8x8xf32> to vector<8x8x8xf32>
    %12 = vector.shape_cast %11 : vector<8x8x8xf32> to vector<64x8xf32>
    %13 = vector.extract_strided_slice %1 {offsets = [1, 0, 0], sizes = [1, 8, 128], strides = [1, 1, 1]} : vector<9x8x128xf32> to vector<1x8x128xf32>
    %14 = vector.shape_cast %13 : vector<1x8x128xf32> to vector<8x128xf32>
    %cst_7 = arith.constant dense<0.000000e+00> : vector<64x128xf32>
    %15 = tpu.matmul %12, %14, %cst_7 {dimension_numbers = #tpu.dot_dimension_numbers<[1], [0], [0], [1], [0, 0, 1, 1], [], []>} : vector<64x8xf32>, vector<8x128xf32>, vector<64x128xf32> -> vector<64x128xf32>
    %16 = arith.addf %9, %15 : vector<64x128xf32>
    %17 = vector.extract_strided_slice %0 {offsets = [0, 0, 1, 0], sizes = [8, 1, 8, 8], strides = [1, 1, 1, 1]} : vector<8x6x9x8xf32> to vector<8x1x8x8xf32>
    %18 = vector.shape_cast %17 : vector<8x1x8x8xf32> to vector<8x8x8xf32>
    %19 = vector.shape_cast %18 : vector<8x8x8xf32> to vector<64x8xf32>
    %20 = vector.extract_strided_slice %1 {offsets = [2, 0, 0], sizes = [1, 8, 128], strides = [1, 1, 1]} : vector<9x8x128xf32> to vector<1x8x128xf32>
    %21 = vector.shape_cast %20 : vector<1x8x128xf32> to vector<8x128xf32>
    %cst_8 = arith.constant dense<0.000000e+00> : vector<64x128xf32>
    %22 = tpu.matmul %19, %21, %cst_8 {dimension_numbers = #tpu.dot_dimension_numbers<[1], [0], [0], [1], [0, 0, 1, 1], [], []>} : vector<64x8xf32>, vector<8x128xf32>, vector<64x128xf32> -> vector<64x128xf32>
    %23 = arith.addf %16, %22 : vector<64x128xf32>
    %24 = vector.extract_strided_slice %0 {offsets = [0, 2, 0, 0], sizes = [8, 1, 8, 8], strides = [1, 1, 1, 1]} : vector<8x6x9x8xf32> to vector<8x1x8x8xf32>
    %25 = vector.shape_cast %24 : vector<8x1x8x8xf32> to vector<8x8x8xf32>
    %26 = vector.shape_cast %25 : vector<8x8x8xf32> to vector<64x8xf32>
    %27 = vector.extract_strided_slice %1 {offsets = [3, 0, 0], sizes = [1, 8, 128], strides = [1, 1, 1]} : vector<9x8x128xf32> to vector<1x8x128xf32>
    %28 = vector.shape_cast %27 : vector<1x8x128xf32> to vector<8x128xf32>
    %cst_9 = arith.constant dense<0.000000e+00> : vector<64x128xf32>
    %29 = tpu.matmul %26, %28, %cst_9 {dimension_numbers = #tpu.dot_dimension_numbers<[1], [0], [0], [1], [0, 0, 1, 1], [], []>} : vector<64x8xf32>, vector<8x128xf32>, vector<64x128xf32> -> vector<64x128xf32>
    %30 = arith.addf %23, %29 : vector<64x128xf32>
    %31 = vector.extract_strided_slice %0 {offsets = [0, 3, 0, 0], sizes = [8, 1, 8, 8], strides = [1, 1, 1, 1]} : vector<8x6x9x8xf32> to vector<8x1x8x8xf32>
    %32 = vector.shape_cast %31 : vector<8x1x8x8xf32> to vector<8x8x8xf32>
    %33 = vector.shape_cast %32 : vector<8x8x8xf32> to vector<64x8xf32>
    %34 = vector.extract_strided_slice %1 {offsets = [4, 0, 0], sizes = [1, 8, 128], strides = [1, 1, 1]} : vector<9x8x128xf32> to vector<1x8x128xf32>
    %35 = vector.shape_cast %34 : vector<1x8x128xf32> to vector<8x128xf32>
    %cst_10 = arith.constant dense<0.000000e+00> : vector<64x128xf32>
    %36 = tpu.matmul %33, %35, %cst_10 {dimension_numbers = #tpu.dot_dimension_numbers<[1], [0], [0], [1], [0, 0, 1, 1], [], []>} : vector<64x8xf32>, vector<8x128xf32>, vector<64x128xf32> -> vector<64x128xf32>
    %37 = arith.addf %30, %36 : vector<64x128xf32>
    %38 = vector.extract_strided_slice %0 {offsets = [0, 2, 1, 0], sizes = [8, 1, 8, 8], strides = [1, 1, 1, 1]} : vector<8x6x9x8xf32> to vector<8x1x8x8xf32>
    %39 = vector.shape_cast %38 : vector<8x1x8x8xf32> to vector<8x8x8xf32>
    %40 = vector.shape_cast %39 : vector<8x8x8xf32> to vector<64x8xf32>
    %41 = vector.extract_strided_slice %1 {offsets = [5, 0, 0], sizes = [1, 8, 128], strides = [1, 1, 1]} : vector<9x8x128xf32> to vector<1x8x128xf32>
    %42 = vector.shape_cast %41 : vector<1x8x128xf32> to vector<8x128xf32>
    %cst_11 = arith.constant dense<0.000000e+00> : vector<64x128xf32>
    %43 = tpu.matmul %40, %42, %cst_11 {dimension_numbers = #tpu.dot_dimension_numbers<[1], [0], [0], [1], [0, 0, 1, 1], [], []>} : vector<64x8xf32>, vector<8x128xf32>, vector<64x128xf32> -> vector<64x128xf32>
    %44 = arith.addf %37, %43 : vector<64x128xf32>
    %45 = vector.extract_strided_slice %0 {offsets = [0, 4, 0, 0], sizes = [8, 1, 8, 8], strides = [1, 1, 1, 1]} : vector<8x6x9x8xf32> to vector<8x1x8x8xf32>
    %46 = vector.shape_cast %45 : vector<8x1x8x8xf32> to vector<8x8x8xf32>
    %47 = vector.shape_cast %46 : vector<8x8x8xf32> to vector<64x8xf32>
    %48 = vector.extract_strided_slice %1 {offsets = [6, 0, 0], sizes = [1, 8, 128], strides = [1, 1, 1]} : vector<9x8x128xf32> to vector<1x8x128xf32>
    %49 = vector.shape_cast %48 : vector<1x8x128xf32> to vector<8x128xf32>
    %cst_12 = arith.constant dense<0.000000e+00> : vector<64x128xf32>
    %50 = tpu.matmul %47, %49, %cst_12 {dimension_numbers = #tpu.dot_dimension_numbers<[1], [0], [0], [1], [0, 0, 1, 1], [], []>} : vector<64x8xf32>, vector<8x128xf32>, vector<64x128xf32> -> vector<64x128xf32>
    %51 = arith.addf %44, %50 : vector<64x128xf32>
    %52 = vector.extract_strided_slice %0 {offsets = [0, 5, 0, 0], sizes = [8, 1, 8, 8], strides = [1, 1, 1, 1]} : vector<8x6x9x8xf32> to vector<8x1x8x8xf32>
    %53 = vector.shape_cast %52 : vector<8x1x8x8xf32> to vector<8x8x8xf32>
    %54 = vector.shape_cast %53 : vector<8x8x8xf32> to vector<64x8xf32>
    %55 = vector.extract_strided_slice %1 {offsets = [7, 0, 0], sizes = [1, 8, 128], strides = [1, 1, 1]} : vector<9x8x128xf32> to vector<1x8x128xf32>
    %56 = vector.shape_cast %55 : vector<1x8x128xf32> to vector<8x128xf32>
    %cst_13 = arith.constant dense<0.000000e+00> : vector<64x128xf32>
    %57 = tpu.matmul %54, %56, %cst_13 {dimension_numbers = #tpu.dot_dimension_numbers<[1], [0], [0], [1], [0, 0, 1, 1], [], []>} : vector<64x8xf32>, vector<8x128xf32>, vector<64x128xf32> -> vector<64x128xf32>
    %58 = arith.addf %51, %57 : vector<64x128xf32>
    %59 = vector.extract_strided_slice %0 {offsets = [0, 4, 1, 0], sizes = [8, 1, 8, 8], strides = [1, 1, 1, 1]} : vector<8x6x9x8xf32> to vector<8x1x8x8xf32>
    %60 = vector.shape_cast %59 : vector<8x1x8x8xf32> to vector<8x8x8xf32>
    %61 = vector.shape_cast %60 : vector<8x8x8xf32> to vector<64x8xf32>
    %62 = vector.extract_strided_slice %1 {offsets = [8, 0, 0], sizes = [1, 8, 128], strides = [1, 1, 1]} : vector<9x8x128xf32> to vector<1x8x128xf32>
    %63 = vector.shape_cast %62 : vector<1x8x128xf32> to vector<8x128xf32>
    %cst_14 = arith.constant dense<0.000000e+00> : vector<64x128xf32>
    %64 = tpu.matmul %61, %63, %cst_14 {dimension_numbers = #tpu.dot_dimension_numbers<[1], [0], [0], [1], [0, 0, 1, 1], [], []>} : vector<64x8xf32>, vector<8x128xf32>, vector<64x128xf32> -> vector<64x128xf32>
    %65 = arith.addf %58, %64 : vector<64x128xf32>
    %c0_15 = arith.constant 0 : index
    %c0_16 = arith.constant 0 : index
    %66 = vector.load %arg3[%c0_15, %c0_16] : memref<64x128xf32, #tpu.memory_space<vmem>>, vector<64x128xf32>
    tpu.vector_store %arg3[%c0_15, %c0_16], %65 {strides = array<i32>} : memref<64x128xf32, #tpu.memory_space<vmem>>, vector<64x128xf32>,
    %cst_17 = arith.constant dense<0.000000e+00> : vector<128xf32>
    %67 = vector.multi_reduction <add>, %65, %cst_17 [0] : vector<64x128xf32> to vector<128xf32>
    %68 = vector.shape_cast %67 : vector<128xf32> to vector<1x128xf32>
    %69 = arith.mulf %65, %65 : vector<64x128xf32>
    %cst_18 = arith.constant dense<0.000000e+00> : vector<128xf32>
    %70 = vector.multi_reduction <add>, %69, %cst_18 [0] : vector<64x128xf32> to vector<128xf32>
    %71 = vector.shape_cast %70 : vector<128xf32> to vector<1x128xf32>
    %72 = tpu.concatenate %68, %71 in 0 : vector<1x128xf32>, vector<1x128xf32> -> vector<2x128xf32>
    %c0_19 = arith.constant 0 : index
    %c0_20 = arith.constant 0 : index
    %c0_21 = arith.constant 0 : index
    %73 = vector.load %arg4[%c0_19, %c0_20, %c0_21] : memref<1x2x128xf32, #tpu.memory_space<vmem>>, vector<1x2x128xf32>
    %74 = vector.shape_cast %73 : vector<1x2x128xf32> to vector<2x128xf32>
    %75 = vector.shape_cast %72 : vector<2x128xf32> to vector<1x2x128xf32>
    tpu.vector_store %arg4[%c0_19, %c0_20, %c0_21], %75 {strides = array<i32>} : memref<1x2x128xf32, #tpu.memory_space<vmem>>, vector<1x2x128xf32>,
    return
  }
  func.func @transform_0(%arg0: i32) -> (i32, i32, i32, i32) {
    %c0_i32 = arith.constant 0 : i32
    %c0_i32_0 = arith.constant 0 : i32
    %c0_i32_1 = arith.constant 0 : i32
    %c0_i32_2 = arith.constant 0 : i32
    return %arg0, %c0_i32, %c0_i32_0, %c0_i32_1 : i32, i32, i32, i32
  }
  func.func @transform_1(%arg0: i32) -> (i32, i32, i32) {
    %c0_i32 = arith.constant 0 : i32
    %c0_i32_0 = arith.constant 0 : i32
    %c0_i32_1 = arith.constant 0 : i32
    %c0_i32_2 = arith.constant 0 : i32
    return %c0_i32, %c0_i32_0, %c0_i32_1 : i32, i32, i32
  }
  func.func @transform_2(%arg0: i32) -> (i32, i32) {
    %c0_i32 = arith.constant 0 : i32
    %c0_i32_0 = arith.constant 0 : i32
    return %arg0, %c0_i32 : i32, i32
  }
  func.func @transform_3(%arg0: i32) -> (i32, i32, i32) {
    %c0_i32 = arith.constant 0 : i32
    %c0_i32_0 = arith.constant 0 : i32
    %c0_i32_1 = arith.constant 0 : i32
    return %arg0, %c0_i32, %c0_i32_0 : i32, i32, i32
  }
}

module attributes {stable_mosaic.version = 11 : i64} {
  func.func @_apply_bn_relu_kernel(%arg0: i32, %arg1: memref<64x128xf32, #tpu.memory_space<vmem>>, %arg2: memref<2x128xf32, #tpu.memory_space<vmem>>, %arg3: memref<64x128xf32, #tpu.memory_space<vmem>>) attributes {dimension_semantics = [#tpu.dimension_semantics<parallel>], iteration_bounds = array<i64: 2>, scalar_prefetch = 0 : i64, scratch_operands = 0 : i64, tpu.core_type = #tpu.core_type<tc>, window_params = [{transform_indices = @transform_0, window_bounds = array<i64: 64, 128>}, {pipeline_mode = #tpu.pipeline_mode<synchronous>, transform_indices = @transform_1, window_bounds = array<i64: 2, 128>}, {transform_indices = @transform_2, window_bounds = array<i64: 64, 128>}]} {
    %c0 = arith.constant 0 : index
    %c0_0 = arith.constant 0 : index
    %0 = vector.load %arg1[%c0, %c0_0] : memref<64x128xf32, #tpu.memory_space<vmem>>, vector<64x128xf32>
    %c0_1 = arith.constant 0 : index
    %c0_2 = arith.constant 0 : index
    %1 = vector.load %arg2[%c0_1, %c0_2] : memref<2x128xf32, #tpu.memory_space<vmem>>, vector<1x128xf32>
    %2 = vector.broadcast %1 : vector<1x128xf32> to vector<64x128xf32>
    %3 = arith.mulf %0, %2 : vector<64x128xf32>
    %c1 = arith.constant 1 : index
    %c0_3 = arith.constant 0 : index
    %4 = vector.load %arg2[%c1, %c0_3] : memref<2x128xf32, #tpu.memory_space<vmem>>, vector<1x128xf32>
    %5 = vector.broadcast %4 : vector<1x128xf32> to vector<64x128xf32>
    %6 = arith.addf %3, %5 : vector<64x128xf32>
    %cst = arith.constant 0.000000e+00 : f32
    %7 = vector.broadcast %cst : f32 to vector<64x128xf32>
    %8 = arith.maximumf %6, %7 : vector<64x128xf32>
    %c0_4 = arith.constant 0 : index
    %c0_5 = arith.constant 0 : index
    %9 = vector.load %arg3[%c0_4, %c0_5] : memref<64x128xf32, #tpu.memory_space<vmem>>, vector<64x128xf32>
    tpu.vector_store %arg3[%c0_4, %c0_5], %8 {strides = array<i32>} : memref<64x128xf32, #tpu.memory_space<vmem>>, vector<64x128xf32>,
    return
  }
  func.func @transform_0(%arg0: i32) -> (i32, i32) {
    %c0_i32 = arith.constant 0 : i32
    %c0_i32_0 = arith.constant 0 : i32
    return %arg0, %c0_i32 : i32, i32
  }
  func.func @transform_1(%arg0: i32) -> (i32, i32) {
    %c0_i32 = arith.constant 0 : i32
    %c0_i32_0 = arith.constant 0 : i32
    %c0_i32_1 = arith.constant 0 : i32
    return %c0_i32, %c0_i32_0 : i32, i32
  }
  func.func @transform_2(%arg0: i32) -> (i32, i32) {
    %c0_i32 = arith.constant 0 : i32
    %c0_i32_0 = arith.constant 0 : i32
    return %arg0, %c0_i32 : i32, i32
  }
}

</mosaic_0001>

<bundles_post_ra>
// kernel: downsample_layer_forward.7
= control target key start
LH: loop header
LB: loop body
LE: loop exit
PB: predicated region body
PF: predicated region fallthrough
CT: control target
= control target key end

     0   :  { %s318_s9 = smov 0   ;;  %s345_s0 = inlined_call_operand.vmem [shape: bf16[512,128], index: 0, kind: input, shape index: {}]   ;;  %s346_s1 = inlined_call_operand.vmem [shape: f32[2,128], index: 1, kind: input, shape index: {}]   ;;  %s347_s2 = inlined_call_operand.vmem [shape: f32[512,128], index: 2, kind: output, shape index: {}]  }
   0x1 LB: > { %s255_s10 = sadd.s32 4294967295, %s301_s9   ;;  %p259_p0 = scmp.ge.s32.totalorder %s301_s9, 1  ;;  %s301_s9 = sphi %s318_s9, %s12_s9  }
   0x2   : > { %p113_p1 = scmp.lt.s32.totalorder %s301_s9, 9 }
   0x4   : > { %p114_p2 = pnand %p259_p0, %p113_p1 }
   0x5   : > { %s260_s11 = sshll.u32 (!%p114_p2), %s255_s10, 3 }
   0x6   : > { %117 = sbr.rel (%p114_p2) target bundleno = 31 (0x1f), region = 28  ;;  %p136_p3 = scmp.lt.s32.totalorder (!%p114_p2), %s260_s11, 63 }
   0xb   : > { %s349_s11 = smov (!%p136_p3, %s260_s11), 63  ;;  %v293_v0 = vld [vmem:[%s346_s1] ss:$0 sm:$0xff]  ;;  %v294_v5 = vld [vmem:[%s346_s1 + $0x1] ss:$0 sm:$0xff] }
   0xc   : > { %s261_s12 = sshll.u32 %s349_s11, 2  ;;  %s263_s20 = sshll.u32 %s349_s11, 3 }
   0xd   : > { %s139_s15 = scalar_lea.vmem %s345_s0, %s261_s12  ;;  %s145_s23 = scalar_lea.vmem %s347_s2, %s263_s20 }
   0xe   : > { %v267_v1 = vld [vmem:[%s139_s15] sm:$0xff]   ;;  %v282_v2 = vld [vmem:[%s139_s15 + $0x8] sm:$0xff]   ;;  %v283_v3 = vld [vmem:[%s139_s15 + $0x10] sm:$0xff]  }
   0xf   : > { %v268_v4 = vunpack.c.l.bf16 %v267_v1  ;;  %v269_v6 = vunpack.c.h.bf16 %v267_v1  ;;  %v272_v7 = vunpack.c.l.bf16 %v282_v2  ;;  %v273_v8 = vunpack.c.h.bf16 %v282_v2  ;;  %v284_v9 = vld [vmem:[%s139_s15 + $0x18] sm:$0xff]  }
  0x10   : > { %v276_v10 = vunpack.c.l.bf16 %v283_v3  ;;  %v277_v11 = vunpack.c.h.bf16 %v283_v3  ;;  %v280_v12 = vunpack.c.l.bf16 %v284_v9  ;;  %v281_v13 = vunpack.c.h.bf16 %v284_v9 }
  0x11   : > { %v165_v14 = vmul.f32 %v293_v0, %v268_v4  ;;  %v166_v15 = vmul.f32 %v293_v0, %v269_v6  ;;  %v167_v16 = vmul.f32 %v293_v0, %v272_v7  ;;  %v168_v17 = vmul.f32 %v293_v0, %v273_v8 }
  0x12   : > { %v169_v18 = vmul.f32 %v293_v0, %v276_v10  ;;  %v170_v19 = vmul.f32 %v293_v0, %v277_v11  ;;  %v171_v20 = vmul.f32 %v293_v0, %v280_v12  ;;  %v172_v21 = vmul.f32 %v293_v0, %v281_v13 }
  0x13   : > { %v175_v22 = vadd.f32 %v294_v5, %v165_v14  ;;  %v176_v23 = vadd.f32 %v294_v5, %v166_v15  ;;  %v177_v24 = vadd.f32 %v294_v5, %v167_v16  ;;  %v178_v25 = vadd.f32 %v294_v5, %v168_v17 }
  0x14   : > { %v179_v26 = vadd.f32 %v294_v5, %v169_v18  ;;  %v180_v27 = vadd.f32 %v294_v5, %v170_v19  ;;  %v181_v31 = vadd.f32 %v294_v5, %v171_v20  ;;  %v182_v33 = vadd.f32 %v294_v5, %v172_v21 }
  0x15   : > { %v183_v28 = vmax.f32 %v175_v22, 0.0  ;;  %v184_v29 = vmax.f32 %v176_v23, 0.0  ;;  %v185_v30 = vmax.f32 %v177_v24, 0.0  ;;  %v186_v32 = vmax.f32 %v178_v25, 0.0 }
  0x16   : > { %v187_v34 = vmax.f32 %v179_v26, 0.0  ;;  %v188_v35 = vmax.f32 %v180_v27, 0.0  ;;  %v189_v36 = vmax.f32 %v181_v31, 0.0  ;;  %v190_v37 = vmax.f32 %v182_v33, 0.0 }
  0x17   : > { %191 = vst [vmem:[%s145_s23] sm:$0xff] %v183_v28 }
  0x18   : > { %192 = vst [vmem:[%s145_s23 + $0x8] sm:$0xff] %v184_v29 }
  0x19   : > { %193 = vst [vmem:[%s145_s23 + $0x10] sm:$0xff] %v185_v30 }
  0x1a   : > { %194 = vst [vmem:[%s145_s23 + $0x18] sm:$0xff] %v186_v32 }
  0x1b   : > { %195 = vst [vmem:[%s145_s23 + $0x20] sm:$0xff] %v187_v34 }
  0x1c   : > { %196 = vst [vmem:[%s145_s23 + $0x28] sm:$0xff] %v188_v35 }
  0x1d   : > { %197 = vst [vmem:[%s145_s23 + $0x30] sm:$0xff] %v189_v36 }
  0x1e   : > { %198 = vst [vmem:[%s145_s23 + $0x38] sm:$0xff] %v190_v37 }
  0x1f PF: > { %s12_s9 = sadd.s32 1, %s301_s9  }
  0x20   : > { %p9_p4 = scmp.ge.s32.totalorder %s12_s9, 10  }
  0x22   :  { %11 = sbr.rel (!%p9_p4) target bundleno = 1 (0x1), region = 58 }

// kernel: downsample_layer_forward.6
= control target key start
LH: loop header
LB: loop body
LE: loop exit
PB: predicated region body
PF: predicated region fallthrough
CT: control target
= control target key end

     0   :  { %s1533_s12 = smov 0   ;;  %s1974_s0 = inlined_call_operand.vmem [shape: bf16[32,3,18,4], index: 0, kind: input, shape index: {}]   ;;  %s1975_s1 = inlined_call_operand.vmem [shape: bf16[9,4,128], index: 1, kind: input, shape index: {}]   ;;  %s1976_s2 = inlined_call_operand.vmem [shape: bf16[512,128], index: 2, kind: output, shape index: {0}]   ;;  %s1977_s3 = inlined_call_operand.vmem [shape: f32[8,2,128], index: 3, kind: output, shape index: {1}]  }
   0x1 LB: > { %s1539_s13 = sadd.s32 4294967295, %s1511_s12   ;;  %p1354_p0 = scmp.ge.s32.totalorder %s1511_s12, 1  ;;  %s1511_s12 = sphi %s1533_s12, %s14_s12  }
   0x2   : > { %p142_p1 = scmp.lt.s32.totalorder %s1511_s12, 9 }
   0x4   : > { %p143_p2 = pnand %p1354_p0, %p142_p1 }
   0x5   : > { %s1355_s16 = sshll.u32 (!%p143_p2), %s1539_s13, 2  ;;  %s1357_s10 = sshll.u32 (!%p143_p2), %s1539_s13, 3 }
   0x6   : > { %146 = sbr.rel (%p143_p2) target bundleno = 328 (0x148), region = 28  ;;  %p172_p3 = scmp.lt.s32.totalorder (!%p143_p2), %s1355_s16, 31 }
   0x7   : > { %p179_p4 = scmp.lt.s32.totalorder (!%p143_p2), %s1357_s10, 63  ;;  %p184_p5 = scmp.lt.s32.totalorder (!%p143_p2), %s1539_s13, 7 }
   0xb   : > { %v226_v0 = vld [vmem:[%s1975_s1 + $0x2] sm:$0x3]  ;;  %vm358_vm0 = vcmask 1041408   ;;  %v227_v2 = vld [vmem:[%s1975_s1 + $0x4] sm:$0x3]  ;;  %s1983_s16 = smov (!%p172_p3, %s1355_s16), 31 }
   0xc   : > { %v360_v1 = vsel %vm358_vm0, %v226_v0, 0  ;;  %v515_v3 = vsel %vm358_vm0, %v227_v2, 0  ;;  %v228_v4 = vld [vmem:[%s1975_s1 + $0x6] sm:$0x3]  ;;  %v225_v5 = vld [vmem:[%s1975_s1] sm:$0x3] }
   0xd   : > { %1493 = vmatpush.bf16.msra.mxu1 %v360_v1  ;;  %1494 = vmatpush.bf16.msra.mxu2 %v360_v1  ;;  %v229_v6 = vld [vmem:[%s1975_s1 + $0x8] sm:$0x3]  ;;  %s1496_s25 = smul.u32 36, %s1983_s16  ;;  %v587_v7 = vsel %vm358_vm0, %v228_v4, 0  ;;  %v424_v8 = vsel %vm358_vm0, %v225_v5, 0  ;;  %vm345_vm3 = vcmask 31744  }
   0xe   : > { %1495 = vmatpush.bf16.msra.mxu3 %v360_v1  ;;  %369 = vmatpush.bf16.msra.mxu0 %v360_v1  ;;  %v747_v9 = vsel %vm358_vm0, %v229_v6, 0  ;;  %vm234_vm1 = vsmask.f32 3328  ;;  %vm235_vm2 = vsmask.f32 7440  ;;  %vm459_vm5 = vcmask 1042432  }
   0xf   : > { %s1567_s28 = scalar_lea.vmem %s1974_s0, %s1496_s25  ;;  %vm1605_vm4 = vmor %vm234_vm1, %vm235_vm2  ;;  %vm460_vm6 = vcmask 1046532   ;;  %s1985_s10 = smov (!%p179_p4, %s1357_s10), 63  ;;  %vm1260_vm8 = vcmask 1040384  }
  0x10   : > { %v1570_v10 = vld [vmem:[%s1567_s28 + $0x24] sm:$0xf]  ;;  %v1573_v11 = vld [vmem:[%s1567_s28 + $0x28] sm:$0xf]  ;;  %v1576_v12 = vld [vmem:[%s1567_s28 + $0x2c] sm:$0x1] }
  0x11   : > { %524 = vmatpush.bf16.msrb.mxu2 %v515_v3  ;;  %433 = vmatpush.bf16.msrb.mxu1 %v424_v8  ;;  %v262_v13 = vshrl.u32 %v1570_v10, 16  ;;  %v265_v14 = vshll.u32 %v1570_v10, 16  ;;  %v271_v15 = vshll.u32 %v1573_v11, 16  ;;  %v275_v16 = vshrl.u32 %v1573_v11, 16  ;;  %v1583_v17 = vld [vmem:[%s1567_s28 + $0x48] sm:$0xf]  ;;  %vm1642_vm7 = vmor %vm459_vm5, %vm460_vm6 }
  0x12   : > { %596 = vmatpush.bf16.msrb.mxu3 %v587_v7  ;;  %756 = vmatpush.bf16.msrb.mxu0 %v747_v9  ;;  %v281_v18 = vshll.u32 %v1576_v12, 16  ;;  %v1587_v19 = vld [vmem:[%s1567_s28 + $0x4c] sm:$0xf]  ;;  %v1590_v20 = vld [vmem:[%s1567_s28 + $0x50] sm:$0x1]  ;;  %v286_v21 = vshrl.u32 %v1583_v17, 16 }
  0x13   : > { %v264_v22 = vrot.slane %v262_v13, 4  ;;  %v267_v23 = vrot.slane %v265_v14, 5  ;;  %v273_v24 = vrot.slane %v271_v15, 5  ;;  %v277_v25 = vrot.slane %v275_v16, 4  ;;  %v1594_v26 = vld [vmem:[%s1567_s28 + $0x6c] sm:$0xf] }
  0x14   : > { %v283_v27 = vrot.slane %v281_v18, 5  ;;  %v288_v28 = vrot.slane %v286_v21, 4  ;;  %v289_v29 = vshll.u32 %v1583_v17, 16  ;;  %v295_v30 = vshll.u32 %v1587_v19, 16  ;;  %v1601_v35 = vld [vmem:[%s1567_s28 + $0x70] sm:$0xf] }
  0x15   : > { %v268_v31 = vor.u32 %v267_v23, %v264_v22  ;;  %v278_v32 = vor.u32 %v277_v25, %v273_v24  ;;  %v299_v33 = vshrl.u32 %v1587_v19, 16  ;;  %v305_v34 = vshll.u32 %v1590_v20, 16  ;;  %v1612_v46 = vld [vmem:[%s1567_s28 + $0x74] sm:$0x1]  ;;  %v189_v54 = vld [vmem:[%s1567_s28] sm:$0xf] }
  0x16   : > { %v291_v37 = vrot.slane %v289_v29, 5  ;;  %v297_v38 = vrot.slane %v295_v30, 5  ;;  %v310_v39 = vshrl.u32 %v1594_v26, 16  ;;  %v313_v40 = vshll.u32 %v1594_v26, 16  ;;  %v190_v2 = vld [vmem:[%s1567_s28 + $0x4] sm:$0xf] }
  0x17   : > { %v269_v41 = vrot.slane %v268_v31, 4  ;;  %v279_v42 = vrot.slane %v278_v32, 4  ;;  %v301_v43 = vrot.slane %v299_v33, 4  ;;  %v307_v44 = vrot.slane %v305_v34, 5  ;;  %v191_v8 = vld [vmem:[%s1567_s28 + $0x8] sm:$0x1] }
  0x18   : > { %v292_v45 = vor.u32 %v291_v37, %v288_v28  ;;  %v312_v47 = vrot.slane %v310_v39, 4  ;;  %v315_v48 = vrot.slane %v313_v40, 5  ;;  %v319_v49 = vshll.u32 %v1601_v35, 16  ;;  %v231_v23 = vld [vmem:[%s1975_s1 + $0xc] sm:$0x3]  ;;  %s1358_s11 = sshll.u32 %s1985_s10, 2 }
  0x19   : > { %v274_v50 = vsel %vm1605_vm4, %v269_v41, %v273_v24  ;;  %v284_v51 = vsel %vm1605_vm4, %v279_v42, %v283_v27  ;;  %v302_v52 = vor.u32 %v301_v43, %v297_v38  ;;  %v323_v53 = vshrl.u32 %v1601_v35, 16  ;;  %v1635_v29 = vld [vmem:[%s1567_s28 + $0xc] sm:$0xf]  ;;  %v1648_v43 = vld [vmem:[%s1567_s28 + $0x10] sm:$0xf]  ;;  %s1945_s16 = scalar_lea.vmem %s1976_s2, %s1358_s11  ;;  %s1987_s13 = smov (!%p184_p5, %s1539_s13), 7 }
  0x1a   : > { %v335_v55 = vunpack.c.l.b16 %v274_v50  ;;  %v336_v56 = vunpack.c.l.b16 %v284_v51  ;;  %v293_v57 = vrot.slane %v292_v45, 4  ;;  %v316_v58 = vor.u32 %v315_v48, %v312_v47  ;;  %s1359_s17 = sshll.u32 %s1987_s13, 1 }
  0x1b   : > { %v303_v59 = vrot.slane %v302_v52, 4  ;;  %v321_v60 = vrot.slane %v319_v49, 5  ;;  %v325_v61 = vrot.slane %v323_v53, 4  ;;  %v329_v62 = vshll.u32 %v1612_v46, 16  ;;  %s187_s20 = scalar_lea.vmem %s1977_s3, %s1359_s17 }
  0x1c   : > { %v342_v63 = vpack.c.b16 %v336_v56, %v335_v55  ;;  %v298_v0 = vsel %vm1605_vm4, %v293_v57, %v297_v38  ;;  %v317_v1 = vrot.slane %v316_v58, 4  ;;  %v238_v3 = vshrl.u32 %v189_v54, 16  ;;  %v1658_v55 = vld [vmem:[%s1567_s28 + $0x14] sm:$0x1]  ;;  %v232_v58 = vld [vmem:[%s1975_s1 + $0xe] sm:$0x3] }
  0x1d   : > { %v308_v4 = vsel %vm1605_vm4, %v303_v59, %v307_v44  ;;  %v337_v5 = vunpack.c.l.b16 %v298_v0  ;;  %v326_v6 = vor.u32 %v325_v61, %v321_v60  ;;  %v331_v7 = vrot.slane %v329_v62, 5  ;;  %v230_v62 = vld [vmem:[%s1975_s1 + $0xa] sm:$0x3] }
  0x1e   : > { %1361 = vmatmul.msk.bf16.vlgmr.msra.gmra.mxu1 %vm345_vm3, %v342_v63  ;;  %v338_v9 = vunpack.c.l.b16 %v308_v4  ;;  %v322_v13 = vsel %vm1605_vm4, %v317_v1, %v321_v60  ;;  %v240_v14 = vrot.slane %v238_v3, 4  ;;  %v241_v15 = vshll.u32 %v189_v54, 16  ;;  %v233_v3 = vld [vmem:[%s1975_s1 + $0x10] sm:$0x3] }
  0x1f   : > { %v327_v16 = vrot.slane %v326_v6, 4  ;;  %v339_v18 = vunpack.c.l.b16 %v322_v13  ;;  %v247_v21 = vshll.u32 %v190_v2, 16  ;;  %v251_v22 = vshrl.u32 %v190_v2, 16 }
  0x20   : > { %v343_v24 = vpack.c.b16 %v338_v9, %v337_v5  ;;  %v243_v25 = vrot.slane %v241_v15, 5  ;;  %v257_v27 = vshll.u32 %v191_v8, 16  ;;  %v467_v28 = vrot.slane %v191_v8, 5  ;;  %v1458_v8 = vld [vmem:[%s1567_s28] sm:$0xff] }
  0x21   : > { %v332_v30 = vsel %vm1605_vm4, %v327_v16, %v331_v7  ;;  %v249_v31 = vrot.slane %v247_v21, 5  ;;  %v253_v32 = vrot.slane %v251_v22, 4  ;;  %v1384_v33 = vrot.slane %v189_v54, 9  ;;  %v1682_v22 = vld [vmem:[%s1567_s28 + $0x30] sm:$0xf] }
  0x22   : > { %1362 = vmatmul.msk.bf16.vlgmr.msra.gmra.mxu2 %vm345_vm3, %v343_v24  ;;  %v340_v34 = vunpack.c.l.b16 %v332_v30  ;;  %v244_v37 = vor.u32 %v243_v25, %v240_v14  ;;  %v259_v38 = vrot.slane %v257_v27, 5  ;;  %v464_v39 = vrot.slane %v190_v2, 5  ;;  %v1686_v24 = vld [vmem:[%s1567_s28 + $0x34] sm:$0xf] }
  0x23   : > { %v254_v40 = vor.u32 %v253_v32, %v249_v31  ;;  %v915_v42 = vsel %vm358_vm0, %v231_v23, 0  ;;  %v627_v44 = vshrl.u32 %v1635_v29, 16  ;;  %v630_v45 = vshll.u32 %v1635_v29, 16 }
  0x24   : > { %v344_v47 = vpack.c.b16 %v340_v34, %v339_v18  ;;  %v245_v48 = vrot.slane %v244_v37, 4  ;;  %v466_v49 = vrot.slane %v464_v39, 4  ;;  %924 = vmatpush.bf16.msra.mxu2 %v915_v42  ;;  %v465_v54 = vsel %vm1642_vm7, %v1384_v33, %v464_v39  ;;  %v1459_v34 = vld [vmem:[%s1567_s28 + $0xc] sm:$0xff] }
  0x25   : > { %v255_v50 = vrot.slane %v254_v40, 4  ;;  %v629_v51 = vrot.slane %v627_v44, 4  ;;  %v632_v52 = vrot.slane %v630_v45, 5  ;;  %v636_v56 = vshll.u32 %v1648_v43, 16 }
  0x26   : > { %1363 = vmatmul.msk.bf16.vlgmr.msra.gmra.mxu3 %vm345_vm3, %v344_v47  ;;  %v250_v53 = vsel %vm1605_vm4, %v245_v48, %v249_v31  ;;  %v640_v57 = vshrl.u32 %v1648_v43, 16  ;;  %v468_v61 = vsel %vm1642_vm7, %v466_v49, %v467_v28  ;;  %v490_v4 = vunpack.c.l.b16 %v465_v54  ;;  %v1703_v48 = vld [vmem:[%s1567_s28 + $0x38] sm:$0x1] }
  0x27   : > { %v260_v59 = vsel %vm1605_vm4, %v255_v50, %v259_v38  ;;  %v333_v60 = vunpack.c.l.b16 %v250_v53  ;;  %v633_v0 = vor.u32 %v632_v52, %v629_v51  ;;  %v638_v1 = vrot.slane %v636_v56, 5  ;;  %v1461_v53 = vld [vmem:[%s1567_s28 + $0x24] sm:$0xff] }
  0x28   : > { %v334_v63 = vunpack.c.l.b16 %v260_v59  ;;  %v642_v2 = vrot.slane %v640_v57, 4  ;;  %v646_v5 = vshll.u32 %v1658_v55, 16  ;;  %v1075_v6 = vsel %vm358_vm0, %v232_v58, 0  ;;  %v1713_v57 = vld [vmem:[%s1567_s28 + $0x54] sm:$0xf] }
  0x29   : > { %v491_v9 = vunpack.c.l.b16 %v468_v61  ;;  %1084 = vmatpush.bf16.msra.mxu3 %v1075_v6  ;;  %v843_v14 = vsel %vm358_vm0, %v230_v62, 0  ;;  %v1171_v15 = vsel %vm358_vm0, %v233_v3, 0  ;;  %v634_v16 = vrot.slane %v633_v0, 4  ;;  %v1716_v61 = vld [vmem:[%s1567_s28 + $0x58] sm:$0xf] }
  0x2a   : > { %v341_v7 = vpack.c.b16 %v334_v63, %v333_v60  ;;  %v643_v13 = vor.u32 %v642_v2, %v638_v1  ;;  %852 = vmatpush.bf16.msra.mxu1 %v843_v14  ;;  %v648_v21 = vrot.slane %v646_v5, 5  ;;  %v471_v25 = vrot.slane %v1573_v11, 5 }
  0x2b   : > { %v498_v23 = vpack.c.b16 %v491_v9, %v490_v4  ;;  %v639_v27 = vsel %vm1605_vm4, %v634_v16, %v638_v1  ;;  %v651_v28 = vshrl.u32 %v1682_v22, 16  ;;  %v654_v31 = vshll.u32 %v1682_v22, 16 }
  0x2c   : > { %1360 = vmatmul.msk.bf16.vlgmr.msra.gmra.mxu0 %vm345_vm3, %v341_v7  ;;  %v644_v18 = vrot.slane %v643_v13, 4  ;;  %v660_v32 = vshll.u32 %v1686_v24, 16  ;;  %v664_v33 = vshrl.u32 %v1686_v24, 16  ;;  %v1385_v11 = vrot.slane %v1570_v10, 9 }
  0x2d   : > { %1180 = vmatpush.bf16.msra.mxu0 %v1171_v15  ;;  %v473_v37 = vrot.slane %v471_v25, 4  ;;  %v474_v38 = vrot.slane %v1576_v12, 5  ;;  %v722_v39 = vunpack.c.l.b16 %v639_v27  ;;  %v653_v42 = vrot.slane %v651_v28, 4 }
  0x2e   : > { %1380 = vmatmul.msk.bf16.vlgmr.msrb.gmra.mxu1 %vm345_vm3, %v1458_v8  ;;  %v649_v30 = vsel %vm1605_vm4, %v644_v18, %v648_v21  ;;  %v656_v44 = vrot.slane %v654_v31, 5  ;;  %v662_v45 = vrot.slane %v660_v32, 5  ;;  %v666_v47 = vrot.slane %v664_v33, 4  ;;  %v1743_v31 = vld [vmem:[%s1567_s28 + $0x5c] sm:$0x1] }
  0x2f   : > { %v723_v40 = vunpack.c.l.b16 %v649_v30  ;;  %v472_v49 = vsel %vm1642_vm7, %v1385_v11, %v471_v25  ;;  %v475_v10 = vsel %vm1642_vm7, %v473_v37, %v474_v38  ;;  %v670_v52 = vshll.u32 %v1703_v48, 16  ;;  %v1464_v37 = vld [vmem:[%s1567_s28 + $0x48] sm:$0xff] }
  0x30   : > { %v657_v12 = vor.u32 %v656_v44, %v653_v42  ;;  %v667_v51 = vor.u32 %v666_v47, %v662_v45  ;;  %v492_v54 = vunpack.c.l.b16 %v472_v49  ;;  %v493_v56 = vunpack.c.l.b16 %v475_v10  ;;  %v1757_v49 = vld [vmem:[%s1567_s28 + $0x7c] sm:$0xf] }
  0x31   : > { %v730_v50 = vpack.c.b16 %v723_v40, %v722_v39  ;;  %v672_v60 = vrot.slane %v670_v52, 5  ;;  %v1387_v63 = vrot.slane %v1594_v26, 9  ;;  %v485_v0 = vrot.slane %v1601_v35, 5 }
  0x32   : > { %1388 = vmatmul.msk.bf16.vlgmr.msrb.gmra.mxu2 %vm345_vm3, %v498_v23  ;;  %v658_v58 = vrot.slane %v657_v12, 4  ;;  %v668_v59 = vrot.slane %v667_v51, 4  ;;  %v499_v62 = vpack.c.b16 %v493_v56, %v492_v54  ;;  %v488_v1 = vrot.slane %v1612_v46, 5  ;;  %v1465_v54 = vld [vmem:[%s1567_s28 + $0x54] sm:$0xff] }
  0x33   : > { %v478_v2 = vrot.slane %v1587_v19, 5  ;;  %v675_v3 = vshrl.u32 %v1713_v57, 16  ;;  %v678_v4 = vshll.u32 %v1713_v57, 16  ;;  %v684_v5 = vshll.u32 %v1716_v61, 16  ;;  %v1462_v19 = vld [vmem:[%s1567_s28 + $0x30] sm:$0xff] }
  0x34   : > { %v486_v6 = vsel %vm1642_vm7, %v1387_v63, %v485_v0  ;;  %v487_v7 = vrot.slane %v485_v0, 4  ;;  %v663_v8 = vsel %vm1605_vm4, %v658_v58, %v662_v45  ;;  %v673_v26 = vsel %vm1605_vm4, %v668_v59, %v672_v60  ;;  %v1753_v45 = vld [vmem:[%s1567_s28 + $0x78] sm:$0xf]  ;;  %v1771_v0 = vld [vmem:[%s1567_s28 + $0x80] sm:$0x1] }
  0x35   : > { %v688_v35 = vshrl.u32 %v1716_v61, 16  ;;  %v496_v46 = vunpack.c.l.b16 %v486_v6  ;;  %v1386_v13 = vrot.slane %v1583_v17, 9  ;;  %v480_v14 = vrot.slane %v478_v2, 4 }
  0x36   : > { %1408 = vmatmul.msk.bf16.vlgmr.msrb.gmra.mxu3 %vm345_vm3, %v1459_v34  ;;  %v489_v9 = vsel %vm1642_vm7, %v487_v7, %v488_v1  ;;  %v481_v15 = vrot.slane %v1590_v20, 5  ;;  %v724_v18 = vunpack.c.l.b16 %v663_v8  ;;  %v725_v21 = vunpack.c.l.b16 %v673_v26  ;;  %v1774_v1 = vld [vmem:[%s1567_s28 + $0x18] sm:$0xf]  ;;  %v1467_v26 = vld [vmem:[%s1567_s28 + $0x6c] sm:$0xff] }
  0x37   : > { %v497_v16 = vunpack.c.l.b16 %v489_v9  ;;  %v677_v23 = vrot.slane %v675_v3, 4  ;;  %v680_v25 = vrot.slane %v678_v4, 5  ;;  %v686_v27 = vrot.slane %v684_v5, 5 }
  0x38   : > { %v690_v28 = vrot.slane %v688_v35, 4  ;;  %v479_v17 = vsel %vm1642_vm7, %v1386_v13, %v478_v2  ;;  %v482_v20 = vsel %vm1642_vm7, %v480_v14, %v481_v15  ;;  %v731_v32 = vpack.c.b16 %v725_v21, %v724_v18  ;;  %v1777_v2 = vld [vmem:[%s1567_s28 + $0x1c] sm:$0xf] }
  0x39   : > { %v1739_v30 = vpack.c.b16 %v497_v16, %v496_v46  ;;  %v681_v33 = vor.u32 %v680_v25, %v677_v23  ;;  %v694_v11 = vshll.u32 %v1743_v31, 16  ;;  %v494_v38 = vunpack.c.l.b16 %v479_v17 }
  0x3a   : > { %v691_v34 = vor.u32 %v690_v28, %v686_v27  ;;  %v495_v39 = vunpack.c.l.b16 %v482_v20  ;;  %v699_v10 = vshrl.u32 %v1753_v45, 16  ;;  %v708_v52 = vshll.u32 %v1757_v49, 16  ;;  %v1468_v20 = vld [vmem:[%s1567_s28 + $0x78] sm:$0xff] }
  0x3b   : > { %v682_v40 = vrot.slane %v681_v33, 4  ;;  %v696_v44 = vrot.slane %v694_v11, 5  ;;  %v718_v6 = vshll.u32 %v1771_v0, 16  ;;  %v955_v7 = vshrl.u32 %v1774_v1, 16 }
  0x3c   : > { %1412 = vmatmul.msk.bf16.vlgmr.msrb.gmra.mxu0 %vm345_vm3, %v730_v50  ;;  %v692_v42 = vrot.slane %v691_v34, 4  ;;  %v500_v47 = vpack.c.b16 %v495_v39, %v494_v38  ;;  %v702_v50 = vshll.u32 %v1753_v45, 16  ;;  %v701_v59 = vrot.slane %v699_v10, 4 }
  0x3d   : > { %v687_v12 = vsel %vm1605_vm4, %v682_v40, %v686_v27  ;;  %v958_v8 = vshll.u32 %v1774_v1, 16  ;;  %v792_v35 = vrot.slane %v1648_v43, 5  ;;  %v964_v46 = vshll.u32 %v1777_v2, 16  ;;  %v197_v27 = vld [vmem:[%s1567_s28 + $0x20] sm:$0x1] }
  0x3e   : > { %1381 = vmatmul.msk.bf16.gmra.mxu1 %vm345_vm3, %v1461_v53  ;;  %v697_v51 = vsel %vm1605_vm4, %v692_v42, %v696_v44  ;;  %v712_v53 = vshrl.u32 %v1757_v49, 16  ;;  %v726_v56 = vunpack.c.l.b16 %v687_v12  ;;  %v704_v60 = vrot.slane %v702_v50, 5 }
  0x3f   : > { %v727_v58 = vunpack.c.l.b16 %v697_v51  ;;  %v795_v9 = vrot.slane %v1658_v55, 5  ;;  %v720_v15 = vrot.slane %v718_v6, 5  ;;  %v957_v16 = vrot.slane %v955_v7, 4 }
  0x40   : > { %v714_v63 = vrot.slane %v712_v53, 4  ;;  %v705_v4 = vor.u32 %v704_v60, %v701_v59  ;;  %v960_v18 = vrot.slane %v958_v8, 5  ;;  %v1416_v21 = vrot.slane %v1635_v29, 9 }
  0x41   : > { %v732_v3 = vpack.c.b16 %v727_v58, %v726_v56  ;;  %v794_v23 = vrot.slane %v792_v35, 4  ;;  %v966_v43 = vrot.slane %v964_v46, 5  ;;  %v974_v34 = vshll.u32 %v197_v27, 16  ;;  %v206_v46 = vld [vmem:[%s1567_s28 + $0x44] sm:$0x1] }
  0x42   : > { %1389 = vmatmul.msk.bf16.gmra.mxu2 %vm345_vm3, %v499_v62  ;;  %v710_v62 = vrot.slane %v708_v52, 5  ;;  %v706_v13 = vrot.slane %v705_v4, 4  ;;  %v961_v17 = vor.u32 %v960_v18, %v957_v16  ;;  %v793_v29 = vsel %vm1642_vm7, %v1416_v21, %v792_v35 }
  0x43   : > { %v818_v38 = vunpack.c.l.b16 %v793_v29  ;;  %v976_v44 = vrot.slane %v974_v34, 5  ;;  %v1120_v50 = vrot.slane %v1777_v2, 5  ;;  %v799_v56 = vrot.slane %v1686_v24, 5  ;;  %v1460_v24 = vld [vmem:[%s1567_s28 + $0x18] sm:$0xff] }
  0x44   : > { %v715_v5 = vor.u32 %v714_v63, %v710_v62  ;;  %v711_v28 = vsel %vm1605_vm4, %v706_v13, %v710_v62  ;;  %v962_v40 = vrot.slane %v961_v17, 4  ;;  %v1448_v62 = vrot.slane %v1774_v1, 9 }
  0x45   : > { %v728_v11 = vunpack.c.l.b16 %v711_v28  ;;  %v1122_v63 = vrot.slane %v1120_v50, 4  ;;  %v1417_v4 = vrot.slane %v1682_v22, 9  ;;  %v801_v7 = vrot.slane %v799_v56, 4  ;;  %v1837_v28 = vld [vmem:[%s1567_s28 + $0x60] sm:$0xf] }
  0x46   : > { %1409 = vmatmul.msk.bf16.gmra.mxu3 %vm345_vm3, %v1462_v19  ;;  %v968_v19 = vshrl.u32 %v1777_v2, 16  ;;  %v716_v14 = vrot.slane %v715_v5, 4  ;;  %v967_v51 = vsel %vm1605_vm4, %v962_v40, %v966_v43  ;;  %v1123_v2 = vrot.slane %v197_v27, 5 }
  0x47   : > { %v1050_v60 = vunpack.c.l.b16 %v967_v51  ;;  %v802_v8 = vrot.slane %v1703_v48, 5  ;;  %v1121_v1 = vsel %vm1642_vm7, %v1448_v62, %v1120_v50  ;;  %v800_v13 = vsel %vm1642_vm7, %v1417_v4, %v799_v56 }
  0x48   : > { %v970_v25 = vrot.slane %v968_v19, 4  ;;  %v721_v55 = vsel %vm1605_vm4, %v716_v14, %v720_v15  ;;  %v998_v15 = vshll.u32 %v206_v46, 16  ;;  %v1146_v16 = vunpack.c.l.b16 %v1121_v1 }
  0x49   : > { %v803_v48 = vsel %vm1642_vm7, %v801_v7, %v802_v8  ;;  %v820_v21 = vunpack.c.l.b16 %v800_v13  ;;  %v806_v34 = vrot.slane %v1716_v61, 5  ;;  %v1418_v50 = vrot.slane %v1713_v57, 9  ;;  %v1463_v61 = vld [vmem:[%s1567_s28 + $0x3c] sm:$0xff] }
  0x4a   : > { %v971_v33 = vor.u32 %v970_v25, %v966_v43  ;;  %v1000_v27 = vrot.slane %v998_v15, 5  ;;  %v809_v51 = vrot.slane %v1743_v31, 5  ;;  %v813_v15 = vrot.slane %v1757_v49, 5 }
  0x4b   : > { %v816_v49 = vrot.slane %v1771_v0, 5 }
  0x4c   : > { %1413 = vmatmul.msk.bf16.gmra.mxu0 %vm345_vm3, %v731_v32  ;;  %v796_v32 = vsel %vm1642_vm7, %v794_v23, %v795_v9  ;;  %v972_v42 = vrot.slane %v971_v33, 4  ;;  %v1124_v9 = vsel %vm1642_vm7, %v1122_v63, %v1123_v2  ;;  %v821_v23 = vunpack.c.l.b16 %v803_v48 }
  0x4d   : > { %v819_v39 = vunpack.c.l.b16 %v796_v32  ;;  %v1147_v18 = vunpack.c.l.b16 %v1124_v9 }
  0x4e   : > { %1382 = vmatmul.msk.bf16.gmra.mxu1 %vm345_vm3, %v1464_v37  ;;  %v729_v37 = vunpack.c.l.b16 %v721_v55  ;;  %v827_v29 = vpack.c.b16 %v821_v23, %v820_v21  ;;  %v1450_v21 = vrot.slane %v1837_v28, 9 }
  0x4f   : > { %v826_v12 = vpack.c.b16 %v819_v39, %v818_v38  ;;  %v1154_v55 = vpack.c.b16 %v1147_v18, %v1146_v16 }
  0x50   : > { %v733_v10 = vpack.c.b16 %v729_v37, %v728_v11  ;;  %v1003_v11 = vshrl.u32 %v1837_v28, 16  ;;  %v1006_v37 = vshll.u32 %v1837_v28, 16 }
  0x52   : > { %1390 = vmatmul.msk.bf16.gmra.mxu2 %vm345_vm3, %v500_v47  ;;  %v1804_v47 = vld [vmem:[%s1567_s28 + $0x3c] sm:$0xf] }
  0x53   : > { %v979_v52 = vshrl.u32 %v1804_v47, 16  ;;  %v982_v53 = vshll.u32 %v1804_v47, 16  ;;  %v1449_v40 = vrot.slane %v1804_v47, 9 }
  0x55   : > { %v981_v5 = vrot.slane %v979_v52, 4  ;;  %v984_v6 = vrot.slane %v982_v53, 5  ;;  %v1005_v52 = vrot.slane %v1003_v11, 4  ;;  %v1008_v53 = vrot.slane %v1006_v37, 5 }
  0x56   : > { %1410 = vmatmul.msk.bf16.gmra.mxu3 %vm345_vm3, %v1465_v54  ;;  %v977_v54 = vsel %vm1605_vm4, %v972_v42, %v976_v44 }
  0x57   : > { %v985_v22 = vor.u32 %v984_v6, %v981_v5  ;;  %v1009_v62 = vor.u32 %v1008_v53, %v1005_v52 }
  0x59   : > { %v986_v43 = vrot.slane %v985_v22, 4 }
  0x5c   : > { %1414 = vmatmul.msk.bf16.gmra.mxu0 %vm345_vm3, %v732_v3  ;;  %v1051_v3 = vunpack.c.l.b16 %v977_v54 }
  0x5e   : > { %1383 = vmatmul.msk.bf16.gmra.mxu1 %vm345_vm3, %v1467_v26  ;;  %v1058_v19 = vpack.c.b16 %v1051_v3, %v1050_v60  ;;  %v807_v60 = vsel %vm1642_vm7, %v1418_v50, %v806_v34 }
  0x5f   : > { %v822_v5 = vunpack.c.l.b16 %v807_v60  ;;  %v1469_v60 = vld [vmem:[%s1567_s28 + $0x84] sm:$0xff] }
  0x62   : > { %1391 = vmatmul.msk.bf16.gmra.mxu2 %vm345_vm3, %v1739_v30  ;;  %v1807_v30 = vld [vmem:[%s1567_s28 + $0x40] sm:$0xf] }
  0x63   : > { %v988_v58 = vshll.u32 %v1807_v30, 16  ;;  %v992_v59 = vshrl.u32 %v1807_v30, 16  ;;  %v1127_v17 = vrot.slane %v1807_v30, 5 }
  0x65   : > { %v990_v26 = vrot.slane %v988_v58, 5  ;;  %v994_v35 = vrot.slane %v992_v59, 4  ;;  %v1129_v42 = vrot.slane %v1127_v17, 4  ;;  %v215_v58 = vld [vmem:[%s1567_s28 + $0x68] sm:$0x1]  ;;  %v1128_v47 = vsel %vm1642_vm7, %v1449_v40, %v1127_v17 }
  0x66   : > { %1411 = vmatmul.msk.bf16.gmra.mxu3 %vm345_vm3, %v1468_v20  ;;  %v1841_v20 = vld [vmem:[%s1567_s28 + $0x64] sm:$0xf]  ;;  %v1022_v2 = vshll.u32 %v215_v58, 16  ;;  %v1148_v3 = vunpack.c.l.b16 %v1128_v47 }
  0x67   : > { %v995_v14 = vor.u32 %v994_v35, %v990_v26  ;;  %v991_v32 = vsel %vm1605_vm4, %v986_v43, %v990_v26  ;;  %v1012_v38 = vshll.u32 %v1841_v20, 16  ;;  %v1016_v39 = vshrl.u32 %v1841_v20, 16  ;;  %v222_v26 = vld [vmem:[%s1567_s28 + $0x84] sm:$0xf]  ;;  %v223_v35 = vld [vmem:[%s1567_s28 + $0x88] sm:$0xf] }
  0x68   : > { %v1052_v44 = vunpack.c.l.b16 %v991_v32  ;;  %v1024_v8 = vrot.slane %v1022_v2, 5  ;;  %v1134_v1 = vrot.slane %v1841_v20, 5  ;;  %v1027_v22 = vshrl.u32 %v222_v26, 16 }
  0x69   : > { %v996_v25 = vrot.slane %v995_v14, 4  ;;  %v1014_v54 = vrot.slane %v1012_v38, 5  ;;  %v1018_v56 = vrot.slane %v1016_v39, 4  ;;  %v1030_v13 = vshll.u32 %v222_v26, 16 }
  0x6a   : > { %v1036_v48 = vshll.u32 %v223_v35, 16  ;;  %v1040_v16 = vshrl.u32 %v223_v35, 16  ;;  %v1136_v23 = vrot.slane %v1134_v1, 4  ;;  %v1137_v43 = vrot.slane %v215_v58, 5 }
  0x6b   : > { %v1001_v33 = vsel %vm1605_vm4, %v996_v25, %v1000_v27  ;;  %v1019_v63 = vor.u32 %v1018_v56, %v1014_v54  ;;  %v1466_v25 = vld [vmem:[%s1567_s28 + $0x60] sm:$0xff]  ;;  %v1032_v17 = vrot.slane %v1030_v13, 5  ;;  %v815_v32 = vrot.slane %v813_v15, 4 }
  0x6c   : > { %1415 = vmatmul.msk.bf16.gmra.mxu0 %vm345_vm3, %v733_v10  ;;  %v1053_v30 = vunpack.c.l.b16 %v1001_v33  ;;  %v1130_v10 = vrot.slane %v206_v46, 5  ;;  %v1038_v20 = vrot.slane %v1036_v48, 5  ;;  %v1042_v33 = vrot.slane %v1040_v16, 4 }
  0x6d   : > { %v1020_v7 = vrot.slane %v1019_v63, 4  ;;  %v1135_v11 = vsel %vm1642_vm7, %v1450_v21, %v1134_v1  ;;  %v1138_v28 = vsel %vm1642_vm7, %v1136_v23, %v1137_v43  ;;  %v1141_v52 = vrot.slane %v223_v35, 5 }
  0x6e   : > { %1420 = vmatmul.msk.bf16.vlgmr.msra.gmra.mxu1 %vm345_vm3, %v826_v12  ;;  %v808_v12 = vrot.slane %v806_v34, 4  ;;  %v1131_v59 = vsel %vm1642_vm7, %v1129_v42, %v1130_v10  ;;  %v1059_v57 = vpack.c.b16 %v1053_v30, %v1052_v44  ;;  %v224_v34 = vld [vmem:[%s1567_s28 + $0x8c] sm:$0x1]  ;;  %v1043_v40 = vor.u32 %v1042_v33, %v1038_v20 }
  0x6f   : > { %v1149_v4 = vunpack.c.l.b16 %v1131_v59  ;;  %v1025_v14 = vsel %vm1605_vm4, %v1020_v7, %v1024_v8  ;;  %v1046_v0 = vshll.u32 %v224_v34, 16  ;;  %v1150_v42 = vunpack.c.l.b16 %v1135_v11 }
  0x70   : > { %v810_v31 = vsel %vm1642_vm7, %v808_v12, %v809_v51  ;;  %v1055_v27 = vunpack.c.l.b16 %v1025_v14  ;;  %v1151_v44 = vunpack.c.l.b16 %v1138_v28  ;;  %v1451_v47 = vrot.slane %v222_v26, 9 }
  0x71   : > { %v823_v6 = vunpack.c.l.b16 %v810_v31  ;;  %v1155_v46 = vpack.c.b16 %v1149_v4, %v1148_v3  ;;  %v1048_v12 = vrot.slane %v1046_v0, 5  ;;  %v1143_v59 = vrot.slane %v1141_v52, 4 }
  0x72   : > { %1440 = vmatmul.msk.bf16.vlgmr.msra.gmra.mxu2 %vm345_vm3, %v1460_v24  ;;  %v1010_v24 = vrot.slane %v1009_v62, 4  ;;  %v1156_v51 = vpack.c.b16 %v1151_v44, %v1150_v42  ;;  %v1142_v63 = vsel %vm1642_vm7, %v1451_v47, %v1141_v52 }
  0x73   : > { %v1152_v4 = vunpack.c.l.b16 %v1142_v63 }
  0x74   : > { %v1015_v9 = vsel %vm1605_vm4, %v1010_v24, %v1014_v54 }
  0x75   : > { %v1054_v18 = vunpack.c.l.b16 %v1015_v9 }
  0x76   : > { %1444 = vmatmul.msk.bf16.vlgmr.msra.gmra.mxu3 %vm345_vm3, %v1058_v19  ;;  %v828_v19 = vpack.c.b16 %v823_v6, %v822_v5 }
  0x77   : > { %v1060_v37 = vpack.c.b16 %v1055_v27, %v1054_v18 }
  0x7c   : > { %1452 = vmatmul.msk.bf16.vlgmr.msra.gmra.mxu0 %vm345_vm3, %v1154_v55  ;;  %v1029_v55 = vrot.slane %v1027_v22, 4 }
  0x7e   : > { %1421 = vmatmul.msk.bf16.gmra.mxu1 %vm345_vm3, %v827_v29  ;;  %v1419_v29 = vrot.slane %v1753_v45, 9  ;;  %v1033_v38 = vor.u32 %v1032_v17, %v1029_v55  ;;  %v817_v45 = vsel %vm1642_vm7, %v815_v32, %v816_v49 }
  0x7f   : > { %v825_v10 = vunpack.c.l.b16 %v817_v45 }
  0x80   : > { %v814_v39 = vsel %vm1642_vm7, %v1419_v29, %v813_v15  ;;  %v1034_v50 = vrot.slane %v1033_v38, 4 }
  0x81   : > { %v824_v30 = vunpack.c.l.b16 %v814_v39 }
  0x82   : > { %1441 = vmatmul.msk.bf16.gmra.mxu2 %vm345_vm3, %v1463_v61  ;;  %v1044_v61 = vrot.slane %v1043_v40, 4  ;;  %v1039_v56 = vsel %vm1605_vm4, %v1034_v50, %v1038_v20 }
  0x83   : > { %v829_v53 = vpack.c.b16 %v825_v10, %v824_v30  ;;  %v1056_v31 = vunpack.c.l.b16 %v1039_v56 }
  0x84   : > { %v1049_v58 = vsel %vm1605_vm4, %v1044_v61, %v1048_v12 }
  0x85   : > { %v1057_v62 = vunpack.c.l.b16 %v1049_v58 }
  0x86   : > { %1445 = vmatmul.msk.bf16.gmra.mxu3 %vm345_vm3, %v1059_v57  ;;  %v1144_v57 = vrot.slane %v224_v34, 5 }
  0x87   : > { %v1061_v36 = vpack.c.b16 %v1057_v62, %v1056_v31 }
  0x88   : > { %v1145_v2 = vsel %vm1642_vm7, %v1143_v59, %v1144_v57 }
  0x89   : > { %v1153_v5 = vunpack.c.l.b16 %v1145_v2 }
  0x8b   : > { %v1157_v24 = vpack.c.b16 %v1153_v5, %v1152_v4 }
  0x8c   : > { %1453 = vmatmul.msk.bf16.gmra.mxu0 %vm345_vm3, %v1155_v46 }
  0x8e   : > { %1422 = vmatmul.msk.bf16.gmra.mxu1 %vm345_vm3, %v828_v19 }
  0x92   : > { %1442 = vmatmul.msk.bf16.gmra.mxu2 %vm345_vm3, %v1466_v25 }
  0x96   : > { %1446 = vmatmul.msk.bf16.gmra.mxu3 %vm345_vm3, %v1060_v37 }
  0x9b   : > { %v376_v54 = vpop.f32.mrf.mxu1 }
  0x9c   : > { %1454 = vmatmul.msk.bf16.gmra.mxu0 %vm345_vm3, %v1156_v51 }
  0x9e   : > { %1423 = vmatmul.msk.bf16.gmra.mxu1 %vm345_vm3, %v829_v53 }
  0xa2   : > { %1443 = vmatmul.msk.bf16.gmra.mxu2 %vm345_vm3, %v1469_v60 }
  0xa3   : > { %v1906_v3 = vpop.f32.mrf.mxu1 }
  0xa5   : > { %v381_v6 = vpop.f32.mrf.mxu2 }
  0xa6   : > { %1447 = vmatmul.msk.bf16.gmra.mxu3 %vm345_vm3, %v1061_v36 }
  0xa9   : > { %v371_v7 = vpop.f32.mrf.mxu0  ;;  %v1909_v8 = vpop.f32.mrf.mxu3 }
  0xab   : > { %v435_v26 = vpop.f32.mrf.mxu1 }
  0xac   : > { %1455 = vmatmul.msk.bf16.gmra.mxu0 %vm345_vm3, %v1157_v24  ;;  %v436_v35 = vadd.f32 %v435_v26, %v371_v7 }
  0xad   : > { %v1912_v41 = vpop.f32.mrf.mxu2 }
  0xb1   : > { %v373_v46 = vpop.f32.mrf.mxu0  ;;  %v1914_v19 = vpop.f32.mrf.mxu3 }
  0xb3   : > { %v437_v1 = vpop.f32.mrf.mxu1 }
  0xb4   : > { %v438_v56 = vadd.f32 %v437_v1, %v373_v46 }
  0xb5   : > { %v526_v9 = vpop.f32.mrf.mxu2 }
  0xb6   : > { %v546_v22 = vadd.f32 %v526_v9, %v436_v35 }
  0xb9   : > { %v758_v13 = vpop.f32.mrf.mxu0  ;;  %v598_v48 = vpop.f32.mrf.mxu3 }
  0xba   : > { %v618_v14 = vadd.f32 %v598_v48, %v546_v22 }
  0xbb   : > { %v440_v15 = vpop.f32.mrf.mxu1 }
  0xbc   : > { %v441_v16 = vadd.f32 %v440_v15, %v376_v54  ;;  %v778_v18 = vadd.f32 %v758_v13, %v618_v14 }
  0xbd   : > { %v528_v21 = vpop.f32.mrf.mxu2 }
  0xbe   : > { %v547_v59 = vadd.f32 %v528_v21, %v438_v56 }
  0xc1   : > { %v760_v23 = vpop.f32.mrf.mxu0  ;;  %v600_v43 = vpop.f32.mrf.mxu3 }
  0xc2   : > { %v619_v31 = vadd.f32 %v600_v43, %v547_v59 }
  0xc3   : > { %v442_v25 = vpop.f32.mrf.mxu1 }
  0xc4   : > { %v779_v4 = vadd.f32 %v760_v23, %v619_v31  ;;  %v443_v35 = vadd.f32 %v442_v25, %v1906_v3 }
  0xc5   : > { %v531_v27 = vpop.f32.mrf.mxu2 }
  0xc6   : > { %v548_v55 = vadd.f32 %v531_v27, %v441_v16 }
  0xc9   : > { %v763_v17 = vpop.f32.mrf.mxu0  ;;  %v603_v20 = vpop.f32.mrf.mxu3 }
  0xca   : > { %v620_v29 = vadd.f32 %v603_v20, %v548_v55 }
  0xcb   : > { %v445_v32 = vpop.f32.mrf.mxu1 }
  0xcc   : > { %v446_v49 = vadd.f32 %v445_v32, %v381_v6  ;;  %v780_v33 = vadd.f32 %v763_v17, %v620_v29 }
  0xcd   : > { %v533_v34 = vpop.f32.mrf.mxu2 }
  0xce   : > { %v549_v46 = vadd.f32 %v533_v34, %v443_v35 }
  0xd1   : > { %v765_v11 = vpop.f32.mrf.mxu0  ;;  %v605_v28 = vpop.f32.mrf.mxu3 }
  0xd2   : > { %v621_v16 = vadd.f32 %v605_v28, %v549_v46 }
  0xd3   : > { %v1916_v37 = vpop.f32.mrf.mxu1 }
  0xd4   : > { %v781_v29 = vadd.f32 %v765_v11, %v621_v16 }
  0xd5   : > { %v536_v38 = vpop.f32.mrf.mxu2 }
  0xd6   : > { %v550_v39 = vadd.f32 %v536_v38, %v446_v49 }
  0xd9   : > { %v768_v45 = vpop.f32.mrf.mxu0  ;;  %v608_v40 = vpop.f32.mrf.mxu3 }
  0xda   : > { %v622_v0 = vadd.f32 %v608_v40, %v550_v39 }
  0xdb   : > { %v1918_v42 = vpop.f32.mrf.mxu1 }
  0xdc   : > { %v1920_v44 = vadd.f32 %v768_v45, %v622_v0  ;;  %v448_v45 = vadd.f32 %v1916_v37, %v1912_v41  ;;  %v451_v41 = vadd.f32 %v1918_v42, %v1909_v8 }
  0xdd   : > { %v538_v30 = vpop.f32.mrf.mxu2 }
  0xde   : > { %v551_v0 = vadd.f32 %v538_v30, %v448_v45 }
  0xe1   : > { %v1922_v10 = vpop.f32.mrf.mxu0  ;;  %v1924_v50 = vpop.f32.mrf.mxu3 }
  0xe2   : > { %v623_v31 = vadd.f32 %v1924_v50, %v551_v0 }
  0xe3   : > { %v1926_v61 = vpop.f32.mrf.mxu1 }
  0xe4   : > { %v453_v8 = vadd.f32 %v1926_v61, %v1914_v19 }
  0xe5   : > { %v1928_v12 = vpop.f32.mrf.mxu2 }
  0xe9   : > { %v1930_v51 = vpop.f32.mrf.mxu0  ;;  %v1932_v52 = vpop.f32.mrf.mxu3 }
  0xeb   : > { %v854_v53 = vpop.f32.mrf.mxu1 }
  0xec   : > { %v874_v62 = vadd.f32 %v854_v53, %v778_v18 }
  0xed   : > { %v1934_v54 = vpop.f32.mrf.mxu2 }
  0xf1   : > { %v1936_v58 = vpop.f32.mrf.mxu0  ;;  %v1938_v47 = vpop.f32.mrf.mxu3 }
  0xf3   : > { %v856_v57 = vpop.f32.mrf.mxu1 }
  0xf4   : > { %v875_v6 = vadd.f32 %v856_v57, %v779_v4 }
  0xf5   : > { %v926_v60 = vpop.f32.mrf.mxu2 }
  0xf6   : > { %v946_v2 = vadd.f32 %v926_v60, %v874_v62 }
  0xf9   : > { %v1182_v63 = vpop.f32.mrf.mxu0  ;;  %v1086_v36 = vpop.f32.mrf.mxu3 }
  0xfa   : > { %v1106_v24 = vadd.f32 %v1086_v36, %v946_v2 }
  0xfb   : > { %v859_v5 = vpop.f32.mrf.mxu1 }
  0xfc   : > { %v1202_v1 = vadd.f32 %v1182_v63, %v1106_v24  ;;  %v876_v15 = vadd.f32 %v859_v5, %v780_v33 }
  0xfd   : > { %v928_v7 = vpop.f32.mrf.mxu2 }
  0xfe   : > { %v947_v26 = vadd.f32 %v928_v7, %v875_v6  ;;  %v1239_v18 = vmul.f32 %v1202_v1, %v1202_v1  ;;  %v552_v6 = vadd.f32 %v1928_v12, %v451_v41 }
 0x100   : > { %v624_v35 = vadd.f32 %v1932_v52, %v552_v6 }
 0x101   : > { %v1184_v9 = vpop.f32.mrf.mxu0  ;;  %v1088_v22 = vpop.f32.mrf.mxu3 }
 0x102   : > { %v1107_v13 = vadd.f32 %v1088_v22, %v947_v26 }
 0x103   : > { %v861_v48 = vpop.f32.mrf.mxu1 }
 0x104   : > { %v1203_v14 = vadd.f32 %v1184_v9, %v1107_v13  ;;  %v877_v33 = vadd.f32 %v861_v48, %v781_v29  ;;  %v553_v13 = vadd.f32 %v1934_v54, %v453_v8 }
 0x105   : > { %v931_v21 = vpop.f32.mrf.mxu2 }
 0x106   : > { %v1473_v23 = vpack.c.bf16 %v1203_v14, %v1202_v1  ;;  %v1226_v3 = vadd.f32 %v1203_v14, %v1202_v1  ;;  %v1240_v43 = vmul.f32 %v1203_v14, %v1203_v14  ;;  %v948_v25 = vadd.f32 %v931_v21, %v876_v15 }
 0x107   : > { %v625_v52 = vadd.f32 %v1938_v47, %v553_v13 }
 0x108   : > { %1474 = vst [vmem:[%s1945_s16] sm:$0xff] %v1473_v23   ;;  %v1247_v27 = vadd.f32 %v1240_v43, %v1239_v18 }
 0x109   : > { %v1187_v55 = vpop.f32.mrf.mxu0  ;;  %v1091_v17 = vpop.f32.mrf.mxu3 }
 0x10a   : > { %v1108_v20 = vadd.f32 %v1091_v17, %v948_v25 }
 0x10b   : > { %v864_v32 = vpop.f32.mrf.mxu1 }
 0x10c   : > { %v1204_v49 = vadd.f32 %v1187_v55, %v1108_v20  ;;  %v878_v60 = vadd.f32 %v864_v32, %v1920_v44  ;;  %v783_v44 = vadd.f32 %v1922_v10, %v623_v31  ;;  %v784_v10 = vadd.f32 %v1930_v51, %v624_v35 }
 0x10d   : > { %v933_v34 = vpop.f32.mrf.mxu2  ;;  %v785_v55 = vadd.f32 %v1936_v58, %v625_v52 }
 0x10e   : > { %v1227_v28 = vadd.f32 %v1226_v3, %v1204_v49  ;;  %v1241_v38 = vmul.f32 %v1204_v49, %v1204_v49  ;;  %v949_v39 = vadd.f32 %v933_v34, %v877_v33 }
 0x110   : > { %v1248_v40 = vadd.f32 %v1247_v27, %v1241_v38 }
 0x111   : > { %v1189_v53 = vpop.f32.mrf.mxu0  ;;  %v1093_v56 = vpop.f32.mrf.mxu3 }
 0x112   : > { %v1109_v59 = vadd.f32 %v1093_v56, %v949_v39 }
 0x113   : > { %v866_v11 = vpop.f32.mrf.mxu1 }
 0x114   : > { %v1205_v57 = vadd.f32 %v1189_v53, %v1109_v59  ;;  %v879_v26 = vadd.f32 %v866_v11, %v783_v44 }
 0x115   : > { %v936_v62 = vpop.f32.mrf.mxu2 }
 0x116   : > { %v1478_v63 = vpack.c.bf16 %v1205_v57, %v1204_v49  ;;  %v1228_v2 = vadd.f32 %v1227_v28, %v1205_v57  ;;  %v1242_v36 = vmul.f32 %v1205_v57, %v1205_v57  ;;  %v950_v4 = vadd.f32 %v936_v62, %v878_v60 }
 0x118   : > { %1490 = vst [vmem:[%s1945_s16 + $0x8] sm:$0xff] %v1478_v63   ;;  %v1249_v37 = vadd.f32 %v1248_v40, %v1242_v36 }
 0x119   : > { %v1192_v30 = vpop.f32.mrf.mxu0  ;;  %v1096_v5 = vpop.f32.mrf.mxu3 }
 0x11a   : > { %v1110_v24 = vadd.f32 %v1096_v5, %v950_v4 }
 0x11b   : > { %v869_v22 = vpop.f32.mrf.mxu1 }
 0x11c   : > { %v1206_v7 = vadd.f32 %v1192_v30, %v1110_v24  ;;  %v880_v16 = vadd.f32 %v869_v22, %v784_v10 }
 0x11d   : > { %v938_v50 = vpop.f32.mrf.mxu2 }
 0x11e   : > { %v1229_v46 = vadd.f32 %v1228_v2, %v1206_v7  ;;  %v1243_v1 = vmul.f32 %v1206_v7, %v1206_v7  ;;  %v951_v9 = vadd.f32 %v938_v50, %v879_v26 }
 0x120   : > { %v1250_v42 = vadd.f32 %v1249_v37, %v1243_v1 }
 0x121   : > { %v1194_v12 = vpop.f32.mrf.mxu0  ;;  %v1098_v48 = vpop.f32.mrf.mxu3 }
 0x122   : > { %v1111_v14 = vadd.f32 %v1098_v48, %v951_v9 }
 0x123   : > { %v871_v19 = vpop.f32.mrf.mxu1 }
 0x124   : > { %v1207_v15 = vadd.f32 %v1194_v12, %v1111_v14  ;;  %v881_v51 = vadd.f32 %v871_v19, %v785_v55 }
 0x125   : > { %v941_v18 = vpop.f32.mrf.mxu2 }
 0x126   : > { %v1483_v21 = vpack.c.bf16 %v1207_v15, %v1206_v7  ;;  %v1230_v23 = vadd.f32 %v1229_v46, %v1207_v15  ;;  %v1244_v3 = vmul.f32 %v1207_v15, %v1207_v15  ;;  %v952_v43 = vadd.f32 %v941_v18, %v880_v16 }
 0x128   : > { %1491 = vst [vmem:[%s1945_s16 + $0x10] sm:$0xff] %v1483_v21   ;;  %v1251_v25 = vadd.f32 %v1250_v42, %v1244_v3 }
 0x129   : > { %v1197_v61 = vpop.f32.mrf.mxu0  ;;  %v1101_v27 = vpop.f32.mrf.mxu3 }
 0x12a   : > { %v1112_v54 = vadd.f32 %v1101_v27, %v952_v43 }
 0x12c   : > { %v1208_v17 = vadd.f32 %v1197_v61, %v1112_v54 }
 0x12d   : > { %v943_v20 = vpop.f32.mrf.mxu2 }
 0x12e   : > { %v1231_v29 = vadd.f32 %v1230_v23, %v1208_v17  ;;  %v1245_v47 = vmul.f32 %v1208_v17, %v1208_v17  ;;  %v953_v32 = vadd.f32 %v943_v20, %v881_v51 }
 0x130   : > { %v1252_v49 = vadd.f32 %v1251_v25, %v1245_v47 }
 0x131   : > { %v1103_v33 = vpop.f32.mrf.mxu3  ;;  %v1199_v28 = vpop.f32.mrf.mxu0 }
 0x132   : > { %v1113_v34 = vadd.f32 %v1103_v33, %v953_v32 }
 0x134   : > { %v1209_v38 = vadd.f32 %v1199_v28, %v1113_v34 }
 0x136   : > { %v1488_v39 = vpack.c.bf16 %v1209_v38, %v1208_v17  ;;  %v1232_v45 = vadd.f32 %v1231_v29, %v1209_v38  ;;  %v1246_v40 = vmul.f32 %v1209_v38, %v1209_v38 }
 0x138   : > { %1492 = vst [vmem:[%s1945_s16 + $0x18] sm:$0xff] %v1488_v39   ;;  %v1233_v0 = vrot.slane %v1232_v45, 4  ;;  %v1253_v53 = vadd.f32 %v1252_v49, %v1246_v40 }
 0x13a   : > { %v1234_v58 = vadd.f32 %v1233_v0, %v1232_v45  ;;  %v1254_v56 = vrot.slane %v1253_v53, 4 }
 0x13c   : > { %v1235_v59 = vrot.slane %v1234_v58, 2  ;;  %v1255_v57 = vadd.f32 %v1254_v56, %v1253_v53 }
 0x13e   : > { %v1236_v60 = vadd.f32 %v1235_v59, %v1234_v58  ;;  %v1256_v11 = vrot.slane %v1255_v57, 2 }
 0x140   : > { %v1237_v31 = vrot.slane %v1236_v60, 1  ;;  %v1257_v62 = vadd.f32 %v1256_v11, %v1255_v57 }
 0x142   : > { %v1258_v63 = vrot.slane %v1257_v62, 1  ;;  %v1238_v2 = vadd.f32 %v1237_v31, %v1236_v60 }
 0x144   : > { %v1259_v36 = vadd.f32 %v1258_v63, %v1257_v62 }
 0x146   : > { %v1261_v4 = vsel %vm1260_vm8, %v1238_v2, %v1259_v36 }
 0x147   : > { %1262 = vst [vmem:[%s187_s20] sm:$0x3] %v1261_v4 }
 0x148 PF: > { %s14_s12 = sadd.s32 1, %s1511_s12  }
 0x149   : > { %p11_p6 = scmp.ge.s32.totalorder %s14_s12, 10  }
 0x14b   :  { %13 = sbr.rel (!%p11_p6) target bundleno = 1 (0x1), region = 70 }

// kernel: downsample_layer_forward.8
= control target key start
LH: loop header
LB: loop body
LE: loop exit
PB: predicated region body
PF: predicated region fallthrough
CT: control target
= control target key end

     0   :  { %s1533_s12 = smov 0   ;;  %s1974_s0 = inlined_call_operand.vmem [shape: bf16[32,3,18,8], index: 0, kind: input, shape index: {}]   ;;  %s1975_s1 = inlined_call_operand.vmem [shape: bf16[9,8,128], index: 1, kind: input, shape index: {}]   ;;  %s1976_s2 = inlined_call_operand.vmem [shape: bf16[512,128], index: 2, kind: output, shape index: {0}]   ;;  %s1977_s3 = inlined_call_operand.vmem [shape: f32[8,2,128], index: 3, kind: output, shape index: {1}]  }
   0x1 LB: > { %s1539_s13 = sadd.s32 4294967295, %s1511_s12   ;;  %p1354_p0 = scmp.ge.s32.totalorder %s1511_s12, 1  ;;  %s1511_s12 = sphi %s1533_s12, %s14_s12  }
   0x2   : > { %p142_p1 = scmp.lt.s32.totalorder %s1511_s12, 9 }
   0x4   : > { %p143_p2 = pnand %p1354_p0, %p142_p1 }
   0x5   : > { %s1355_s16 = sshll.u32 (!%p143_p2), %s1539_s13, 2  ;;  %s1357_s10 = sshll.u32 (!%p143_p2), %s1539_s13, 3 }
   0x6   : > { %146 = sbr.rel (%p143_p2) target bundleno = 328 (0x148), region = 28  ;;  %p172_p3 = scmp.lt.s32.totalorder (!%p143_p2), %s1355_s16, 31 }
   0x7   : > { %p179_p4 = scmp.lt.s32.totalorder (!%p143_p2), %s1357_s10, 63  ;;  %p184_p5 = scmp.lt.s32.totalorder (!%p143_p2), %s1539_s13, 7 }
   0xb   : > { %v226_v0 = vld [vmem:[%s1975_s1 + $0x4] sm:$0xf]  ;;  %vm358_vm0 = vcmask 1043456   ;;  %v227_v2 = vld [vmem:[%s1975_s1 + $0x8] sm:$0xf]  ;;  %s1983_s16 = smov (!%p172_p3, %s1355_s16), 31 }
   0xc   : > { %v360_v1 = vsel %vm358_vm0, %v226_v0, 0  ;;  %v515_v3 = vsel %vm358_vm0, %v227_v2, 0  ;;  %v228_v4 = vld [vmem:[%s1975_s1 + $0xc] sm:$0xf]  ;;  %v225_v5 = vld [vmem:[%s1975_s1] sm:$0xf] }
   0xd   : > { %1493 = vmatpush.bf16.msra.mxu1 %v360_v1  ;;  %1494 = vmatpush.bf16.msra.mxu2 %v360_v1  ;;  %v229_v6 = vld [vmem:[%s1975_s1 + $0x10] sm:$0xf]  ;;  %s1496_s25 = smul.u32 36, %s1983_s16  ;;  %v587_v7 = vsel %vm358_vm0, %v228_v4, 0  ;;  %v424_v8 = vsel %vm358_vm0, %v225_v5, 0  ;;  %vm345_vm3 = vcmask 64512  }
   0xe   : > { %1495 = vmatpush.bf16.msra.mxu3 %v360_v1  ;;  %369 = vmatpush.bf16.msra.mxu0 %v360_v1  ;;  %v747_v9 = vsel %vm358_vm0, %v229_v6, 0  ;;  %vm234_vm1 = vsmask.f32 3328  ;;  %vm235_vm2 = vsmask.f32 7440  ;;  %vm459_vm5 = vcmask 1042432  }
   0xf   : > { %s1567_s28 = scalar_lea.vmem %s1974_s0, %s1496_s25  ;;  %vm1605_vm4 = vmor %vm234_vm1, %vm235_vm2  ;;  %vm460_vm6 = vcmask 1046532   ;;  %s1985_s10 = smov (!%p179_p4, %s1357_s10), 63  ;;  %vm1260_vm8 = vcmask 1040384  }
  0x10   : > { %v1570_v10 = vld [vmem:[%s1567_s28 + $0x24] sm:$0xf]  ;;  %v1573_v11 = vld [vmem:[%s1567_s28 + $0x28] sm:$0xf]  ;;  %v1576_v12 = vld [vmem:[%s1567_s28 + $0x2c] sm:$0x1] }
  0x11   : > { %524 = vmatpush.bf16.msrb.mxu2 %v515_v3  ;;  %433 = vmatpush.bf16.msrb.mxu1 %v424_v8  ;;  %v262_v13 = vshrl.u32 %v1570_v10, 16  ;;  %v265_v14 = vshll.u32 %v1570_v10, 16  ;;  %v271_v15 = vshll.u32 %v1573_v11, 16  ;;  %v275_v16 = vshrl.u32 %v1573_v11, 16  ;;  %v1583_v17 = vld [vmem:[%s1567_s28 + $0x48] sm:$0xf]  ;;  %vm1642_vm7 = vmor %vm459_vm5, %vm460_vm6 }
  0x12   : > { %596 = vmatpush.bf16.msrb.mxu3 %v587_v7  ;;  %756 = vmatpush.bf16.msrb.mxu0 %v747_v9  ;;  %v281_v18 = vshll.u32 %v1576_v12, 16  ;;  %v1587_v19 = vld [vmem:[%s1567_s28 + $0x4c] sm:$0xf]  ;;  %v1590_v20 = vld [vmem:[%s1567_s28 + $0x50] sm:$0x1]  ;;  %v286_v21 = vshrl.u32 %v1583_v17, 16 }
  0x13   : > { %v264_v22 = vrot.slane %v262_v13, 4  ;;  %v267_v23 = vrot.slane %v265_v14, 5  ;;  %v273_v24 = vrot.slane %v271_v15, 5  ;;  %v277_v25 = vrot.slane %v275_v16, 4  ;;  %v1594_v26 = vld [vmem:[%s1567_s28 + $0x6c] sm:$0xf] }
  0x14   : > { %v283_v27 = vrot.slane %v281_v18, 5  ;;  %v288_v28 = vrot.slane %v286_v21, 4  ;;  %v289_v29 = vshll.u32 %v1583_v17, 16  ;;  %v295_v30 = vshll.u32 %v1587_v19, 16  ;;  %v1601_v35 = vld [vmem:[%s1567_s28 + $0x70] sm:$0xf] }
  0x15   : > { %v268_v31 = vor.u32 %v267_v23, %v264_v22  ;;  %v278_v32 = vor.u32 %v277_v25, %v273_v24  ;;  %v299_v33 = vshrl.u32 %v1587_v19, 16  ;;  %v305_v34 = vshll.u32 %v1590_v20, 16  ;;  %v1612_v46 = vld [vmem:[%s1567_s28 + $0x74] sm:$0x1]  ;;  %v189_v54 = vld [vmem:[%s1567_s28] sm:$0xf] }
  0x16   : > { %v291_v37 = vrot.slane %v289_v29, 5  ;;  %v297_v38 = vrot.slane %v295_v30, 5  ;;  %v310_v39 = vshrl.u32 %v1594_v26, 16  ;;  %v313_v40 = vshll.u32 %v1594_v26, 16  ;;  %v190_v2 = vld [vmem:[%s1567_s28 + $0x4] sm:$0xf] }
  0x17   : > { %v269_v41 = vrot.slane %v268_v31, 4  ;;  %v279_v42 = vrot.slane %v278_v32, 4  ;;  %v301_v43 = vrot.slane %v299_v33, 4  ;;  %v307_v44 = vrot.slane %v305_v34, 5  ;;  %v191_v8 = vld [vmem:[%s1567_s28 + $0x8] sm:$0x1] }
  0x18   : > { %v292_v45 = vor.u32 %v291_v37, %v288_v28  ;;  %v312_v47 = vrot.slane %v310_v39, 4  ;;  %v315_v48 = vrot.slane %v313_v40, 5  ;;  %v319_v49 = vshll.u32 %v1601_v35, 16  ;;  %v231_v23 = vld [vmem:[%s1975_s1 + $0x18] sm:$0xf]  ;;  %s1358_s11 = sshll.u32 %s1985_s10, 2 }
  0x19   : > { %v274_v50 = vsel %vm1605_vm4, %v269_v41, %v273_v24  ;;  %v284_v51 = vsel %vm1605_vm4, %v279_v42, %v283_v27  ;;  %v302_v52 = vor.u32 %v301_v43, %v297_v38  ;;  %v323_v53 = vshrl.u32 %v1601_v35, 16  ;;  %v1635_v29 = vld [vmem:[%s1567_s28 + $0xc] sm:$0xf]  ;;  %v1648_v43 = vld [vmem:[%s1567_s28 + $0x10] sm:$0xf]  ;;  %s1945_s16 = scalar_lea.vmem %s1976_s2, %s1358_s11  ;;  %s1987_s13 = smov (!%p184_p5, %s1539_s13), 7 }
  0x1a   : > { %v335_v55 = vunpack.c.l.b16 %v274_v50  ;;  %v336_v56 = vunpack.c.l.b16 %v284_v51  ;;  %v293_v57 = vrot.slane %v292_v45, 4  ;;  %v316_v58 = vor.u32 %v315_v48, %v312_v47  ;;  %s1359_s17 = sshll.u32 %s1987_s13, 1 }
  0x1b   : > { %v303_v59 = vrot.slane %v302_v52, 4  ;;  %v321_v60 = vrot.slane %v319_v49, 5  ;;  %v325_v61 = vrot.slane %v323_v53, 4  ;;  %v329_v62 = vshll.u32 %v1612_v46, 16  ;;  %s187_s20 = scalar_lea.vmem %s1977_s3, %s1359_s17 }
  0x1c   : > { %v342_v63 = vpack.c.b16 %v336_v56, %v335_v55  ;;  %v298_v0 = vsel %vm1605_vm4, %v293_v57, %v297_v38  ;;  %v317_v1 = vrot.slane %v316_v58, 4  ;;  %v238_v3 = vshrl.u32 %v189_v54, 16  ;;  %v1658_v55 = vld [vmem:[%s1567_s28 + $0x14] sm:$0x1]  ;;  %v232_v58 = vld [vmem:[%s1975_s1 + $0x1c] sm:$0xf] }
  0x1d   : > { %v308_v4 = vsel %vm1605_vm4, %v303_v59, %v307_v44  ;;  %v337_v5 = vunpack.c.l.b16 %v298_v0  ;;  %v326_v6 = vor.u32 %v325_v61, %v321_v60  ;;  %v331_v7 = vrot.slane %v329_v62, 5  ;;  %v230_v62 = vld [vmem:[%s1975_s1 + $0x14] sm:$0xf] }
  0x1e   : > { %1361 = vmatmul.msk.bf16.vlgmr.msra.gmra.mxu1 %vm345_vm3, %v342_v63  ;;  %v338_v9 = vunpack.c.l.b16 %v308_v4  ;;  %v322_v13 = vsel %vm1605_vm4, %v317_v1, %v321_v60  ;;  %v240_v14 = vrot.slane %v238_v3, 4  ;;  %v241_v15 = vshll.u32 %v189_v54, 16  ;;  %v233_v3 = vld [vmem:[%s1975_s1 + $0x20] sm:$0xf] }
  0x1f   : > { %v327_v16 = vrot.slane %v326_v6, 4  ;;  %v339_v18 = vunpack.c.l.b16 %v322_v13  ;;  %v247_v21 = vshll.u32 %v190_v2, 16  ;;  %v251_v22 = vshrl.u32 %v190_v2, 16 }
  0x20   : > { %v343_v24 = vpack.c.b16 %v338_v9, %v337_v5  ;;  %v243_v25 = vrot.slane %v241_v15, 5  ;;  %v257_v27 = vshll.u32 %v191_v8, 16  ;;  %v467_v28 = vrot.slane %v191_v8, 5  ;;  %v1458_v8 = vld [vmem:[%s1567_s28] sm:$0xff] }
  0x21   : > { %v332_v30 = vsel %vm1605_vm4, %v327_v16, %v331_v7  ;;  %v249_v31 = vrot.slane %v247_v21, 5  ;;  %v253_v32 = vrot.slane %v251_v22, 4  ;;  %v1384_v33 = vrot.slane %v189_v54, 9  ;;  %v1682_v22 = vld [vmem:[%s1567_s28 + $0x30] sm:$0xf] }
  0x22   : > { %1362 = vmatmul.msk.bf16.vlgmr.msra.gmra.mxu2 %vm345_vm3, %v343_v24  ;;  %v340_v34 = vunpack.c.l.b16 %v332_v30  ;;  %v244_v37 = vor.u32 %v243_v25, %v240_v14  ;;  %v259_v38 = vrot.slane %v257_v27, 5  ;;  %v464_v39 = vrot.slane %v190_v2, 5  ;;  %v1686_v24 = vld [vmem:[%s1567_s28 + $0x34] sm:$0xf] }
  0x23   : > { %v254_v40 = vor.u32 %v253_v32, %v249_v31  ;;  %v915_v42 = vsel %vm358_vm0, %v231_v23, 0  ;;  %v627_v44 = vshrl.u32 %v1635_v29, 16  ;;  %v630_v45 = vshll.u32 %v1635_v29, 16 }
  0x24   : > { %v344_v47 = vpack.c.b16 %v340_v34, %v339_v18  ;;  %v245_v48 = vrot.slane %v244_v37, 4  ;;  %v466_v49 = vrot.slane %v464_v39, 4  ;;  %924 = vmatpush.bf16.msra.mxu2 %v915_v42  ;;  %v465_v54 = vsel %vm1642_vm7, %v1384_v33, %v464_v39  ;;  %v1459_v34 = vld [vmem:[%s1567_s28 + $0xc] sm:$0xff] }
  0x25   : > { %v255_v50 = vrot.slane %v254_v40, 4  ;;  %v629_v51 = vrot.slane %v627_v44, 4  ;;  %v632_v52 = vrot.slane %v630_v45, 5  ;;  %v636_v56 = vshll.u32 %v1648_v43, 16 }
  0x26   : > { %1363 = vmatmul.msk.bf16.vlgmr.msra.gmra.mxu3 %vm345_vm3, %v344_v47  ;;  %v250_v53 = vsel %vm1605_vm4, %v245_v48, %v249_v31  ;;  %v640_v57 = vshrl.u32 %v1648_v43, 16  ;;  %v468_v61 = vsel %vm1642_vm7, %v466_v49, %v467_v28  ;;  %v490_v4 = vunpack.c.l.b16 %v465_v54  ;;  %v1703_v48 = vld [vmem:[%s1567_s28 + $0x38] sm:$0x1] }
  0x27   : > { %v260_v59 = vsel %vm1605_vm4, %v255_v50, %v259_v38  ;;  %v333_v60 = vunpack.c.l.b16 %v250_v53  ;;  %v633_v0 = vor.u32 %v632_v52, %v629_v51  ;;  %v638_v1 = vrot.slane %v636_v56, 5  ;;  %v1461_v53 = vld [vmem:[%s1567_s28 + $0x24] sm:$0xff] }
  0x28   : > { %v334_v63 = vunpack.c.l.b16 %v260_v59  ;;  %v642_v2 = vrot.slane %v640_v57, 4  ;;  %v646_v5 = vshll.u32 %v1658_v55, 16  ;;  %v1075_v6 = vsel %vm358_vm0, %v232_v58, 0  ;;  %v1713_v57 = vld [vmem:[%s1567_s28 + $0x54] sm:$0xf] }
  0x29   : > { %v491_v9 = vunpack.c.l.b16 %v468_v61  ;;  %1084 = vmatpush.bf16.msra.mxu3 %v1075_v6  ;;  %v843_v14 = vsel %vm358_vm0, %v230_v62, 0  ;;  %v1171_v15 = vsel %vm358_vm0, %v233_v3, 0  ;;  %v634_v16 = vrot.slane %v633_v0, 4  ;;  %v1716_v61 = vld [vmem:[%s1567_s28 + $0x58] sm:$0xf] }
  0x2a   : > { %v341_v7 = vpack.c.b16 %v334_v63, %v333_v60  ;;  %v643_v13 = vor.u32 %v642_v2, %v638_v1  ;;  %852 = vmatpush.bf16.msra.mxu1 %v843_v14  ;;  %v648_v21 = vrot.slane %v646_v5, 5  ;;  %v471_v25 = vrot.slane %v1573_v11, 5 }
  0x2b   : > { %v498_v23 = vpack.c.b16 %v491_v9, %v490_v4  ;;  %v639_v27 = vsel %vm1605_vm4, %v634_v16, %v638_v1  ;;  %v651_v28 = vshrl.u32 %v1682_v22, 16  ;;  %v654_v31 = vshll.u32 %v1682_v22, 16 }
  0x2c   : > { %1360 = vmatmul.msk.bf16.vlgmr.msra.gmra.mxu0 %vm345_vm3, %v341_v7  ;;  %v644_v18 = vrot.slane %v643_v13, 4  ;;  %v660_v32 = vshll.u32 %v1686_v24, 16  ;;  %v664_v33 = vshrl.u32 %v1686_v24, 16  ;;  %v1385_v11 = vrot.slane %v1570_v10, 9 }
  0x2d   : > { %1180 = vmatpush.bf16.msra.mxu0 %v1171_v15  ;;  %v473_v37 = vrot.slane %v471_v25, 4  ;;  %v474_v38 = vrot.slane %v1576_v12, 5  ;;  %v722_v39 = vunpack.c.l.b16 %v639_v27  ;;  %v653_v42 = vrot.slane %v651_v28, 4 }
  0x2e   : > { %1380 = vmatmul.msk.bf16.vlgmr.msrb.gmra.mxu1 %vm345_vm3, %v1458_v8  ;;  %v649_v30 = vsel %vm1605_vm4, %v644_v18, %v648_v21  ;;  %v656_v44 = vrot.slane %v654_v31, 5  ;;  %v662_v45 = vrot.slane %v660_v32, 5  ;;  %v666_v47 = vrot.slane %v664_v33, 4  ;;  %v1743_v31 = vld [vmem:[%s1567_s28 + $0x5c] sm:$0x1] }
  0x2f   : > { %v723_v40 = vunpack.c.l.b16 %v649_v30  ;;  %v472_v49 = vsel %vm1642_vm7, %v1385_v11, %v471_v25  ;;  %v475_v10 = vsel %vm1642_vm7, %v473_v37, %v474_v38  ;;  %v670_v52 = vshll.u32 %v1703_v48, 16  ;;  %v1464_v37 = vld [vmem:[%s1567_s28 + $0x48] sm:$0xff] }
  0x30   : > { %v657_v12 = vor.u32 %v656_v44, %v653_v42  ;;  %v667_v51 = vor.u32 %v666_v47, %v662_v45  ;;  %v492_v54 = vunpack.c.l.b16 %v472_v49  ;;  %v493_v56 = vunpack.c.l.b16 %v475_v10  ;;  %v1757_v49 = vld [vmem:[%s1567_s28 + $0x7c] sm:$0xf] }
  0x31   : > { %v730_v50 = vpack.c.b16 %v723_v40, %v722_v39  ;;  %v672_v60 = vrot.slane %v670_v52, 5  ;;  %v1387_v63 = vrot.slane %v1594_v26, 9  ;;  %v485_v0 = vrot.slane %v1601_v35, 5 }
  0x32   : > { %1388 = vmatmul.msk.bf16.vlgmr.msrb.gmra.mxu2 %vm345_vm3, %v498_v23  ;;  %v658_v58 = vrot.slane %v657_v12, 4  ;;  %v668_v59 = vrot.slane %v667_v51, 4  ;;  %v499_v62 = vpack.c.b16 %v493_v56, %v492_v54  ;;  %v488_v1 = vrot.slane %v1612_v46, 5  ;;  %v1465_v54 = vld [vmem:[%s1567_s28 + $0x54] sm:$0xff] }
  0x33   : > { %v478_v2 = vrot.slane %v1587_v19, 5  ;;  %v675_v3 = vshrl.u32 %v1713_v57, 16  ;;  %v678_v4 = vshll.u32 %v1713_v57, 16  ;;  %v684_v5 = vshll.u32 %v1716_v61, 16  ;;  %v1462_v19 = vld [vmem:[%s1567_s28 + $0x30] sm:$0xff] }
  0x34   : > { %v486_v6 = vsel %vm1642_vm7, %v1387_v63, %v485_v0  ;;  %v487_v7 = vrot.slane %v485_v0, 4  ;;  %v663_v8 = vsel %vm1605_vm4, %v658_v58, %v662_v45  ;;  %v673_v26 = vsel %vm1605_vm4, %v668_v59, %v672_v60  ;;  %v1753_v45 = vld [vmem:[%s1567_s28 + $0x78] sm:$0xf]  ;;  %v1771_v0 = vld [vmem:[%s1567_s28 + $0x80] sm:$0x1] }
  0x35   : > { %v688_v35 = vshrl.u32 %v1716_v61, 16  ;;  %v496_v46 = vunpack.c.l.b16 %v486_v6  ;;  %v1386_v13 = vrot.slane %v1583_v17, 9  ;;  %v480_v14 = vrot.slane %v478_v2, 4 }
  0x36   : > { %1408 = vmatmul.msk.bf16.vlgmr.msrb.gmra.mxu3 %vm345_vm3, %v1459_v34  ;;  %v489_v9 = vsel %vm1642_vm7, %v487_v7, %v488_v1  ;;  %v481_v15 = vrot.slane %v1590_v20, 5  ;;  %v724_v18 = vunpack.c.l.b16 %v663_v8  ;;  %v725_v21 = vunpack.c.l.b16 %v673_v26  ;;  %v1774_v1 = vld [vmem:[%s1567_s28 + $0x18] sm:$0xf]  ;;  %v1467_v26 = vld [vmem:[%s1567_s28 + $0x6c] sm:$0xff] }
  0x37   : > { %v497_v16 = vunpack.c.l.b16 %v489_v9  ;;  %v677_v23 = vrot.slane %v675_v3, 4  ;;  %v680_v25 = vrot.slane %v678_v4, 5  ;;  %v686_v27 = vrot.slane %v684_v5, 5 }
  0x38   : > { %v690_v28 = vrot.slane %v688_v35, 4  ;;  %v479_v17 = vsel %vm1642_vm7, %v1386_v13, %v478_v2  ;;  %v482_v20 = vsel %vm1642_vm7, %v480_v14, %v481_v15  ;;  %v731_v32 = vpack.c.b16 %v725_v21, %v724_v18  ;;  %v1777_v2 = vld [vmem:[%s1567_s28 + $0x1c] sm:$0xf] }
  0x39   : > { %v1739_v30 = vpack.c.b16 %v497_v16, %v496_v46  ;;  %v681_v33 = vor.u32 %v680_v25, %v677_v23  ;;  %v694_v11 = vshll.u32 %v1743_v31, 16  ;;  %v494_v38 = vunpack.c.l.b16 %v479_v17 }
  0x3a   : > { %v691_v34 = vor.u32 %v690_v28, %v686_v27  ;;  %v495_v39 = vunpack.c.l.b16 %v482_v20  ;;  %v699_v10 = vshrl.u32 %v1753_v45, 16  ;;  %v708_v52 = vshll.u32 %v1757_v49, 16  ;;  %v1468_v20 = vld [vmem:[%s1567_s28 + $0x78] sm:$0xff] }
  0x3b   : > { %v682_v40 = vrot.slane %v681_v33, 4  ;;  %v696_v44 = vrot.slane %v694_v11, 5  ;;  %v718_v6 = vshll.u32 %v1771_v0, 16  ;;  %v955_v7 = vshrl.u32 %v1774_v1, 16 }
  0x3c   : > { %1412 = vmatmul.msk.bf16.vlgmr.msrb.gmra.mxu0 %vm345_vm3, %v730_v50  ;;  %v692_v42 = vrot.slane %v691_v34, 4  ;;  %v500_v47 = vpack.c.b16 %v495_v39, %v494_v38  ;;  %v702_v50 = vshll.u32 %v1753_v45, 16  ;;  %v701_v59 = vrot.slane %v699_v10, 4 }
  0x3d   : > { %v687_v12 = vsel %vm1605_vm4, %v682_v40, %v686_v27  ;;  %v958_v8 = vshll.u32 %v1774_v1, 16  ;;  %v792_v35 = vrot.slane %v1648_v43, 5  ;;  %v964_v46 = vshll.u32 %v1777_v2, 16  ;;  %v197_v27 = vld [vmem:[%s1567_s28 + $0x20] sm:$0x1] }
  0x3e   : > { %1381 = vmatmul.msk.bf16.gmra.mxu1 %vm345_vm3, %v1461_v53  ;;  %v697_v51 = vsel %vm1605_vm4, %v692_v42, %v696_v44  ;;  %v712_v53 = vshrl.u32 %v1757_v49, 16  ;;  %v726_v56 = vunpack.c.l.b16 %v687_v12  ;;  %v704_v60 = vrot.slane %v702_v50, 5 }
  0x3f   : > { %v727_v58 = vunpack.c.l.b16 %v697_v51  ;;  %v795_v9 = vrot.slane %v1658_v55, 5  ;;  %v720_v15 = vrot.slane %v718_v6, 5  ;;  %v957_v16 = vrot.slane %v955_v7, 4 }
  0x40   : > { %v714_v63 = vrot.slane %v712_v53, 4  ;;  %v705_v4 = vor.u32 %v704_v60, %v701_v59  ;;  %v960_v18 = vrot.slane %v958_v8, 5  ;;  %v1416_v21 = vrot.slane %v1635_v29, 9 }
  0x41   : > { %v732_v3 = vpack.c.b16 %v727_v58, %v726_v56  ;;  %v794_v23 = vrot.slane %v792_v35, 4  ;;  %v966_v43 = vrot.slane %v964_v46, 5  ;;  %v974_v34 = vshll.u32 %v197_v27, 16  ;;  %v206_v46 = vld [vmem:[%s1567_s28 + $0x44] sm:$0x1] }
  0x42   : > { %1389 = vmatmul.msk.bf16.gmra.mxu2 %vm345_vm3, %v499_v62  ;;  %v710_v62 = vrot.slane %v708_v52, 5  ;;  %v706_v13 = vrot.slane %v705_v4, 4  ;;  %v961_v17 = vor.u32 %v960_v18, %v957_v16  ;;  %v793_v29 = vsel %vm1642_vm7, %v1416_v21, %v792_v35 }
  0x43   : > { %v818_v38 = vunpack.c.l.b16 %v793_v29  ;;  %v976_v44 = vrot.slane %v974_v34, 5  ;;  %v1120_v50 = vrot.slane %v1777_v2, 5  ;;  %v799_v56 = vrot.slane %v1686_v24, 5  ;;  %v1460_v24 = vld [vmem:[%s1567_s28 + $0x18] sm:$0xff] }
  0x44   : > { %v715_v5 = vor.u32 %v714_v63, %v710_v62  ;;  %v711_v28 = vsel %vm1605_vm4, %v706_v13, %v710_v62  ;;  %v962_v40 = vrot.slane %v961_v17, 4  ;;  %v1448_v62 = vrot.slane %v1774_v1, 9 }
  0x45   : > { %v728_v11 = vunpack.c.l.b16 %v711_v28  ;;  %v1122_v63 = vrot.slane %v1120_v50, 4  ;;  %v1417_v4 = vrot.slane %v1682_v22, 9  ;;  %v801_v7 = vrot.slane %v799_v56, 4  ;;  %v1837_v28 = vld [vmem:[%s1567_s28 + $0x60] sm:$0xf] }
  0x46   : > { %1409 = vmatmul.msk.bf16.gmra.mxu3 %vm345_vm3, %v1462_v19  ;;  %v968_v19 = vshrl.u32 %v1777_v2, 16  ;;  %v716_v14 = vrot.slane %v715_v5, 4  ;;  %v967_v51 = vsel %vm1605_vm4, %v962_v40, %v966_v43  ;;  %v1123_v2 = vrot.slane %v197_v27, 5 }
  0x47   : > { %v1050_v60 = vunpack.c.l.b16 %v967_v51  ;;  %v802_v8 = vrot.slane %v1703_v48, 5  ;;  %v1121_v1 = vsel %vm1642_vm7, %v1448_v62, %v1120_v50  ;;  %v800_v13 = vsel %vm1642_vm7, %v1417_v4, %v799_v56 }
  0x48   : > { %v970_v25 = vrot.slane %v968_v19, 4  ;;  %v721_v55 = vsel %vm1605_vm4, %v716_v14, %v720_v15  ;;  %v998_v15 = vshll.u32 %v206_v46, 16  ;;  %v1146_v16 = vunpack.c.l.b16 %v1121_v1 }
  0x49   : > { %v803_v48 = vsel %vm1642_vm7, %v801_v7, %v802_v8  ;;  %v820_v21 = vunpack.c.l.b16 %v800_v13  ;;  %v806_v34 = vrot.slane %v1716_v61, 5  ;;  %v1418_v50 = vrot.slane %v1713_v57, 9  ;;  %v1463_v61 = vld [vmem:[%s1567_s28 + $0x3c] sm:$0xff] }
  0x4a   : > { %v971_v33 = vor.u32 %v970_v25, %v966_v43  ;;  %v1000_v27 = vrot.slane %v998_v15, 5  ;;  %v809_v51 = vrot.slane %v1743_v31, 5  ;;  %v813_v15 = vrot.slane %v1757_v49, 5 }
  0x4b   : > { %v816_v49 = vrot.slane %v1771_v0, 5 }
  0x4c   : > { %1413 = vmatmul.msk.bf16.gmra.mxu0 %vm345_vm3, %v731_v32  ;;  %v796_v32 = vsel %vm1642_vm7, %v794_v23, %v795_v9  ;;  %v972_v42 = vrot.slane %v971_v33, 4  ;;  %v1124_v9 = vsel %vm1642_vm7, %v1122_v63, %v1123_v2  ;;  %v821_v23 = vunpack.c.l.b16 %v803_v48 }
  0x4d   : > { %v819_v39 = vunpack.c.l.b16 %v796_v32  ;;  %v1147_v18 = vunpack.c.l.b16 %v1124_v9 }
  0x4e   : > { %1382 = vmatmul.msk.bf16.gmra.mxu1 %vm345_vm3, %v1464_v37  ;;  %v729_v37 = vunpack.c.l.b16 %v721_v55  ;;  %v827_v29 = vpack.c.b16 %v821_v23, %v820_v21  ;;  %v1450_v21 = vrot.slane %v1837_v28, 9 }
  0x4f   : > { %v826_v12 = vpack.c.b16 %v819_v39, %v818_v38  ;;  %v1154_v55 = vpack.c.b16 %v1147_v18, %v1146_v16 }
  0x50   : > { %v733_v10 = vpack.c.b16 %v729_v37, %v728_v11  ;;  %v1003_v11 = vshrl.u32 %v1837_v28, 16  ;;  %v1006_v37 = vshll.u32 %v1837_v28, 16 }
  0x52   : > { %1390 = vmatmul.msk.bf16.gmra.mxu2 %vm345_vm3, %v500_v47  ;;  %v1804_v47 = vld [vmem:[%s1567_s28 + $0x3c] sm:$0xf] }
  0x53   : > { %v979_v52 = vshrl.u32 %v1804_v47, 16  ;;  %v982_v53 = vshll.u32 %v1804_v47, 16  ;;  %v1449_v40 = vrot.slane %v1804_v47, 9 }
  0x55   : > { %v981_v5 = vrot.slane %v979_v52, 4  ;;  %v984_v6 = vrot.slane %v982_v53, 5  ;;  %v1005_v52 = vrot.slane %v1003_v11, 4  ;;  %v1008_v53 = vrot.slane %v1006_v37, 5 }
  0x56   : > { %1410 = vmatmul.msk.bf16.gmra.mxu3 %vm345_vm3, %v1465_v54  ;;  %v977_v54 = vsel %vm1605_vm4, %v972_v42, %v976_v44 }
  0x57   : > { %v985_v22 = vor.u32 %v984_v6, %v981_v5  ;;  %v1009_v62 = vor.u32 %v1008_v53, %v1005_v52 }
  0x59   : > { %v986_v43 = vrot.slane %v985_v22, 4 }
  0x5c   : > { %1414 = vmatmul.msk.bf16.gmra.mxu0 %vm345_vm3, %v732_v3  ;;  %v1051_v3 = vunpack.c.l.b16 %v977_v54 }
  0x5e   : > { %1383 = vmatmul.msk.bf16.gmra.mxu1 %vm345_vm3, %v1467_v26  ;;  %v1058_v19 = vpack.c.b16 %v1051_v3, %v1050_v60  ;;  %v807_v60 = vsel %vm1642_vm7, %v1418_v50, %v806_v34 }
  0x5f   : > { %v822_v5 = vunpack.c.l.b16 %v807_v60  ;;  %v1469_v60 = vld [vmem:[%s1567_s28 + $0x84] sm:$0xff] }
  0x62   : > { %1391 = vmatmul.msk.bf16.gmra.mxu2 %vm345_vm3, %v1739_v30  ;;  %v1807_v30 = vld [vmem:[%s1567_s28 + $0x40] sm:$0xf] }
  0x63   : > { %v988_v58 = vshll.u32 %v1807_v30, 16  ;;  %v992_v59 = vshrl.u32 %v1807_v30, 16  ;;  %v1127_v17 = vrot.slane %v1807_v30, 5 }
  0x65   : > { %v990_v26 = vrot.slane %v988_v58, 5  ;;  %v994_v35 = vrot.slane %v992_v59, 4  ;;  %v1129_v42 = vrot.slane %v1127_v17, 4  ;;  %v215_v58 = vld [vmem:[%s1567_s28 + $0x68] sm:$0x1]  ;;  %v1128_v47 = vsel %vm1642_vm7, %v1449_v40, %v1127_v17 }
  0x66   : > { %1411 = vmatmul.msk.bf16.gmra.mxu3 %vm345_vm3, %v1468_v20  ;;  %v1841_v20 = vld [vmem:[%s1567_s28 + $0x64] sm:$0xf]  ;;  %v1022_v2 = vshll.u32 %v215_v58, 16  ;;  %v1148_v3 = vunpack.c.l.b16 %v1128_v47 }
  0x67   : > { %v995_v14 = vor.u32 %v994_v35, %v990_v26  ;;  %v991_v32 = vsel %vm1605_vm4, %v986_v43, %v990_v26  ;;  %v1012_v38 = vshll.u32 %v1841_v20, 16  ;;  %v1016_v39 = vshrl.u32 %v1841_v20, 16  ;;  %v222_v26 = vld [vmem:[%s1567_s28 + $0x84] sm:$0xf]  ;;  %v223_v35 = vld [vmem:[%s1567_s28 + $0x88] sm:$0xf] }
  0x68   : > { %v1052_v44 = vunpack.c.l.b16 %v991_v32  ;;  %v1024_v8 = vrot.slane %v1022_v2, 5  ;;  %v1134_v1 = vrot.slane %v1841_v20, 5  ;;  %v1027_v22 = vshrl.u32 %v222_v26, 16 }
  0x69   : > { %v996_v25 = vrot.slane %v995_v14, 4  ;;  %v1014_v54 = vrot.slane %v1012_v38, 5  ;;  %v1018_v56 = vrot.slane %v1016_v39, 4  ;;  %v1030_v13 = vshll.u32 %v222_v26, 16 }
  0x6a   : > { %v1036_v48 = vshll.u32 %v223_v35, 16  ;;  %v1040_v16 = vshrl.u32 %v223_v35, 16  ;;  %v1136_v23 = vrot.slane %v1134_v1, 4  ;;  %v1137_v43 = vrot.slane %v215_v58, 5 }
  0x6b   : > { %v1001_v33 = vsel %vm1605_vm4, %v996_v25, %v1000_v27  ;;  %v1019_v63 = vor.u32 %v1018_v56, %v1014_v54  ;;  %v1466_v25 = vld [vmem:[%s1567_s28 + $0x60] sm:$0xff]  ;;  %v1032_v17 = vrot.slane %v1030_v13, 5  ;;  %v815_v32 = vrot.slane %v813_v15, 4 }
  0x6c   : > { %1415 = vmatmul.msk.bf16.gmra.mxu0 %vm345_vm3, %v733_v10  ;;  %v1053_v30 = vunpack.c.l.b16 %v1001_v33  ;;  %v1130_v10 = vrot.slane %v206_v46, 5  ;;  %v1038_v20 = vrot.slane %v1036_v48, 5  ;;  %v1042_v33 = vrot.slane %v1040_v16, 4 }
  0x6d   : > { %v1020_v7 = vrot.slane %v1019_v63, 4  ;;  %v1135_v11 = vsel %vm1642_vm7, %v1450_v21, %v1134_v1  ;;  %v1138_v28 = vsel %vm1642_vm7, %v1136_v23, %v1137_v43  ;;  %v1141_v52 = vrot.slane %v223_v35, 5 }
  0x6e   : > { %1420 = vmatmul.msk.bf16.vlgmr.msra.gmra.mxu1 %vm345_vm3, %v826_v12  ;;  %v808_v12 = vrot.slane %v806_v34, 4  ;;  %v1131_v59 = vsel %vm1642_vm7, %v1129_v42, %v1130_v10  ;;  %v1059_v57 = vpack.c.b16 %v1053_v30, %v1052_v44  ;;  %v224_v34 = vld [vmem:[%s1567_s28 + $0x8c] sm:$0x1]  ;;  %v1043_v40 = vor.u32 %v1042_v33, %v1038_v20 }
  0x6f   : > { %v1149_v4 = vunpack.c.l.b16 %v1131_v59  ;;  %v1025_v14 = vsel %vm1605_vm4, %v1020_v7, %v1024_v8  ;;  %v1046_v0 = vshll.u32 %v224_v34, 16  ;;  %v1150_v42 = vunpack.c.l.b16 %v1135_v11 }
  0x70   : > { %v810_v31 = vsel %vm1642_vm7, %v808_v12, %v809_v51  ;;  %v1055_v27 = vunpack.c.l.b16 %v1025_v14  ;;  %v1151_v44 = vunpack.c.l.b16 %v1138_v28  ;;  %v1451_v47 = vrot.slane %v222_v26, 9 }
  0x71   : > { %v823_v6 = vunpack.c.l.b16 %v810_v31  ;;  %v1155_v46 = vpack.c.b16 %v1149_v4, %v1148_v3  ;;  %v1048_v12 = vrot.slane %v1046_v0, 5  ;;  %v1143_v59 = vrot.slane %v1141_v52, 4 }
  0x72   : > { %1440 = vmatmul.msk.bf16.vlgmr.msra.gmra.mxu2 %vm345_vm3, %v1460_v24  ;;  %v1010_v24 = vrot.slane %v1009_v62, 4  ;;  %v1156_v51 = vpack.c.b16 %v1151_v44, %v1150_v42  ;;  %v1142_v63 = vsel %vm1642_vm7, %v1451_v47, %v1141_v52 }
  0x73   : > { %v1152_v4 = vunpack.c.l.b16 %v1142_v63 }
  0x74   : > { %v1015_v9 = vsel %vm1605_vm4, %v1010_v24, %v1014_v54 }
  0x75   : > { %v1054_v18 = vunpack.c.l.b16 %v1015_v9 }
  0x76   : > { %1444 = vmatmul.msk.bf16.vlgmr.msra.gmra.mxu3 %vm345_vm3, %v1058_v19  ;;  %v828_v19 = vpack.c.b16 %v823_v6, %v822_v5 }
  0x77   : > { %v1060_v37 = vpack.c.b16 %v1055_v27, %v1054_v18 }
  0x7c   : > { %1452 = vmatmul.msk.bf16.vlgmr.msra.gmra.mxu0 %vm345_vm3, %v1154_v55  ;;  %v1029_v55 = vrot.slane %v1027_v22, 4 }
  0x7e   : > { %1421 = vmatmul.msk.bf16.gmra.mxu1 %vm345_vm3, %v827_v29  ;;  %v1419_v29 = vrot.slane %v1753_v45, 9  ;;  %v1033_v38 = vor.u32 %v1032_v17, %v1029_v55  ;;  %v817_v45 = vsel %vm1642_vm7, %v815_v32, %v816_v49 }
  0x7f   : > { %v825_v10 = vunpack.c.l.b16 %v817_v45 }
  0x80   : > { %v814_v39 = vsel %vm1642_vm7, %v1419_v29, %v813_v15  ;;  %v1034_v50 = vrot.slane %v1033_v38, 4 }
  0x81   : > { %v824_v30 = vunpack.c.l.b16 %v814_v39 }
  0x82   : > { %1441 = vmatmul.msk.bf16.gmra.mxu2 %vm345_vm3, %v1463_v61  ;;  %v1044_v61 = vrot.slane %v1043_v40, 4  ;;  %v1039_v56 = vsel %vm1605_vm4, %v1034_v50, %v1038_v20 }
  0x83   : > { %v829_v53 = vpack.c.b16 %v825_v10, %v824_v30  ;;  %v1056_v31 = vunpack.c.l.b16 %v1039_v56 }
  0x84   : > { %v1049_v58 = vsel %vm1605_vm4, %v1044_v61, %v1048_v12 }
  0x85   : > { %v1057_v62 = vunpack.c.l.b16 %v1049_v58 }
  0x86   : > { %1445 = vmatmul.msk.bf16.gmra.mxu3 %vm345_vm3, %v1059_v57  ;;  %v1144_v57 = vrot.slane %v224_v34, 5 }
  0x87   : > { %v1061_v36 = vpack.c.b16 %v1057_v62, %v1056_v31 }
  0x88   : > { %v1145_v2 = vsel %vm1642_vm7, %v1143_v59, %v1144_v57 }
  0x89   : > { %v1153_v5 = vunpack.c.l.b16 %v1145_v2 }
  0x8b   : > { %v1157_v24 = vpack.c.b16 %v1153_v5, %v1152_v4 }
  0x8c   : > { %1453 = vmatmul.msk.bf16.gmra.mxu0 %vm345_vm3, %v1155_v46 }
  0x8e   : > { %1422 = vmatmul.msk.bf16.gmra.mxu1 %vm345_vm3, %v828_v19 }
  0x92   : > { %1442 = vmatmul.msk.bf16.gmra.mxu2 %vm345_vm3, %v1466_v25 }
  0x96   : > { %1446 = vmatmul.msk.bf16.gmra.mxu3 %vm345_vm3, %v1060_v37 }
  0x9b   : > { %v376_v54 = vpop.f32.mrf.mxu1 }
  0x9c   : > { %1454 = vmatmul.msk.bf16.gmra.mxu0 %vm345_vm3, %v1156_v51 }
  0x9e   : > { %1423 = vmatmul.msk.bf16.gmra.mxu1 %vm345_vm3, %v829_v53 }
  0xa2   : > { %1443 = vmatmul.msk.bf16.gmra.mxu2 %vm345_vm3, %v1469_v60 }
  0xa3   : > { %v1906_v3 = vpop.f32.mrf.mxu1 }
  0xa5   : > { %v381_v6 = vpop.f32.mrf.mxu2 }
  0xa6   : > { %1447 = vmatmul.msk.bf16.gmra.mxu3 %vm345_vm3, %v1061_v36 }
  0xa9   : > { %v371_v7 = vpop.f32.mrf.mxu0  ;;  %v1909_v8 = vpop.f32.mrf.mxu3 }
  0xab   : > { %v435_v26 = vpop.f32.mrf.mxu1 }
  0xac   : > { %1455 = vmatmul.msk.bf16.gmra.mxu0 %vm345_vm3, %v1157_v24  ;;  %v436_v35 = vadd.f32 %v435_v26, %v371_v7 }
  0xad   : > { %v1912_v41 = vpop.f32.mrf.mxu2 }
  0xb1   : > { %v373_v46 = vpop.f32.mrf.mxu0  ;;  %v1914_v19 = vpop.f32.mrf.mxu3 }
  0xb3   : > { %v437_v1 = vpop.f32.mrf.mxu1 }
  0xb4   : > { %v438_v56 = vadd.f32 %v437_v1, %v373_v46 }
  0xb5   : > { %v526_v9 = vpop.f32.mrf.mxu2 }
  0xb6   : > { %v546_v22 = vadd.f32 %v526_v9, %v436_v35 }
  0xb9   : > { %v758_v13 = vpop.f32.mrf.mxu0  ;;  %v598_v48 = vpop.f32.mrf.mxu3 }
  0xba   : > { %v618_v14 = vadd.f32 %v598_v48, %v546_v22 }
  0xbb   : > { %v440_v15 = vpop.f32.mrf.mxu1 }
  0xbc   : > { %v441_v16 = vadd.f32 %v440_v15, %v376_v54  ;;  %v778_v18 = vadd.f32 %v758_v13, %v618_v14 }
  0xbd   : > { %v528_v21 = vpop.f32.mrf.mxu2 }
  0xbe   : > { %v547_v59 = vadd.f32 %v528_v21, %v438_v56 }
  0xc1   : > { %v760_v23 = vpop.f32.mrf.mxu0  ;;  %v600_v43 = vpop.f32.mrf.mxu3 }
  0xc2   : > { %v619_v31 = vadd.f32 %v600_v43, %v547_v59 }
  0xc3   : > { %v442_v25 = vpop.f32.mrf.mxu1 }
  0xc4   : > { %v779_v4 = vadd.f32 %v760_v23, %v619_v31  ;;  %v443_v35 = vadd.f32 %v442_v25, %v1906_v3 }
  0xc5   : > { %v531_v27 = vpop.f32.mrf.mxu2 }
  0xc6   : > { %v548_v55 = vadd.f32 %v531_v27, %v441_v16 }
  0xc9   : > { %v763_v17 = vpop.f32.mrf.mxu0  ;;  %v603_v20 = vpop.f32.mrf.mxu3 }
  0xca   : > { %v620_v29 = vadd.f32 %v603_v20, %v548_v55 }
  0xcb   : > { %v445_v32 = vpop.f32.mrf.mxu1 }
  0xcc   : > { %v446_v49 = vadd.f32 %v445_v32, %v381_v6  ;;  %v780_v33 = vadd.f32 %v763_v17, %v620_v29 }
  0xcd   : > { %v533_v34 = vpop.f32.mrf.mxu2 }
  0xce   : > { %v549_v46 = vadd.f32 %v533_v34, %v443_v35 }
  0xd1   : > { %v765_v11 = vpop.f32.mrf.mxu0  ;;  %v605_v28 = vpop.f32.mrf.mxu3 }
  0xd2   : > { %v621_v16 = vadd.f32 %v605_v28, %v549_v46 }
  0xd3   : > { %v1916_v37 = vpop.f32.mrf.mxu1 }
  0xd4   : > { %v781_v29 = vadd.f32 %v765_v11, %v621_v16 }
  0xd5   : > { %v536_v38 = vpop.f32.mrf.mxu2 }
  0xd6   : > { %v550_v39 = vadd.f32 %v536_v38, %v446_v49 }
  0xd9   : > { %v768_v45 = vpop.f32.mrf.mxu0  ;;  %v608_v40 = vpop.f32.mrf.mxu3 }
  0xda   : > { %v622_v0 = vadd.f32 %v608_v40, %v550_v39 }
  0xdb   : > { %v1918_v42 = vpop.f32.mrf.mxu1 }
  0xdc   : > { %v1920_v44 = vadd.f32 %v768_v45, %v622_v0  ;;  %v448_v45 = vadd.f32 %v1916_v37, %v1912_v41  ;;  %v451_v41 = vadd.f32 %v1918_v42, %v1909_v8 }
  0xdd   : > { %v538_v30 = vpop.f32.mrf.mxu2 }
  0xde   : > { %v551_v0 = vadd.f32 %v538_v30, %v448_v45 }
  0xe1   : > { %v1922_v10 = vpop.f32.mrf.mxu0  ;;  %v1924_v50 = vpop.f32.mrf.mxu3 }
  0xe2   : > { %v623_v31 = vadd.f32 %v1924_v50, %v551_v0 }
  0xe3   : > { %v1926_v61 = vpop.f32.mrf.mxu1 }
  0xe4   : > { %v453_v8 = vadd.f32 %v1926_v61, %v1914_v19 }
  0xe5   : > { %v1928_v12 = vpop.f32.mrf.mxu2 }
  0xe9   : > { %v1930_v51 = vpop.f32.mrf.mxu0  ;;  %v1932_v52 = vpop.f32.mrf.mxu3 }
  0xeb   : > { %v854_v53 = vpop.f32.mrf.mxu1 }
  0xec   : > { %v874_v62 = vadd.f32 %v854_v53, %v778_v18 }
  0xed   : > { %v1934_v54 = vpop.f32.mrf.mxu2 }
  0xf1   : > { %v1936_v58 = vpop.f32.mrf.mxu0  ;;  %v1938_v47 = vpop.f32.mrf.mxu3 }
  0xf3   : > { %v856_v57 = vpop.f32.mrf.mxu1 }
  0xf4   : > { %v875_v6 = vadd.f32 %v856_v57, %v779_v4 }
  0xf5   : > { %v926_v60 = vpop.f32.mrf.mxu2 }
  0xf6   : > { %v946_v2 = vadd.f32 %v926_v60, %v874_v62 }
  0xf9   : > { %v1182_v63 = vpop.f32.mrf.mxu0  ;;  %v1086_v36 = vpop.f32.mrf.mxu3 }
  0xfa   : > { %v1106_v24 = vadd.f32 %v1086_v36, %v946_v2 }
  0xfb   : > { %v859_v5 = vpop.f32.mrf.mxu1 }
  0xfc   : > { %v1202_v1 = vadd.f32 %v1182_v63, %v1106_v24  ;;  %v876_v15 = vadd.f32 %v859_v5, %v780_v33 }
  0xfd   : > { %v928_v7 = vpop.f32.mrf.mxu2 }
  0xfe   : > { %v947_v26 = vadd.f32 %v928_v7, %v875_v6  ;;  %v1239_v18 = vmul.f32 %v1202_v1, %v1202_v1  ;;  %v552_v6 = vadd.f32 %v1928_v12, %v451_v41 }
 0x100   : > { %v624_v35 = vadd.f32 %v1932_v52, %v552_v6 }
 0x101   : > { %v1184_v9 = vpop.f32.mrf.mxu0  ;;  %v1088_v22 = vpop.f32.mrf.mxu3 }
 0x102   : > { %v1107_v13 = vadd.f32 %v1088_v22, %v947_v26 }
 0x103   : > { %v861_v48 = vpop.f32.mrf.mxu1 }
 0x104   : > { %v1203_v14 = vadd.f32 %v1184_v9, %v1107_v13  ;;  %v877_v33 = vadd.f32 %v861_v48, %v781_v29  ;;  %v553_v13 = vadd.f32 %v1934_v54, %v453_v8 }
 0x105   : > { %v931_v21 = vpop.f32.mrf.mxu2 }
 0x106   : > { %v1473_v23 = vpack.c.bf16 %v1203_v14, %v1202_v1  ;;  %v1226_v3 = vadd.f32 %v1203_v14, %v1202_v1  ;;  %v1240_v43 = vmul.f32 %v1203_v14, %v1203_v14  ;;  %v948_v25 = vadd.f32 %v931_v21, %v876_v15 }
 0x107   : > { %v625_v52 = vadd.f32 %v1938_v47, %v553_v13 }
 0x108   : > { %1474 = vst [vmem:[%s1945_s16] sm:$0xff] %v1473_v23   ;;  %v1247_v27 = vadd.f32 %v1240_v43, %v1239_v18 }
 0x109   : > { %v1187_v55 = vpop.f32.mrf.mxu0  ;;  %v1091_v17 = vpop.f32.mrf.mxu3 }
 0x10a   : > { %v1108_v20 = vadd.f32 %v1091_v17, %v948_v25 }
 0x10b   : > { %v864_v32 = vpop.f32.mrf.mxu1 }
 0x10c   : > { %v1204_v49 = vadd.f32 %v1187_v55, %v1108_v20  ;;  %v878_v60 = vadd.f32 %v864_v32, %v1920_v44  ;;  %v783_v44 = vadd.f32 %v1922_v10, %v623_v31  ;;  %v784_v10 = vadd.f32 %v1930_v51, %v624_v35 }
 0x10d   : > { %v933_v34 = vpop.f32.mrf.mxu2  ;;  %v785_v55 = vadd.f32 %v1936_v58, %v625_v52 }
 0x10e   : > { %v1227_v28 = vadd.f32 %v1226_v3, %v1204_v49  ;;  %v1241_v38 = vmul.f32 %v1204_v49, %v1204_v49  ;;  %v949_v39 = vadd.f32 %v933_v34, %v877_v33 }
 0x110   : > { %v1248_v40 = vadd.f32 %v1247_v27, %v1241_v38 }
 0x111   : > { %v1189_v53 = vpop.f32.mrf.mxu0  ;;  %v1093_v56 = vpop.f32.mrf.mxu3 }
 0x112   : > { %v1109_v59 = vadd.f32 %v1093_v56, %v949_v39 }
 0x113   : > { %v866_v11 = vpop.f32.mrf.mxu1 }
 0x114   : > { %v1205_v57 = vadd.f32 %v1189_v53, %v1109_v59  ;;  %v879_v26 = vadd.f32 %v866_v11, %v783_v44 }
 0x115   : > { %v936_v62 = vpop.f32.mrf.mxu2 }
 0x116   : > { %v1478_v63 = vpack.c.bf16 %v1205_v57, %v1204_v49  ;;  %v1228_v2 = vadd.f32 %v1227_v28, %v1205_v57  ;;  %v1242_v36 = vmul.f32 %v1205_v57, %v1205_v57  ;;  %v950_v4 = vadd.f32 %v936_v62, %v878_v60 }
 0x118   : > { %1490 = vst [vmem:[%s1945_s16 + $0x8] sm:$0xff] %v1478_v63   ;;  %v1249_v37 = vadd.f32 %v1248_v40, %v1242_v36 }
 0x119   : > { %v1192_v30 = vpop.f32.mrf.mxu0  ;;  %v1096_v5 = vpop.f32.mrf.mxu3 }
 0x11a   : > { %v1110_v24 = vadd.f32 %v1096_v5, %v950_v4 }
 0x11b   : > { %v869_v22 = vpop.f32.mrf.mxu1 }
 0x11c   : > { %v1206_v7 = vadd.f32 %v1192_v30, %v1110_v24  ;;  %v880_v16 = vadd.f32 %v869_v22, %v784_v10 }
 0x11d   : > { %v938_v50 = vpop.f32.mrf.mxu2 }
 0x11e   : > { %v1229_v46 = vadd.f32 %v1228_v2, %v1206_v7  ;;  %v1243_v1 = vmul.f32 %v1206_v7, %v1206_v7  ;;  %v951_v9 = vadd.f32 %v938_v50, %v879_v26 }
 0x120   : > { %v1250_v42 = vadd.f32 %v1249_v37, %v1243_v1 }
 0x121   : > { %v1194_v12 = vpop.f32.mrf.mxu0  ;;  %v1098_v48 = vpop.f32.mrf.mxu3 }
 0x122   : > { %v1111_v14 = vadd.f32 %v1098_v48, %v951_v9 }
 0x123   : > { %v871_v19 = vpop.f32.mrf.mxu1 }
 0x124   : > { %v1207_v15 = vadd.f32 %v1194_v12, %v1111_v14  ;;  %v881_v51 = vadd.f32 %v871_v19, %v785_v55 }
 0x125   : > { %v941_v18 = vpop.f32.mrf.mxu2 }
 0x126   : > { %v1483_v21 = vpack.c.bf16 %v1207_v15, %v1206_v7  ;;  %v1230_v23 = vadd.f32 %v1229_v46, %v1207_v15  ;;  %v1244_v3 = vmul.f32 %v1207_v15, %v1207_v15  ;;  %v952_v43 = vadd.f32 %v941_v18, %v880_v16 }
 0x128   : > { %1491 = vst [vmem:[%s1945_s16 + $0x10] sm:$0xff] %v1483_v21   ;;  %v1251_v25 = vadd.f32 %v1250_v42, %v1244_v3 }
 0x129   : > { %v1197_v61 = vpop.f32.mrf.mxu0  ;;  %v1101_v27 = vpop.f32.mrf.mxu3 }
 0x12a   : > { %v1112_v54 = vadd.f32 %v1101_v27, %v952_v43 }
 0x12c   : > { %v1208_v17 = vadd.f32 %v1197_v61, %v1112_v54 }
 0x12d   : > { %v943_v20 = vpop.f32.mrf.mxu2 }
 0x12e   : > { %v1231_v29 = vadd.f32 %v1230_v23, %v1208_v17  ;;  %v1245_v47 = vmul.f32 %v1208_v17, %v1208_v17  ;;  %v953_v32 = vadd.f32 %v943_v20, %v881_v51 }
 0x130   : > { %v1252_v49 = vadd.f32 %v1251_v25, %v1245_v47 }
 0x131   : > { %v1103_v33 = vpop.f32.mrf.mxu3  ;;  %v1199_v28 = vpop.f32.mrf.mxu0 }
 0x132   : > { %v1113_v34 = vadd.f32 %v1103_v33, %v953_v32 }
 0x134   : > { %v1209_v38 = vadd.f32 %v1199_v28, %v1113_v34 }
 0x136   : > { %v1488_v39 = vpack.c.bf16 %v1209_v38, %v1208_v17  ;;  %v1232_v45 = vadd.f32 %v1231_v29, %v1209_v38  ;;  %v1246_v40 = vmul.f32 %v1209_v38, %v1209_v38 }
 0x138   : > { %1492 = vst [vmem:[%s1945_s16 + $0x18] sm:$0xff] %v1488_v39   ;;  %v1233_v0 = vrot.slane %v1232_v45, 4  ;;  %v1253_v53 = vadd.f32 %v1252_v49, %v1246_v40 }
 0x13a   : > { %v1234_v58 = vadd.f32 %v1233_v0, %v1232_v45  ;;  %v1254_v56 = vrot.slane %v1253_v53, 4 }
 0x13c   : > { %v1235_v59 = vrot.slane %v1234_v58, 2  ;;  %v1255_v57 = vadd.f32 %v1254_v56, %v1253_v53 }
 0x13e   : > { %v1236_v60 = vadd.f32 %v1235_v59, %v1234_v58  ;;  %v1256_v11 = vrot.slane %v1255_v57, 2 }
 0x140   : > { %v1237_v31 = vrot.slane %v1236_v60, 1  ;;  %v1257_v62 = vadd.f32 %v1256_v11, %v1255_v57 }
 0x142   : > { %v1258_v63 = vrot.slane %v1257_v62, 1  ;;  %v1238_v2 = vadd.f32 %v1237_v31, %v1236_v60 }
 0x144   : > { %v1259_v36 = vadd.f32 %v1258_v63, %v1257_v62 }
 0x146   : > { %v1261_v4 = vsel %vm1260_vm8, %v1238_v2, %v1259_v36 }
 0x147   : > { %1262 = vst [vmem:[%s187_s20] sm:$0x3] %v1261_v4 }
 0x148 PF: > { %s14_s12 = sadd.s32 1, %s1511_s12  }
 0x149   : > { %p11_p6 = scmp.ge.s32.totalorder %s14_s12, 10  }
 0x14b   :  { %13 = sbr.rel (!%p11_p6) target bundleno = 1 (0x1), region = 70 }

// kernel: downsample_layer_forward.11
= control target key start
LH: loop header
LB: loop body
LE: loop exit
PB: predicated region body
PF: predicated region fallthrough
CT: control target
= control target key end

     0   :  { %s291_s9 = smov 0   ;;  %s314_s0 = inlined_call_operand.vmem [shape: f32[128,128], index: 0, kind: input, shape index: {}]   ;;  %s315_s1 = inlined_call_operand.vmem [shape: f32[2,128], index: 1, kind: input, shape index: {}]   ;;  %s316_s2 = inlined_call_operand.vmem [shape: f32[128,128], index: 2, kind: output, shape index: {}]  }
   0x1 LB: > { %s247_s10 = sadd.s32 4294967295, %s274_s9   ;;  %p251_p0 = scmp.ge.s32.totalorder %s274_s9, 1  ;;  %s274_s9 = sphi %s291_s9, %s12_s9  }
   0x2   : > { %p113_p1 = scmp.lt.s32.totalorder %s274_s9, 3 }
   0x4   : > { %p114_p2 = pnand %p251_p0, %p113_p1 }
   0x5   : > { %s252_s11 = sshll.u32 (!%p114_p2), %s247_s10, 3 }
   0x6   : > { %117 = sbr.rel (%p114_p2) target bundleno = 29 (0x1d), region = 28  ;;  %p136_p3 = scmp.lt.s32.totalorder (!%p114_p2), %s252_s11, 15 }
   0xb   : > { %s318_s11 = smov (!%p136_p3, %s252_s11), 15  ;;  %v266_v0 = vld [vmem:[%s315_s1] ss:$0 sm:$0xff]  ;;  %v267_v1 = vld [vmem:[%s315_s1 + $0x1] ss:$0 sm:$0xff] }
   0xc   : > { %s253_s14 = sshll.u32 %s318_s11, 3 }
   0xd   : > { %s139_s17 = scalar_lea.vmem %s314_s0, %s253_s14  ;;  %s145_s22 = scalar_lea.vmem %s316_s2, %s253_s14 }
   0xe   : > { %v147_v2 = vld [vmem:[%s139_s17] sm:$0xff]  ;;  %v148_v3 = vld [vmem:[%s139_s17 + $0x8] sm:$0xff]  ;;  %v149_v4 = vld [vmem:[%s139_s17 + $0x10] sm:$0xff] }
   0xf   : > { %v157_v5 = vmul.f32 %v266_v0, %v147_v2  ;;  %v158_v6 = vmul.f32 %v266_v0, %v148_v3  ;;  %v159_v7 = vmul.f32 %v266_v0, %v149_v4  ;;  %v150_v8 = vld [vmem:[%s139_s17 + $0x18] sm:$0xff]  ;;  %v151_v9 = vld [vmem:[%s139_s17 + $0x20] sm:$0xff]  ;;  %v152_v10 = vld [vmem:[%s139_s17 + $0x28] sm:$0xff] }
  0x10   : > { %v160_v11 = vmul.f32 %v266_v0, %v150_v8  ;;  %v161_v12 = vmul.f32 %v266_v0, %v151_v9  ;;  %v162_v13 = vmul.f32 %v266_v0, %v152_v10  ;;  %v153_v14 = vld [vmem:[%s139_s17 + $0x30] sm:$0xff]  ;;  %v154_v15 = vld [vmem:[%s139_s17 + $0x38] sm:$0xff] }
  0x11   : > { %v167_v16 = vadd.f32 %v267_v1, %v157_v5  ;;  %v168_v17 = vadd.f32 %v267_v1, %v158_v6  ;;  %v169_v18 = vadd.f32 %v267_v1, %v159_v7  ;;  %v163_v19 = vmul.f32 %v266_v0, %v153_v14 }
  0x12   : > { %v170_v20 = vadd.f32 %v267_v1, %v160_v11  ;;  %v171_v21 = vadd.f32 %v267_v1, %v161_v12  ;;  %v172_v22 = vadd.f32 %v267_v1, %v162_v13  ;;  %v164_v23 = vmul.f32 %v266_v0, %v154_v15 }
  0x13   : > { %v175_v24 = vmax.f32 %v167_v16, 0.0  ;;  %v176_v25 = vmax.f32 %v168_v17, 0.0  ;;  %v177_v26 = vmax.f32 %v169_v18, 0.0  ;;  %v173_v27 = vadd.f32 %v267_v1, %v163_v19 }
  0x14   : > { %v178_v28 = vmax.f32 %v170_v20, 0.0  ;;  %v174_v29 = vadd.f32 %v267_v1, %v164_v23  ;;  %v179_v30 = vmax.f32 %v171_v21, 0.0  ;;  %v180_v31 = vmax.f32 %v172_v22, 0.0 }
  0x15   : > { %183 = vst [vmem:[%s145_s22] sm:$0xff] %v175_v24  ;;  %v181_v32 = vmax.f32 %v173_v27, 0.0 }
  0x16   : > { %184 = vst [vmem:[%s145_s22 + $0x8] sm:$0xff] %v176_v25  ;;  %v182_v33 = vmax.f32 %v174_v29, 0.0 }
  0x17   : > { %185 = vst [vmem:[%s145_s22 + $0x10] sm:$0xff] %v177_v26 }
  0x18   : > { %186 = vst [vmem:[%s145_s22 + $0x18] sm:$0xff] %v178_v28 }
  0x19   : > { %187 = vst [vmem:[%s145_s22 + $0x20] sm:$0xff] %v179_v30 }
  0x1a   : > { %188 = vst [vmem:[%s145_s22 + $0x28] sm:$0xff] %v180_v31 }
  0x1b   : > { %189 = vst [vmem:[%s145_s22 + $0x30] sm:$0xff] %v181_v32 }
  0x1c   : > { %190 = vst [vmem:[%s145_s22 + $0x38] sm:$0xff] %v182_v33 }
  0x1d PF: > { %s12_s9 = sadd.s32 1, %s274_s9  }
  0x1e   : > { %p9_p4 = scmp.ge.s32.totalorder %s12_s9, 4  }
  0x20   :  { %11 = sbr.rel (!%p9_p4) target bundleno = 1 (0x1), region = 58 }

// kernel: downsample_layer_forward.10
= control target key start
LH: loop header
LB: loop body
LE: loop exit
PB: predicated region body
PF: predicated region fallthrough
CT: control target
= control target key end

     0   :  { %s1240_s12 = smov 0   ;;  %s1574_s0 = inlined_call_operand.vmem [shape: f32[16,6,9,8], index: 0, kind: input, shape index: {}]   ;;  %s1575_s1 = inlined_call_operand.vmem [shape: f32[9,8,128], index: 1, kind: input, shape index: {}]   ;;  %s1576_s2 = inlined_call_operand.vmem [shape: f32[128,128], index: 2, kind: output, shape index: {0}]   ;;  %s1577_s3 = inlined_call_operand.vmem [shape: f32[2,2,128], index: 3, kind: output, shape index: {1}]  }
   0x1 LB: > { %s1246_s13 = sadd.s32 4294967295, %s1218_s12   ;;  %p1120_p0 = scmp.ge.s32.totalorder %s1218_s12, 1  ;;  %s1218_s12 = sphi %s1240_s12, %s14_s12  }
   0x2   : > { %p142_p1 = scmp.lt.s32.totalorder %s1218_s12, 3 }
   0x4   : > { %p143_p2 = pnand %p1120_p0, %p142_p1 }
   0x5   : > { %s1121_s16 = sshll.u32 (!%p143_p2), %s1246_s13, 3  ;;  %p184_p4 = scmp.lt.s32.totalorder (!%p143_p2), %s1246_s13, 1 }
   0x6   : > { %146 = sbr.rel (%p143_p2) target bundleno = 309 (0x135), region = 28  ;;  %p172_p3 = scmp.lt.s32.totalorder (!%p143_p2), %s1121_s16, 15 }
   0xb   : > { %v261_v0 = vld [vmem:[%s1575_s1 + $0x8] sm:$0xff]  ;;  %v262_v1 = vld [vmem:[%s1575_s1 + $0x10] sm:$0xff]  ;;  %v263_v2 = vld [vmem:[%s1575_s1 + $0x18] sm:$0xff]  ;;  %s1579_s16 = smov (!%p172_p3, %s1121_s16), 15  ;;  %vm269_vm0 = vcmask 64512   ;;  %vm408_vm1 = vcmask 1046528  }
   0xc   : > { %1200 = vmatpush.msra.mxu1 %v261_v0  ;;  %1201 = vmatpush.msra.mxu2 %v261_v0  ;;  %v260_v3 = vld [vmem:[%s1575_s1] sm:$0xff]  ;;  %s1203_s25 = smul.u32 96, %s1579_s16  ;;  %v266_v5 = vld [vmem:[%s1575_s1 + $0x30] sm:$0xff]  ;;  %v267_v6 = vld [vmem:[%s1575_s1 + $0x38] sm:$0xff]  ;;  %s1124_s10 = sshll.u32 %s1579_s16, 3  ;;  %vm1026_vm2 = vcmask 1040384  }
   0xd   : > { %1202 = vmatpush.msra.mxu3 %v261_v0  ;;  %v264_v4 = vld [vmem:[%s1575_s1 + $0x20] sm:$0xff]  ;;  %309 = vmatpush.msra.mxu0 %v261_v0  ;;  %v265_v11 = vld [vmem:[%s1575_s1 + $0x28] sm:$0xff]  ;;  %s1535_s15 = scalar_lea.vmem %s1576_s2, %s1124_s10  ;;  %s1581_s13 = smov (!%p184_p4, %s1246_s13), 1 }
   0xe   : > { %464 = vmatpush.msrb.mxu2 %v262_v1  ;;  %374 = vmatpush.msrb.mxu1 %v260_v3  ;;  %s1272_s28 = scalar_lea.vmem %s1574_s0, %s1203_s25  ;;  %v268_v12 = vld [vmem:[%s1575_s1 + $0x40] sm:$0xff]  ;;  %s1125_s16 = sshll.u32 %s1581_s13, 1 }
   0xf   : > { %537 = vmatpush.msrb.mxu3 %v263_v2  ;;  %610 = vmatpush.msrb.mxu0 %v264_v4  ;;  %v208_v7 = vld [vmem:[%s1272_s28 + $0xd0] sm:$0xff]  ;;  %v188_v16 = vld [vmem:[%s1272_s28] sm:$0xff]  ;;  %v189_v17 = vld [vmem:[%s1272_s28 + $0x8] sm:$0x1]  ;;  %s187_s19 = scalar_lea.vmem %s1577_s3, %s1125_s16 }
  0x10   : > { %v226_v8 = vld [vmem:[%s1272_s28 + $0x190] sm:$0xff]  ;;  %1128 = vmatmul.msk.f32.vlgmr.msra.gmra.mxu1 %vm269_vm0, %v208_v7  ;;  %v409_v19 = vrot.slane %v188_v16, 1  ;;  %v410_v20 = vrot.slane %v189_v17, 1  ;;  %v1306_v22 = vld [vmem:[%s1272_s28 + $0x20] sm:$0xff]  ;;  %v198_v24 = vld [vmem:[%s1272_s28 + $0x68] sm:$0x1] }
  0x11   : > { %v244_v9 = vld [vmem:[%s1272_s28 + $0x250] sm:$0xff]  ;;  %1130 = vmatmul.msk.f32.vlgmr.msra.gmra.mxu2 %vm269_vm0, %v226_v8  ;;  %707 = vmatpush.msra.mxu1 %v265_v11  ;;  %v197_v23 = vld [vmem:[%s1272_s28 + $0x60] sm:$0xff]  ;;  %v413_v27 = vrot.slane %v198_v24, 1  ;;  %v207_v31 = vld [vmem:[%s1272_s28 + $0xc8] sm:$0x1]  ;;  %v652_v11 = vrot.slane %v1306_v22, 1 }
  0x12   : > { %v190_v10 = vld [vmem:[%s1272_s28 + $0x10] sm:$0xff]  ;;  %1132 = vmatmul.msk.f32.vlgmr.msra.gmra.mxu3 %vm269_vm0, %v244_v9  ;;  %780 = vmatpush.msra.mxu2 %v266_v5  ;;  %v411_v21 = vsel %vm408_vm1, %v409_v19, %v410_v20  ;;  %v412_v26 = vrot.slane %v197_v23, 1  ;;  %v1318_v29 = vld [vmem:[%s1272_s28 + $0x80] sm:$0xff]  ;;  %v416_v34 = vrot.slane %v207_v31, 1  ;;  %v216_v38 = vld [vmem:[%s1272_s28 + $0x128] sm:$0x1] }
  0x13   : > { %1126 = vmatmul.msk.f32.vlgmr.msra.gmra.mxu0 %vm269_vm0, %v190_v10  ;;  %853 = vmatpush.msra.mxu3 %v267_v6  ;;  %v217_v13 = vld [vmem:[%s1272_s28 + $0x130] sm:$0xff]  ;;  %v206_v30 = vld [vmem:[%s1272_s28 + $0xc0] sm:$0xff]  ;;  %v419_v41 = vrot.slane %v216_v38, 1  ;;  %v225_v45 = vld [vmem:[%s1272_s28 + $0x188] sm:$0x1] }
  0x14   : > { %950 = vmatpush.msra.mxu0 %v268_v12  ;;  %v235_v14 = vld [vmem:[%s1272_s28 + $0x1f0] sm:$0xff]  ;;  %v414_v28 = vsel %vm408_vm1, %v412_v26, %v413_v27  ;;  %v415_v33 = vrot.slane %v206_v30, 1  ;;  %v1330_v36 = vld [vmem:[%s1272_s28 + $0xe0] sm:$0xff]  ;;  %v422_v48 = vrot.slane %v225_v45, 1  ;;  %v234_v52 = vld [vmem:[%s1272_s28 + $0x1e8] sm:$0x1] }
  0x15   : > { %v253_v15 = vld [vmem:[%s1272_s28 + $0x2b0] sm:$0xff]  ;;  %v215_v37 = vld [vmem:[%s1272_s28 + $0x120] sm:$0xff]  ;;  %v425_v55 = vrot.slane %v234_v52, 1  ;;  %v243_v59 = vld [vmem:[%s1272_s28 + $0x248] sm:$0x1] }
  0x16   : > { %v199_v18 = vld [vmem:[%s1272_s28 + $0x70] sm:$0xff]  ;;  %v417_v35 = vsel %vm408_vm1, %v415_v33, %v416_v34  ;;  %v418_v40 = vrot.slane %v215_v37, 1  ;;  %v1342_v43 = vld [vmem:[%s1272_s28 + $0x140] sm:$0xff]  ;;  %v428_v62 = vrot.slane %v243_v59, 1  ;;  %v252_v2 = vld [vmem:[%s1272_s28 + $0x2a8] sm:$0x1] }
  0x17   : > { %v193_v25 = vld [vmem:[%s1272_s28 + $0x30] sm:$0xff]  ;;  %v224_v44 = vld [vmem:[%s1272_s28 + $0x180] sm:$0xff]  ;;  %v431_v5 = vrot.slane %v252_v2, 1  ;;  %v192_v8 = vld [vmem:[%s1272_s28 + $0x28] sm:$0x1] }
  0x18   : > { %1129 = vmatmul.msk.f32.gmra.mxu1 %vm269_vm0, %v217_v13  ;;  %v202_v32 = vld [vmem:[%s1272_s28 + $0x90] sm:$0xff]  ;;  %v420_v42 = vsel %vm408_vm1, %v418_v40, %v419_v41  ;;  %v421_v47 = vrot.slane %v224_v44, 1  ;;  %v1354_v50 = vld [vmem:[%s1272_s28 + $0x1a0] sm:$0xff]  ;;  %v195_v10 = vld [vmem:[%s1272_s28 + $0x48] sm:$0x1]  ;;  %v653_v12 = vrot.slane %v192_v8, 1 }
  0x19   : > { %1131 = vmatmul.msk.f32.gmra.mxu2 %vm269_vm0, %v235_v14  ;;  %v211_v39 = vld [vmem:[%s1272_s28 + $0xf0] sm:$0xff]  ;;  %v233_v51 = vld [vmem:[%s1272_s28 + $0x1e0] sm:$0xff]  ;;  %v204_v20 = vld [vmem:[%s1272_s28 + $0xa8] sm:$0x1] }
  0x1a   : > { %1133 = vmatmul.msk.f32.gmra.mxu3 %vm269_vm0, %v253_v15  ;;  %v220_v46 = vld [vmem:[%s1272_s28 + $0x150] sm:$0xff]  ;;  %v423_v49 = vsel %vm408_vm1, %v421_v47, %v422_v48  ;;  %v424_v54 = vrot.slane %v233_v51, 1  ;;  %v1366_v57 = vld [vmem:[%s1272_s28 + $0x200] sm:$0xff]  ;;  %v896_v15 = vrot.slane %v195_v10, 1  ;;  %v213_v31 = vld [vmem:[%s1272_s28 + $0x108] sm:$0x1] }
  0x1b   : > { %1127 = vmatmul.msk.f32.gmra.mxu0 %vm269_vm0, %v199_v18  ;;  %v229_v53 = vld [vmem:[%s1272_s28 + $0x1b0] sm:$0xff]  ;;  %v242_v58 = vld [vmem:[%s1272_s28 + $0x240] sm:$0xff]  ;;  %v201_v18 = vld [vmem:[%s1272_s28 + $0x88] sm:$0x1] }
  0x1c   : > { %v426_v56 = vsel %vm408_vm1, %v424_v54, %v425_v55  ;;  %v238_v60 = vld [vmem:[%s1272_s28 + $0x210] sm:$0xff]  ;;  %v427_v61 = vrot.slane %v242_v58, 1  ;;  %v1378_v0 = vld [vmem:[%s1272_s28 + $0x260] sm:$0xff]  ;;  %v222_v41 = vld [vmem:[%s1272_s28 + $0x168] sm:$0x1] }
  0x1d   : > { %v251_v1 = vld [vmem:[%s1272_s28 + $0x2a0] sm:$0xff]  ;;  %v247_v3 = vld [vmem:[%s1272_s28 + $0x270] sm:$0xff]  ;;  %v231_v52 = vld [vmem:[%s1272_s28 + $0x1c8] sm:$0x1] }
  0x1e   : > { %v429_v63 = vsel %vm408_vm1, %v427_v61, %v428_v62  ;;  %v430_v4 = vrot.slane %v251_v1, 1  ;;  %v1390_v7 = vld [vmem:[%s1272_s28 + $0x2c0] sm:$0xff]  ;;  %v256_v9 = vld [vmem:[%s1272_s28 + $0x2d0] sm:$0xff]  ;;  %v240_v62 = vld [vmem:[%s1272_s28 + $0x228] sm:$0x1] }
  0x1f   : > { %v194_v13 = vld [vmem:[%s1272_s28 + $0x40] sm:$0xff]  ;;  %v196_v17 = vld [vmem:[%s1272_s28 + $0x50] sm:$0xff] }
  0x20   : > { %1134 = vmatmul.msk.f32.vlgmr.msrb.gmra.mxu1 %vm269_vm0, %v188_v16  ;;  %v432_v6 = vsel %vm408_vm1, %v430_v4, %v431_v5  ;;  %v895_v14 = vrot.slane %v194_v13, 1  ;;  %v654_v16 = vsel %vm408_vm1, %v652_v11, %v653_v12  ;;  %v205_v27 = vld [vmem:[%s1272_s28 + $0xb0] sm:$0xff]  ;;  %v212_v33 = vld [vmem:[%s1272_s28 + $0x100] sm:$0xff] }
  0x21   : > { %1142 = vmatmul.msk.f32.vlgmr.msrb.gmra.mxu2 %vm269_vm0, %v411_v21  ;;  %v655_v21 = vrot.slane %v1318_v29, 1  ;;  %v901_v34 = vrot.slane %v212_v33, 1  ;;  %v214_v38 = vld [vmem:[%s1272_s28 + $0x110] sm:$0xff]  ;;  %v230_v54 = vld [vmem:[%s1272_s28 + $0x1c0] sm:$0xff] }
  0x22   : > { %1150 = vmatmul.msk.f32.vlgmr.msrb.gmra.mxu3 %vm269_vm0, %v1306_v22  ;;  %v897_v19 = vsel %vm408_vm1, %v895_v14, %v896_v15  ;;  %v656_v22 = vrot.slane %v201_v18, 1  ;;  %v223_v48 = vld [vmem:[%s1272_s28 + $0x170] sm:$0xff]  ;;  %v907_v55 = vrot.slane %v230_v54, 1  ;;  %v248_v11 = vld [vmem:[%s1272_s28 + $0x280] sm:$0xff]  ;;  %v255_v18 = vld [vmem:[%s1272_s28 + $0x2c8] sm:$0x1] }
  0x23   : > { %1158 = vmatmul.msk.f32.vlgmr.msrb.gmra.mxu0 %vm269_vm0, %v193_v25  ;;  %v899_v25 = vrot.slane %v204_v20, 1  ;;  %v232_v59 = vld [vmem:[%s1272_s28 + $0x1d0] sm:$0xff]  ;;  %v913_v12 = vrot.slane %v248_v11, 1  ;;  %v673_v20 = vrot.slane %v1390_v7, 1 }
  0x24   : > { %v657_v26 = vsel %vm408_vm1, %v655_v21, %v656_v22  ;;  %v241_v5 = vld [vmem:[%s1272_s28 + $0x230] sm:$0xff]  ;;  %v674_v21 = vrot.slane %v255_v18, 1  ;;  %v257_v22 = vld [vmem:[%s1272_s28 + $0x2e0] sm:$0xff] }
  0x28   : > { %1135 = vmatmul.msk.f32.gmra.mxu1 %vm269_vm0, %v197_v23  ;;  %v203_v23 = vld [vmem:[%s1272_s28 + $0xa0] sm:$0xff] }
  0x29   : > { %1143 = vmatmul.msk.f32.gmra.mxu2 %vm269_vm0, %v414_v28  ;;  %v898_v24 = vrot.slane %v203_v23, 1  ;;  %v210_v28 = vld [vmem:[%s1272_s28 + $0xe8] sm:$0x1] }
  0x2a   : > { %1151 = vmatmul.msk.f32.gmra.mxu3 %vm269_vm0, %v1318_v29  ;;  %v658_v29 = vrot.slane %v1330_v36, 1 }
  0x2b   : > { %1159 = vmatmul.msk.f32.gmra.mxu0 %vm269_vm0, %v202_v32  ;;  %v659_v32 = vrot.slane %v210_v28, 1  ;;  %v675_v28 = vsel %vm408_vm1, %v673_v20, %v674_v21 }
  0x30   : > { %1136 = vmatmul.msk.f32.gmra.mxu1 %vm269_vm0, %v206_v30  ;;  %v900_v30 = vsel %vm408_vm1, %v898_v24, %v899_v25 }
  0x31   : > { %1144 = vmatmul.msk.f32.gmra.mxu2 %vm269_vm0, %v417_v35  ;;  %v902_v35 = vrot.slane %v213_v31, 1 }
  0x32   : > { %1152 = vmatmul.msk.f32.gmra.mxu3 %vm269_vm0, %v1330_v36  ;;  %v661_v36 = vrot.slane %v1342_v43, 1 }
  0x33   : > { %1160 = vmatmul.msk.f32.gmra.mxu0 %vm269_vm0, %v211_v39  ;;  %v219_v39 = vld [vmem:[%s1272_s28 + $0x148] sm:$0x1]  ;;  %v903_v40 = vsel %vm408_vm1, %v901_v34, %v902_v35 }
  0x38   : > { %1137 = vmatmul.msk.f32.gmra.mxu1 %vm269_vm0, %v215_v37  ;;  %v660_v37 = vsel %vm408_vm1, %v658_v29, %v659_v32 }
  0x39   : > { %1145 = vmatmul.msk.f32.gmra.mxu2 %vm269_vm0, %v420_v42  ;;  %v662_v42 = vrot.slane %v219_v39, 1 }
  0x3a   : > { %1153 = vmatmul.msk.f32.gmra.mxu3 %vm269_vm0, %v1342_v43  ;;  %v664_v43 = vrot.slane %v1354_v50, 1 }
  0x3b   : > { %1161 = vmatmul.msk.f32.gmra.mxu0 %vm269_vm0, %v220_v46  ;;  %v905_v46 = vrot.slane %v222_v41, 1  ;;  %v663_v47 = vsel %vm408_vm1, %v661_v36, %v662_v42 }
  0x40   : > { %1138 = vmatmul.msk.f32.gmra.mxu1 %vm269_vm0, %v224_v44  ;;  %v221_v44 = vld [vmem:[%s1272_s28 + $0x160] sm:$0xff] }
  0x41   : > { %1146 = vmatmul.msk.f32.gmra.mxu2 %vm269_vm0, %v423_v49  ;;  %v904_v45 = vrot.slane %v221_v44, 1  ;;  %v228_v49 = vld [vmem:[%s1272_s28 + $0x1a8] sm:$0x1] }
  0x42   : > { %1154 = vmatmul.msk.f32.gmra.mxu3 %vm269_vm0, %v1354_v50  ;;  %v667_v50 = vrot.slane %v1366_v57, 1 }
  0x43   : > { %1162 = vmatmul.msk.f32.gmra.mxu0 %vm269_vm0, %v229_v53  ;;  %v665_v53 = vrot.slane %v228_v49, 1 }
  0x48   : > { %1139 = vmatmul.msk.f32.gmra.mxu1 %vm269_vm0, %v233_v51  ;;  %v906_v51 = vsel %vm408_vm1, %v904_v45, %v905_v46 }
  0x49   : > { %1147 = vmatmul.msk.f32.gmra.mxu2 %vm269_vm0, %v426_v56  ;;  %v908_v56 = vrot.slane %v231_v52, 1 }
  0x4a   : > { %1155 = vmatmul.msk.f32.gmra.mxu3 %vm269_vm0, %v1366_v57  ;;  %v670_v57 = vrot.slane %v1378_v0, 1 }
  0x4b   : > { %1163 = vmatmul.msk.f32.gmra.mxu0 %vm269_vm0, %v238_v60  ;;  %v237_v60 = vld [vmem:[%s1272_s28 + $0x208] sm:$0x1]  ;;  %v909_v61 = vsel %vm408_vm1, %v907_v55, %v908_v56 }
  0x50   : > { %1140 = vmatmul.msk.f32.gmra.mxu1 %vm269_vm0, %v242_v58  ;;  %v666_v58 = vsel %vm408_vm1, %v664_v43, %v665_v53 }
  0x51   : > { %1148 = vmatmul.msk.f32.gmra.mxu2 %vm269_vm0, %v429_v63  ;;  %v668_v63 = vrot.slane %v237_v60, 1 }
  0x52   : > { %1156 = vmatmul.msk.f32.gmra.mxu3 %vm269_vm0, %v1378_v0  ;;  %v258_v0 = vld [vmem:[%s1272_s28 + $0x2e8] sm:$0x1] }
  0x53   : > { %1164 = vmatmul.msk.f32.gmra.mxu0 %vm269_vm0, %v247_v3  ;;  %v911_v3 = vrot.slane %v240_v62, 1  ;;  %v669_v4 = vsel %vm408_vm1, %v667_v50, %v668_v63  ;;  %v917_v24 = vrot.slane %v258_v0, 1 }
  0x58   : > { %1141 = vmatmul.msk.f32.gmra.mxu1 %vm269_vm0, %v251_v1  ;;  %v239_v1 = vld [vmem:[%s1272_s28 + $0x220] sm:$0xff] }
  0x59   : > { %1149 = vmatmul.msk.f32.gmra.mxu2 %vm269_vm0, %v432_v6  ;;  %v910_v2 = vrot.slane %v239_v1, 1  ;;  %v246_v6 = vld [vmem:[%s1272_s28 + $0x268] sm:$0x1] }
  0x5a   : > { %1157 = vmatmul.msk.f32.gmra.mxu3 %vm269_vm0, %v1390_v7  ;;  %v671_v10 = vrot.slane %v246_v6, 1 }
  0x5b   : > { %1165 = vmatmul.msk.f32.gmra.mxu0 %vm269_vm0, %v256_v9  ;;  %v912_v8 = vsel %vm408_vm1, %v910_v2, %v911_v3  ;;  %v249_v9 = vld [vmem:[%s1272_s28 + $0x288] sm:$0x1] }
  0x5c   : > { %v672_v15 = vsel %vm408_vm1, %v670_v57, %v671_v10 }
  0x60   : > { %1166 = vmatmul.msk.f32.vlgmr.msra.gmra.mxu1 %vm269_vm0, %v654_v16  ;;  %v250_v16 = vld [vmem:[%s1272_s28 + $0x290] sm:$0xff] }
  0x61   : > { %1174 = vmatmul.msk.f32.vlgmr.msra.gmra.mxu2 %vm269_vm0, %v194_v13  ;;  %v914_v13 = vrot.slane %v249_v9, 1 }
  0x62   : > { %1182 = vmatmul.msk.f32.vlgmr.msra.gmra.mxu3 %vm269_vm0, %v196_v17 }
  0x63   : > { %1190 = vmatmul.msk.f32.vlgmr.msra.gmra.mxu0 %vm269_vm0, %v897_v19  ;;  %v915_v19 = vsel %vm408_vm1, %v913_v12, %v914_v13 }
  0x68   : > { %1167 = vmatmul.msk.f32.gmra.mxu1 %vm269_vm0, %v657_v26 }
  0x69   : > { %1175 = vmatmul.msk.f32.gmra.mxu2 %vm269_vm0, %v203_v23  ;;  %v916_v23 = vrot.slane %v257_v22, 1 }
  0x6a   : > { %1183 = vmatmul.msk.f32.gmra.mxu3 %vm269_vm0, %v205_v27 }
  0x6b   : > { %1191 = vmatmul.msk.f32.gmra.mxu0 %vm269_vm0, %v900_v30  ;;  %v259_v30 = vld [vmem:[%s1272_s28 + $0x2f0] sm:$0xff]  ;;  %v918_v7 = vsel %vm408_vm1, %v916_v23, %v917_v24 }
  0x70   : > { %1168 = vmatmul.msk.f32.gmra.mxu1 %vm269_vm0, %v660_v37 }
  0x71   : > { %1176 = vmatmul.msk.f32.gmra.mxu2 %vm269_vm0, %v212_v33 }
  0x72   : > { %1184 = vmatmul.msk.f32.gmra.mxu3 %vm269_vm0, %v214_v38 }
  0x73   : > { %1192 = vmatmul.msk.f32.gmra.mxu0 %vm269_vm0, %v903_v40 }
  0x78   : > { %1169 = vmatmul.msk.f32.gmra.mxu1 %vm269_vm0, %v663_v47 }
  0x79   : > { %1177 = vmatmul.msk.f32.gmra.mxu2 %vm269_vm0, %v221_v44 }
  0x7a   : > { %1185 = vmatmul.msk.f32.gmra.mxu3 %vm269_vm0, %v223_v48 }
  0x7b   : > { %1193 = vmatmul.msk.f32.gmra.mxu0 %vm269_vm0, %v906_v51 }
  0x80   : > { %1170 = vmatmul.msk.f32.gmra.mxu1 %vm269_vm0, %v666_v58 }
  0x81   : > { %1178 = vmatmul.msk.f32.gmra.mxu2 %vm269_vm0, %v230_v54 }
  0x82   : > { %1186 = vmatmul.msk.f32.gmra.mxu3 %vm269_vm0, %v232_v59 }
  0x83   : > { %1194 = vmatmul.msk.f32.gmra.mxu0 %vm269_vm0, %v909_v61 }
  0x88   : > { %1171 = vmatmul.msk.f32.gmra.mxu1 %vm269_vm0, %v669_v4 }
  0x89   : > { %1179 = vmatmul.msk.f32.gmra.mxu2 %vm269_vm0, %v239_v1 }
  0x8a   : > { %1187 = vmatmul.msk.f32.gmra.mxu3 %vm269_vm0, %v241_v5 }
  0x8b   : > { %1195 = vmatmul.msk.f32.gmra.mxu0 %vm269_vm0, %v912_v8 }
  0x8d   : > { %v1468_v14 = vpop.f32.mrf.mxu1 }
  0x90   : > { %v311_v17 = vpop.f32.mrf.mxu0  ;;  %1172 = vmatmul.msk.f32.gmra.mxu1 %vm269_vm0, %v672_v15 }
  0x91   : > { %1180 = vmatmul.msk.f32.gmra.mxu2 %vm269_vm0, %v248_v11 }
  0x92   : > { %1188 = vmatmul.msk.f32.gmra.mxu3 %vm269_vm0, %v250_v16 }
  0x93   : > { %1196 = vmatmul.msk.f32.gmra.mxu0 %vm269_vm0, %v915_v19 }
  0x94   : > { %v1481_v25 = vpop.f32.mrf.mxu2 }
  0x95   : > { %v1483_v26 = vpop.f32.mrf.mxu3  ;;  %v1485_v27 = vpop.f32.mrf.mxu1 }
  0x98   : > { %v314_v31 = vpop.f32.mrf.mxu0  ;;  %1173 = vmatmul.msk.f32.gmra.mxu1 %vm269_vm0, %v675_v28 }
  0x99   : > { %1181 = vmatmul.msk.f32.gmra.mxu2 %vm269_vm0, %v257_v22 }
  0x9a   : > { %1189 = vmatmul.msk.f32.gmra.mxu3 %vm269_vm0, %v259_v30 }
  0x9b   : > { %1197 = vmatmul.msk.f32.gmra.mxu0 %vm269_vm0, %v918_v7 }
  0x9c   : > { %v1494_v29 = vpop.f32.mrf.mxu2 }
  0x9d   : > { %v1496_v32 = vpop.f32.mrf.mxu3  ;;  %v376_v33 = vpop.f32.mrf.mxu1 }
  0x9e   : > { %v377_v63 = vadd.f32 %v376_v33, %v311_v17 }
  0xa0   : > { %v612_v34 = vpop.f32.mrf.mxu0 }
  0xa4   : > { %v466_v35 = vpop.f32.mrf.mxu2 }
  0xa5   : > { %v539_v37 = vpop.f32.mrf.mxu3  ;;  %v379_v38 = vpop.f32.mrf.mxu1  ;;  %v490_v2 = vadd.f32 %v466_v35, %v377_v63 }
  0xa6   : > { %v380_v8 = vadd.f32 %v379_v38, %v314_v31 }
  0xa7   : > { %v563_v4 = vadd.f32 %v539_v37, %v490_v2 }
  0xa8   : > { %v615_v39 = vpop.f32.mrf.mxu0 }
  0xa9   : > { %v636_v57 = vadd.f32 %v612_v34, %v563_v4 }
  0xac   : > { %v469_v40 = vpop.f32.mrf.mxu2 }
  0xad   : > { %v542_v41 = vpop.f32.mrf.mxu3  ;;  %v382_v36 = vpop.f32.mrf.mxu1  ;;  %v491_v10 = vadd.f32 %v469_v40, %v380_v8 }
  0xae   : > { %v383_v18 = vadd.f32 %v382_v36, %v1468_v14 }
  0xaf   : > { %v564_v13 = vadd.f32 %v542_v41, %v491_v10 }
  0xb0   : > { %v618_v42 = vpop.f32.mrf.mxu0 }
  0xb1   : > { %v637_v20 = vadd.f32 %v615_v39, %v564_v13 }
  0xb4   : > { %v472_v44 = vpop.f32.mrf.mxu2 }
  0xb5   : > { %v545_v45 = vpop.f32.mrf.mxu3  ;;  %v385_v46 = vpop.f32.mrf.mxu1  ;;  %v492_v21 = vadd.f32 %v472_v44, %v383_v18 }
  0xb6   : > { %v386_v14 = vadd.f32 %v385_v46, %v1485_v27 }
  0xb7   : > { %v565_v28 = vadd.f32 %v545_v45, %v492_v21 }
  0xb8   : > { %v1498_v47 = vpop.f32.mrf.mxu0 }
  0xb9   : > { %v638_v35 = vadd.f32 %v618_v42, %v565_v28 }
  0xbc   : > { %v475_v48 = vpop.f32.mrf.mxu2 }
  0xbd   : > { %v548_v49 = vpop.f32.mrf.mxu3  ;;  %v388_v51 = vpop.f32.mrf.mxu1  ;;  %v493_v37 = vadd.f32 %v475_v48, %v386_v14 }
  0xbe   : > { %v389_v8 = vadd.f32 %v388_v51, %v1481_v25 }
  0xbf   : > { %v566_v63 = vadd.f32 %v548_v49, %v493_v37 }
  0xc0   : > { %v1500_v52 = vpop.f32.mrf.mxu0 }
  0xc1   : > { %v639_v42 = vadd.f32 %v1498_v47, %v566_v63 }
  0xc4   : > { %v1502_v43 = vpop.f32.mrf.mxu2 }
  0xc5   : > { %v1504_v53 = vpop.f32.mrf.mxu3  ;;  %v1506_v54 = vpop.f32.mrf.mxu1  ;;  %v494_v48 = vadd.f32 %v1502_v43, %v389_v8 }
  0xc6   : > { %v392_v25 = vadd.f32 %v1506_v54, %v1494_v29 }
  0xc7   : > { %v567_v49 = vadd.f32 %v1504_v53, %v494_v48 }
  0xc8   : > { %v1508_v55 = vpop.f32.mrf.mxu0 }
  0xc9   : > { %v640_v43 = vadd.f32 %v1500_v52, %v567_v49 }
  0xcc   : > { %v1510_v56 = vpop.f32.mrf.mxu2 }
  0xcd   : > { %v1512_v58 = vpop.f32.mrf.mxu3  ;;  %v1514_v59 = vpop.f32.mrf.mxu1  ;;  %v495_v18 = vadd.f32 %v1510_v56, %v392_v25 }
  0xce   : > { %v395_v29 = vadd.f32 %v1514_v59, %v1483_v26 }
  0xd0   : > { %v1516_v60 = vpop.f32.mrf.mxu0 }
  0xd4   : > { %v1518_v61 = vpop.f32.mrf.mxu2 }
  0xd5   : > { %v1520_v62 = vpop.f32.mrf.mxu3  ;;  %v1522_v50 = vpop.f32.mrf.mxu1  ;;  %v496_v56 = vadd.f32 %v1518_v61, %v395_v29 }
  0xd6   : > { %v398_v26 = vadd.f32 %v1522_v50, %v1496_v32 }
  0xd8   : > { %v1524_v1 = vpop.f32.mrf.mxu0 }
  0xdc   : > { %v1526_v3 = vpop.f32.mrf.mxu2 }
  0xdd   : > { %v1528_v5 = vpop.f32.mrf.mxu3  ;;  %v709_v6 = vpop.f32.mrf.mxu1  ;;  %v497_v61 = vadd.f32 %v1526_v3, %v398_v26 }
  0xde   : > { %v733_v11 = vadd.f32 %v709_v6, %v636_v57 }
  0xe0   : > { %v952_v9 = vpop.f32.mrf.mxu0 }
  0xe4   : > { %v782_v12 = vpop.f32.mrf.mxu2 }
  0xe5   : > { %v806_v15 = vadd.f32 %v782_v12, %v733_v11  ;;  %v855_v16 = vpop.f32.mrf.mxu3  ;;  %v712_v17 = vpop.f32.mrf.mxu1 }
  0xe6   : > { %v734_v23 = vadd.f32 %v712_v17, %v637_v20 }
  0xe7   : > { %v879_v19 = vadd.f32 %v855_v16, %v806_v15 }
  0xe8   : > { %v955_v0 = vpop.f32.mrf.mxu0 }
  0xe9   : > { %v976_v22 = vadd.f32 %v952_v9, %v879_v19 }
  0xeb   : > { %984 = vst [vmem:[%s1535_s15] sm:$0xff] %v976_v22  ;;  %v1005_v40 = vmul.f32 %v976_v22, %v976_v22 }
  0xec   : > { %v785_v24 = vpop.f32.mrf.mxu2 }
  0xed   : > { %v807_v30 = vadd.f32 %v785_v24, %v734_v23  ;;  %v858_v31 = vpop.f32.mrf.mxu3  ;;  %v715_v7 = vpop.f32.mrf.mxu1 }
  0xee   : > { %v735_v41 = vadd.f32 %v715_v7, %v638_v35  ;;  %v569_v35 = vadd.f32 %v1520_v62, %v496_v56 }
  0xef   : > { %v880_v33 = vadd.f32 %v858_v31, %v807_v30 }
  0xf0   : > { %v958_v34 = vpop.f32.mrf.mxu0  ;;  %v642_v59 = vadd.f32 %v1516_v60, %v569_v35 }
  0xf1   : > { %v977_v38 = vadd.f32 %v955_v0, %v880_v33 }
  0xf3   : > { %985 = vst [vmem:[%s1535_s15 + $0x8] sm:$0xff] %v977_v38  ;;  %v992_v39 = vadd.f32 %v977_v38, %v976_v22  ;;  %v1006_v36 = vmul.f32 %v977_v38, %v977_v38  ;;  %v568_v22 = vadd.f32 %v1512_v58, %v495_v18 }
  0xf4   : > { %v788_v44 = vpop.f32.mrf.mxu2 }
  0xf5   : > { %v1013_v2 = vadd.f32 %v1006_v36, %v1005_v40  ;;  %v808_v45 = vadd.f32 %v788_v44, %v735_v41  ;;  %v861_v4 = vpop.f32.mrf.mxu3  ;;  %v718_v6 = vpop.f32.mrf.mxu1  ;;  %v641_v52 = vadd.f32 %v1508_v55, %v568_v22 }
  0xf6   : > { %v736_v57 = vadd.f32 %v718_v6, %v639_v42 }
  0xf7   : > { %v881_v27 = vadd.f32 %v861_v4, %v808_v45  ;;  %v570_v45 = vadd.f32 %v1528_v5, %v497_v61 }
  0xf8   : > { %v961_v46 = vpop.f32.mrf.mxu0 }
  0xf9   : > { %v978_v9 = vadd.f32 %v958_v34, %v881_v27  ;;  %v643_v60 = vadd.f32 %v1524_v1, %v570_v45 }
  0xfb   : > { %986 = vst [vmem:[%s1535_s15 + $0x10] sm:$0xff] %v978_v9  ;;  %v993_v10 = vadd.f32 %v992_v39, %v978_v9  ;;  %v1007_v11 = vmul.f32 %v978_v9, %v978_v9 }
  0xfc   : > { %v791_v12 = vpop.f32.mrf.mxu2 }
  0xfd   : > { %v1014_v13 = vadd.f32 %v1013_v2, %v1007_v11  ;;  %v809_v15 = vadd.f32 %v791_v12, %v736_v57  ;;  %v864_v16 = vpop.f32.mrf.mxu3  ;;  %v721_v17 = vpop.f32.mrf.mxu1 }
  0xfe   : > { %v737_v0 = vadd.f32 %v721_v17, %v640_v43 }
  0xff   : > { %v882_v51 = vadd.f32 %v864_v16, %v809_v15 }
 0x100   : > { %v964_v47 = vpop.f32.mrf.mxu0 }
 0x101   : > { %v979_v19 = vadd.f32 %v961_v46, %v882_v51 }
 0x103   : > { %987 = vst [vmem:[%s1535_s15 + $0x18] sm:$0xff] %v979_v19  ;;  %v994_v20 = vadd.f32 %v993_v10, %v979_v19  ;;  %v1008_v21 = vmul.f32 %v979_v19, %v979_v19 }
 0x104   : > { %v794_v53 = vpop.f32.mrf.mxu2 }
 0x105   : > { %v1015_v23 = vadd.f32 %v1014_v13, %v1008_v21  ;;  %v810_v24 = vadd.f32 %v794_v53, %v737_v0  ;;  %v867_v28 = vpop.f32.mrf.mxu3  ;;  %v724_v30 = vpop.f32.mrf.mxu1 }
 0x106   : > { %v738_v14 = vadd.f32 %v724_v30, %v641_v52 }
 0x107   : > { %v883_v54 = vadd.f32 %v867_v28, %v810_v24 }
 0x108   : > { %v967_v7 = vpop.f32.mrf.mxu0 }
 0x109   : > { %v980_v31 = vadd.f32 %v964_v47, %v883_v54 }
 0x10b   : > { %988 = vst [vmem:[%s1535_s15 + $0x20] sm:$0xff] %v980_v31  ;;  %v995_v33 = vadd.f32 %v994_v20, %v980_v31  ;;  %v1009_v34 = vmul.f32 %v980_v31, %v980_v31 }
 0x10c   : > { %v797_v58 = vpop.f32.mrf.mxu2 }
 0x10d   : > { %v1016_v37 = vadd.f32 %v1015_v23, %v1009_v34  ;;  %v811_v38 = vadd.f32 %v797_v58, %v738_v14  ;;  %v870_v40 = vpop.f32.mrf.mxu3  ;;  %v727_v41 = vpop.f32.mrf.mxu1 }
 0x10e   : > { %v739_v36 = vadd.f32 %v727_v41, %v642_v59 }
 0x10f   : > { %v884_v55 = vadd.f32 %v870_v40, %v811_v38 }
 0x110   : > { %v970_v62 = vpop.f32.mrf.mxu0 }
 0x111   : > { %v981_v39 = vadd.f32 %v967_v7, %v884_v55 }
 0x113   : > { %989 = vst [vmem:[%s1535_s15 + $0x28] sm:$0xff] %v981_v39  ;;  %v996_v44 = vadd.f32 %v995_v33, %v981_v39  ;;  %v1010_v63 = vmul.f32 %v981_v39, %v981_v39 }
 0x114   : > { %v800_v2 = vpop.f32.mrf.mxu2 }
 0x115   : > { %v1017_v4 = vadd.f32 %v1016_v37, %v1010_v63  ;;  %v812_v6 = vadd.f32 %v800_v2, %v739_v36  ;;  %v873_v8 = vpop.f32.mrf.mxu3  ;;  %v730_v50 = vpop.f32.mrf.mxu1 }
 0x116   : > { %v740_v3 = vadd.f32 %v730_v50, %v643_v60 }
 0x117   : > { %v885_v32 = vadd.f32 %v873_v8, %v812_v6 }
 0x118   : > { %v973_v5 = vpop.f32.mrf.mxu0 }
 0x119   : > { %v982_v27 = vadd.f32 %v970_v62, %v885_v32 }
 0x11b   : > { %990 = vst [vmem:[%s1535_s15 + $0x30] sm:$0xff] %v982_v27  ;;  %v997_v46 = vadd.f32 %v996_v44, %v982_v27  ;;  %v1011_v42 = vmul.f32 %v982_v27, %v982_v27 }
 0x11c   : > { %v803_v48 = vpop.f32.mrf.mxu2 }
 0x11d   : > { %v1018_v9 = vadd.f32 %v1017_v4, %v1011_v42  ;;  %v813_v57 = vadd.f32 %v803_v48, %v740_v3  ;;  %v876_v10 = vpop.f32.mrf.mxu3 }
 0x11f   : > { %v886_v11 = vadd.f32 %v876_v10, %v813_v57 }
 0x121   : > { %v983_v12 = vadd.f32 %v973_v5, %v886_v11 }
 0x123   : > { %991 = vst [vmem:[%s1535_s15 + $0x38] sm:$0xff] %v983_v12  ;;  %v998_v49 = vadd.f32 %v997_v46, %v983_v12  ;;  %v1012_v13 = vmul.f32 %v983_v12, %v983_v12 }
 0x125   : > { %v999_v15 = vrot.slane %v998_v49, 4  ;;  %v1019_v16 = vadd.f32 %v1018_v9, %v1012_v13 }
 0x127   : > { %v1000_v1 = vadd.f32 %v999_v15, %v998_v49  ;;  %v1020_v17 = vrot.slane %v1019_v16, 4 }
 0x129   : > { %v1001_v25 = vrot.slane %v1000_v1, 2  ;;  %v1021_v51 = vadd.f32 %v1020_v17, %v1019_v16 }
 0x12b   : > { %v1002_v47 = vadd.f32 %v1001_v25, %v1000_v1  ;;  %v1022_v43 = vrot.slane %v1021_v51, 2 }
 0x12d   : > { %v1003_v18 = vrot.slane %v1002_v47, 1  ;;  %v1023_v19 = vadd.f32 %v1022_v43, %v1021_v51 }
 0x12f   : > { %v1024_v0 = vrot.slane %v1023_v19, 1  ;;  %v1004_v20 = vadd.f32 %v1003_v18, %v1002_v47 }
 0x131   : > { %v1025_v21 = vadd.f32 %v1024_v0, %v1023_v19 }
 0x133   : > { %v1027_v53 = vsel %vm1026_vm2, %v1004_v20, %v1025_v21 }
 0x134   : > { %1028 = vst [vmem:[%s187_s19] sm:$0x3] %v1027_v53 }
 0x135 PF: > { %s14_s12 = sadd.s32 1, %s1218_s12  }
 0x136   : > { %p11_p5 = scmp.ge.s32.totalorder %s14_s12, 4  }
 0x138   :  { %13 = sbr.rel (!%p11_p5) target bundleno = 1 (0x1), region = 70 }

</bundles_post_ra>
